<compile_context>
chip_gen: v7x
topology: tpu7x:2x2x1
jax: 0.10.0
libtpu: 0.0.40
codegen_flags: <defaults>
</compile_context>

<pallas_src>
import jax
import jax.numpy as jnp
from jax.experimental import pallas as pl
from jax.experimental.pallas import tpu as pltpu

# ---- model constants (mirror the PyTorch module) ----
BETA = 1.0
THRESH = 1.0
NUM_HIDDEN = 31
NUM_INPUTS = 8 * 8
NUM_OUTPUTS = 10
NUM_STEPS = 25
PAD = 128  # lane-padded feature width used for every layer inside the kernel


def _leaky_step_ref(inp, mem_prev):
    """Full snn.Leaky(beta=1, threshold=1, reset_mechanism='zero', reset_delay=False)."""
    f32 = jnp.float32
    reset = (mem_prev > THRESH).astype(f32)
    mem = (1.0 - reset) * mem_prev
    mem = BETA * mem + inp
    spk = (mem > THRESH).astype(f32)
    do_reset = spk - reset
    mem = mem - do_reset * mem
    return spk, mem


def _fast_step(inp, mem_prev):
    """Simplified leaky step + clamp.  Bit-exact with (_leaky_step_ref + clip) under the
    invariant mem_prev <= THRESH, which is guaranteed here because BETA == 1, the reset
    mechanism is 'zero', reset_delay is False and mem is clamped to [-1, 1] every step
    (so the `reset` branch of the full step is always dead)."""
    mem = mem_prev + inp
    fire = mem > THRESH
    spk = fire.astype(jnp.float32)
    mem = jnp.where(fire, 0.0, mem)          # zero-reset (reset_delay=False)
    mem = jnp.maximum(mem, -THRESH)          # lower clamp; upper bound enforced by reset
    return spk, mem


def snn_kernel(x_ref, w1t_ref, w2t_ref, spk2_out_ref, mem2_out_ref, traj_ref):
    """One padded batch tile, fully VMEM-resident.  Three unrolled VPU recurrences with
    the two linears hoisted into a single batched MXU matmul each; one reusable scratch
    buffer holds (in turn) the spk0 trajectory, cur1, the spk1 trajectory and cur2."""
    f32 = jnp.float32
    x = x_ref[...]            # (BT, PAD)   zero-padded constant input drive
    w1t = w1t_ref[...]        # (PAD, PAD)  zero-padded fc1.weight.T
    w2t = w2t_ref[...]        # (PAD, PAD)  zero-padded fc2.weight.T
    bt = x.shape[0]
    zeros = jnp.zeros((bt, PAD), f32)

    # --- layer 0: spike generator (serial, VPU only) -------------------------------
    mem0 = zeros
    spk0 = zeros
    for t in range(NUM_STEPS):                       # static unroll, static stores
        traj_ref[t * bt:(t + 1) * bt, :] = spk0      # spk0 entering step t
        spk0, mem0 = _fast_step(x, mem0)

    # --- fc1 for ALL time steps in one MXU matmul: (T*BT,128) @ (128,128) ----------
    cur1_all = jnp.dot(traj_ref[...], w1t, preferred_element_type=f32)
    traj_ref[...] = cur1_all                         # buffer now holds cur1

    # --- layer 1 leaky recurrence: load cur1 row FIRST, then reuse row for spk1 ----
    mem1 = zeros
    spk1 = zeros
    for t in range(NUM_STEPS):
        cur1_t = traj_ref[t * bt:(t + 1) * bt, :]    # load before overwrite
        traj_ref[t * bt:(t + 1) * bt, :] = spk1      # spk1 entering step t
        spk1, mem1 = _fast_step(cur1_t, mem1)

    # --- fc2 for ALL time steps in one MXU matmul -----------------------------------
    cur2_all = jnp.dot(traj_ref[...], w2t, preferred_element_type=f32)
    traj_ref[...] = cur2_all                         # buffer now holds cur2

    # --- layer 2 leaky recurrence + lane-dense recording (full-vreg stores) ---------
    mem2 = zeros
    spk2 = zeros
    for t in range(NUM_STEPS):
        spk2_out_ref[t] = spk2                       # record spk2 entering step t
        cur2_t = traj_ref[t * bt:(t + 1) * bt, :]
        spk2, mem2 = _fast_step(cur2_t, mem2)
        mem2_out_ref[t] = mem2                       # record clamped mem2 after step t


def snn_forward(x, w1, w2, *, batch_tile=128):
    """x: (B, NUM_INPUTS); w1: (NUM_HIDDEN, NUM_INPUTS); w2: (NUM_OUTPUTS, NUM_HIDDEN).
    Returns (spk2_rec, mem2_rec), each (NUM_STEPS, B, NUM_OUTPUTS)."""
    f32 = jnp.float32
    B = x.shape[0]
    bt = max(8, min(((B + 7) // 8) * 8, ((batch_tile + 7) // 8) * 8))  # sublane-aligned tile
    Bp = ((B + bt - 1) // bt) * bt                                      # padded batch
    grid = (Bp // bt,)

    # zero-pad to TPU-native tiles; padding is exactly preserved as zeros by the
    # leaky dynamics, so results are identical after slicing.
    x_p = jnp.zeros((Bp, PAD), f32).at[:B, :NUM_INPUTS].set(x.astype(f32))
    w1t_p = jnp.zeros((PAD, PAD), f32).at[:NUM_INPUTS, :NUM_HIDDEN].set(
        jnp.transpose(w1).astype(f32))
    w2t_p = jnp.zeros((PAD, PAD), f32).at[:NUM_HIDDEN, :NUM_OUTPUTS].set(
        jnp.transpose(w2).astype(f32))

    out_shape = (
        jax.ShapeDtypeStruct((NUM_STEPS, Bp, PAD), f32),
        jax.ShapeDtypeStruct((NUM_STEPS, Bp, PAD), f32),
    )
    spk2_p, mem2_p = pl.pallas_call(
        snn_kernel,
        out_shape=out_shape,
        grid=grid,
        in_specs=[
            pl.BlockSpec((bt, PAD), lambda i: (i, 0)),        # x tile
            pl.BlockSpec((PAD, PAD), lambda i: (0, 0)),       # fc1.weight.T (shared)
            pl.BlockSpec((PAD, PAD), lambda i: (0, 0)),       # fc2.weight.T (shared)
        ],
        out_specs=(
            pl.BlockSpec((NUM_STEPS, bt, PAD), lambda i: (0, i, 0)),
            pl.BlockSpec((NUM_STEPS, bt, PAD), lambda i: (0, i, 0)),
        ),
        scratch_shapes=[
            pltpu.VMEM((NUM_STEPS * bt, PAD), f32),           # shared trajectory / cur buffer
        ],
        compiler_params=pltpu.CompilerParams(
            dimension_semantics=("parallel",)),               # megacore-shardable batch grid
    )(x_p, w1t_p, w2t_p)

    # Outputs stay lane-padded to 128 (only 10 lanes real) so the in-kernel stores are
    # full-vreg; for very large batches fuse the downstream spike-count reduction into
    # the kernel to cut the extra HBM writeback.
    return spk2_p[:, :B, :NUM_OUTPUTS], mem2_p[:, :B, :NUM_OUTPUTS]


def snn_forward_ref(x, w1, w2):
    """Pure-JAX reference of the PyTorch forward (full leaky-step semantics)."""
    B = x.shape[0]
    f32 = jnp.float32
    mem0 = jnp.zeros((B, NUM_INPUTS), f32)
    mem1 = jnp.zeros((B, NUM_HIDDEN), f32)
    mem2 = jnp.zeros((B, NUM_OUTPUTS), f32)
    spk0 = jnp.zeros((B, NUM_INPUTS), f32)
    spk1 = jnp.zeros((B, NUM_HIDDEN), f32)
    spk2 = jnp.zeros((B, NUM_OUTPUTS), f32)
    spk2_rec, mem2_rec = [], []
    for _ in range(NUM_STEPS):
        spk0_next, mem0 = _leaky_step_ref(x, mem0)
        cur1 = spk0 @ w1.T
        spk1_next, mem1 = _leaky_step_ref(cur1, mem1)
        cur2 = spk1 @ w2.T
        spk2_next, mem2 = _leaky_step_ref(cur2, mem2)
        mem0 = jnp.clip(mem0, -THRESH, THRESH)
        mem1 = jnp.clip(mem1, -THRESH, THRESH)
        mem2 = jnp.clip(mem2, -THRESH, THRESH)
        spk2_rec.append(spk2)
        mem2_rec.append(mem2)
        spk0, spk1, spk2 = spk0_next, spk1_next, spk2_next
    return jnp.stack(spk2_rec, 0), jnp.stack(mem2_rec, 0)


if __name__ == "__main__":
    key = jax.random.PRNGKey(0)
    kx, k1, k2 = jax.random.split(key, 3)

    batch = 2
    # input drive in [0, 1) so the spike generator fires within a few steps
    x = jax.random.uniform(kx, (batch, NUM_INPUTS), dtype=jnp.float32)

    # deterministic "kaiming-uniform-like" init: U(-1/sqrt(fan_in), 1/sqrt(fan_in))
    b1 = 1.0 / jnp.sqrt(jnp.float32(NUM_INPUTS))
    b2 = 1.0 / jnp.sqrt(jnp.float32(NUM_HIDDEN))
    w1 = jax.random.uniform(k1, (NUM_HIDDEN, NUM_INPUTS), jnp.float32, -b1, b1)
    w2 = jax.random.uniform(k2, (NUM_OUTPUTS, NUM_HIDDEN), jnp.float32, -b2, b2)

    spk2_rec, mem2_rec = jax.block_until_ready(snn_forward(x, w1, w2))

    spk2_ref, mem2_ref = snn_forward_ref(x, w1, w2)
    assert spk2_rec.shape == (NUM_STEPS, batch, NUM_OUTPUTS)
    assert mem2_rec.shape == (NUM_STEPS, batch, NUM_OUTPUTS)
    assert jnp.allclose(spk2_rec, spk2_ref, atol=1e-5)
    assert jnp.allclose(mem2_rec, mem2_ref, atol=1e-5)

    print("KERNEL_OK")
</pallas_src>

<mosaic_0001>
module attributes {stable_mosaic.version = 11 : i64} {
  func.func @snn_kernel(%arg0: i32, %arg1: memref<8x128xf32, #tpu.memory_space<vmem>>, %arg2: memref<128x128xf32, #tpu.memory_space<vmem>>, %arg3: memref<128x128xf32, #tpu.memory_space<vmem>>, %arg4: memref<25x8x128xf32, #tpu.memory_space<vmem>>, %arg5: memref<25x8x128xf32, #tpu.memory_space<vmem>>, %arg6: memref<200x128xf32, #tpu.memory_space<vmem>>) attributes {dimension_semantics = [#tpu.dimension_semantics<parallel>], iteration_bounds = array<i64: 1>, scalar_prefetch = 0 : i64, scratch_operands = 1 : i64, tpu.core_type = #tpu.core_type<tc>, window_params = [{transform_indices = @transform_0, window_bounds = array<i64: 8, 128>}, {pipeline_mode = #tpu.pipeline_mode<synchronous>, transform_indices = @transform_1, window_bounds = array<i64: 128, 128>}, {pipeline_mode = #tpu.pipeline_mode<synchronous>, transform_indices = @transform_2, window_bounds = array<i64: 128, 128>}, {transform_indices = @transform_3, window_bounds = array<i64: 25, 8, 128>}, {transform_indices = @transform_4, window_bounds = array<i64: 25, 8, 128>}]} {
    %c0 = arith.constant 0 : index
    %c0_0 = arith.constant 0 : index
    %0 = vector.load %arg1[%c0, %c0_0] : memref<8x128xf32, #tpu.memory_space<vmem>>, vector<8x128xf32>
    %c0_1 = arith.constant 0 : index
    %c0_2 = arith.constant 0 : index
    %1 = vector.load %arg2[%c0_1, %c0_2] : memref<128x128xf32, #tpu.memory_space<vmem>>, vector<128x128xf32>
    %c0_3 = arith.constant 0 : index
    %c0_4 = arith.constant 0 : index
    %2 = vector.load %arg3[%c0_3, %c0_4] : memref<128x128xf32, #tpu.memory_space<vmem>>, vector<128x128xf32>
    %cst = arith.constant 0.000000e+00 : f32
    %3 = vector.broadcast %cst : f32 to vector<8x128xf32>
    %c0_5 = arith.constant 0 : index
    %c0_6 = arith.constant 0 : index
    %4 = vector.load %arg6[%c0_5, %c0_6] : memref<200x128xf32, #tpu.memory_space<vmem>>, vector<8x128xf32>
    tpu.vector_store %arg6[%c0_5, %c0_6], %3 {strides = array<i32>} : memref<200x128xf32, #tpu.memory_space<vmem>>, vector<8x128xf32>,
    %5 = arith.addf %3, %0 : vector<8x128xf32>
    %cst_7 = arith.constant 1.000000e+00 : f32
    %6 = vector.broadcast %cst_7 : f32 to vector<8x128xf32>
    %7 = arith.cmpf ogt, %5, %6 : vector<8x128xf32>
    %8 = arith.extui %7 : vector<8x128xi1> to vector<8x128xi32>
    %9 = arith.sitofp %8 : vector<8x128xi32> to vector<8x128xf32>
    %cst_8 = arith.constant 0.000000e+00 : f32
    %10 = vector.broadcast %cst_8 : f32 to vector<8x128xf32>
    %11 = arith.select %7, %10, %5 : vector<8x128xi1>, vector<8x128xf32>
    %cst_9 = arith.constant -1.000000e+00 : f32
    %12 = vector.broadcast %cst_9 : f32 to vector<8x128xf32>
    %13 = arith.maximumf %11, %12 : vector<8x128xf32>
    %c8 = arith.constant 8 : index
    %c0_10 = arith.constant 0 : index
    %14 = vector.load %arg6[%c8, %c0_10] : memref<200x128xf32, #tpu.memory_space<vmem>>, vector<8x128xf32>
    tpu.vector_store %arg6[%c8, %c0_10], %9 {strides = array<i32>} : memref<200x128xf32, #tpu.memory_space<vmem>>, vector<8x128xf32>,
    %15 = arith.addf %13, %0 : vector<8x128xf32>
    %cst_11 = arith.constant 1.000000e+00 : f32
    %16 = vector.broadcast %cst_11 : f32 to vector<8x128xf32>
    %17 = arith.cmpf ogt, %15, %16 : vector<8x128xf32>
    %18 = arith.extui %17 : vector<8x128xi1> to vector<8x128xi32>
    %19 = arith.sitofp %18 : vector<8x128xi32> to vector<8x128xf32>
    %cst_12 = arith.constant 0.000000e+00 : f32
    %20 = vector.broadcast %cst_12 : f32 to vector<8x128xf32>
    %21 = arith.select %17, %20, %15 : vector<8x128xi1>, vector<8x128xf32>
    %cst_13 = arith.constant -1.000000e+00 : f32
    %22 = vector.broadcast %cst_13 : f32 to vector<8x128xf32>
    %23 = arith.maximumf %21, %22 : vector<8x128xf32>
    %c16 = arith.constant 16 : index
    %c0_14 = arith.constant 0 : index
    %24 = vector.load %arg6[%c16, %c0_14] : memref<200x128xf32, #tpu.memory_space<vmem>>, vector<8x128xf32>
    tpu.vector_store %arg6[%c16, %c0_14], %19 {strides = array<i32>} : memref<200x128xf32, #tpu.memory_space<vmem>>, vector<8x128xf32>,
    %25 = arith.addf %23, %0 : vector<8x128xf32>
    %cst_15 = arith.constant 1.000000e+00 : f32
    %26 = vector.broadcast %cst_15 : f32 to vector<8x128xf32>
    %27 = arith.cmpf ogt, %25, %26 : vector<8x128xf32>
    %28 = arith.extui %27 : vector<8x128xi1> to vector<8x128xi32>
    %29 = arith.sitofp %28 : vector<8x128xi32> to vector<8x128xf32>
    %cst_16 = arith.constant 0.000000e+00 : f32
    %30 = vector.broadcast %cst_16 : f32 to vector<8x128xf32>
    %31 = arith.select %27, %30, %25 : vector<8x128xi1>, vector<8x128xf32>
    %cst_17 = arith.constant -1.000000e+00 : f32
    %32 = vector.broadcast %cst_17 : f32 to vector<8x128xf32>
    %33 = arith.maximumf %31, %32 : vector<8x128xf32>
    %c24 = arith.constant 24 : index
    %c0_18 = arith.constant 0 : index
    %34 = vector.load %arg6[%c24, %c0_18] : memref<200x128xf32, #tpu.memory_space<vmem>>, vector<8x128xf32>
    tpu.vector_store %arg6[%c24, %c0_18], %29 {strides = array<i32>} : memref<200x128xf32, #tpu.memory_space<vmem>>, vector<8x128xf32>,
    %35 = arith.addf %33, %0 : vector<8x128xf32>
    %cst_19 = arith.constant 1.000000e+00 : f32
    %36 = vector.broadcast %cst_19 : f32 to vector<8x128xf32>
    %37 = arith.cmpf ogt, %35, %36 : vector<8x128xf32>
    %38 = arith.extui %37 : vector<8x128xi1> to vector<8x128xi32>
    %39 = arith.sitofp %38 : vector<8x128xi32> to vector<8x128xf32>
    %cst_20 = arith.constant 0.000000e+00 : f32
    %40 = vector.broadcast %cst_20 : f32 to vector<8x128xf32>
    %41 = arith.select %37, %40, %35 : vector<8x128xi1>, vector<8x128xf32>
    %cst_21 = arith.constant -1.000000e+00 : f32
    %42 = vector.broadcast %cst_21 : f32 to vector<8x128xf32>
    %43 = arith.maximumf %41, %42 : vector<8x128xf32>
    %c32 = arith.constant 32 : index
    %c0_22 = arith.constant 0 : index
    %44 = vector.load %arg6[%c32, %c0_22] : memref<200x128xf32, #tpu.memory_space<vmem>>, vector<8x128xf32>
    tpu.vector_store %arg6[%c32, %c0_22], %39 {strides = array<i32>} : memref<200x128xf32, #tpu.memory_space<vmem>>, vector<8x128xf32>,
    %45 = arith.addf %43, %0 : vector<8x128xf32>
    %cst_23 = arith.constant 1.000000e+00 : f32
    %46 = vector.broadcast %cst_23 : f32 to vector<8x128xf32>
    %47 = arith.cmpf ogt, %45, %46 : vector<8x128xf32>
    %48 = arith.extui %47 : vector<8x128xi1> to vector<8x128xi32>
    %49 = arith.sitofp %48 : vector<8x128xi32> to vector<8x128xf32>
    %cst_24 = arith.constant 0.000000e+00 : f32
    %50 = vector.broadcast %cst_24 : f32 to vector<8x128xf32>
    %51 = arith.select %47, %50, %45 : vector<8x128xi1>, vector<8x128xf32>
    %cst_25 = arith.constant -1.000000e+00 : f32
    %52 = vector.broadcast %cst_25 : f32 to vector<8x128xf32>
    %53 = arith.maximumf %51, %52 : vector<8x128xf32>
    %c40 = arith.constant 40 : index
    %c0_26 = arith.constant 0 : index
    %54 = vector.load %arg6[%c40, %c0_26] : memref<200x128xf32, #tpu.memory_space<vmem>>, vector<8x128xf32>
    tpu.vector_store %arg6[%c40, %c0_26], %49 {strides = array<i32>} : memref<200x128xf32, #tpu.memory_space<vmem>>, vector<8x128xf32>,
    %55 = arith.addf %53, %0 : vector<8x128xf32>
    %cst_27 = arith.constant 1.000000e+00 : f32
    %56 = vector.broadcast %cst_27 : f32 to vector<8x128xf32>
    %57 = arith.cmpf ogt, %55, %56 : vector<8x128xf32>
    %58 = arith.extui %57 : vector<8x128xi1> to vector<8x128xi32>
    %59 = arith.sitofp %58 : vector<8x128xi32> to vector<8x128xf32>
    %cst_28 = arith.constant 0.000000e+00 : f32
    %60 = vector.broadcast %cst_28 : f32 to vector<8x128xf32>
    %61 = arith.select %57, %60, %55 : vector<8x128xi1>, vector<8x128xf32>
    %cst_29 = arith.constant -1.000000e+00 : f32
    %62 = vector.broadcast %cst_29 : f32 to vector<8x128xf32>
    %63 = arith.maximumf %61, %62 : vector<8x128xf32>
    %c48 = arith.constant 48 : index
    %c0_30 = arith.constant 0 : index
    %64 = vector.load %arg6[%c48, %c0_30] : memref<200x128xf32, #tpu.memory_space<vmem>>, vector<8x128xf32>
    tpu.vector_store %arg6[%c48, %c0_30], %59 {strides = array<i32>} : memref<200x128xf32, #tpu.memory_space<vmem>>, vector<8x128xf32>,
    %65 = arith.addf %63, %0 : vector<8x128xf32>
    %cst_31 = arith.constant 1.000000e+00 : f32
    %66 = vector.broadcast %cst_31 : f32 to vector<8x128xf32>
    %67 = arith.cmpf ogt, %65, %66 : vector<8x128xf32>
    %68 = arith.extui %67 : vector<8x128xi1> to vector<8x128xi32>
    %69 = arith.sitofp %68 : vector<8x128xi32> to vector<8x128xf32>
    %cst_32 = arith.constant 0.000000e+00 : f32
    %70 = vector.broadcast %cst_32 : f32 to vector<8x128xf32>
    %71 = arith.select %67, %70, %65 : vector<8x128xi1>, vector<8x128xf32>
    %cst_33 = arith.constant -1.000000e+00 : f32
    %72 = vector.broadcast %cst_33 : f32 to vector<8x128xf32>
    %73 = arith.maximumf %71, %72 : vector<8x128xf32>
    %c56 = arith.constant 56 : index
    %c0_34 = arith.constant 0 : index
    %74 = vector.load %arg6[%c56, %c0_34] : memref<200x128xf32, #tpu.memory_space<vmem>>, vector<8x128xf32>
    tpu.vector_store %arg6[%c56, %c0_34], %69 {strides = array<i32>} : memref<200x128xf32, #tpu.memory_space<vmem>>, vector<8x128xf32>,
    %75 = arith.addf %73, %0 : vector<8x128xf32>
    %cst_35 = arith.constant 1.000000e+00 : f32
    %76 = vector.broadcast %cst_35 : f32 to vector<8x128xf32>
    %77 = arith.cmpf ogt, %75, %76 : vector<8x128xf32>
    %78 = arith.extui %77 : vector<8x128xi1> to vector<8x128xi32>
    %79 = arith.sitofp %78 : vector<8x128xi32> to vector<8x128xf32>
    %cst_36 = arith.constant 0.000000e+00 : f32
    %80 = vector.broadcast %cst_36 : f32 to vector<8x128xf32>
    %81 = arith.select %77, %80, %75 : vector<8x128xi1>, vector<8x128xf32>
    %cst_37 = arith.constant -1.000000e+00 : f32
    %82 = vector.broadcast %cst_37 : f32 to vector<8x128xf32>
    %83 = arith.maximumf %81, %82 : vector<8x128xf32>
    %c64 = arith.constant 64 : index
    %c0_38 = arith.constant 0 : index
    %84 = vector.load %arg6[%c64, %c0_38] : memref<200x128xf32, #tpu.memory_space<vmem>>, vector<8x128xf32>
    tpu.vector_store %arg6[%c64, %c0_38], %79 {strides = array<i32>} : memref<200x128xf32, #tpu.memory_space<vmem>>, vector<8x128xf32>,
    %85 = arith.addf %83, %0 : vector<8x128xf32>
    %cst_39 = arith.constant 1.000000e+00 : f32
    %86 = vector.broadcast %cst_39 : f32 to vector<8x128xf32>
    %87 = arith.cmpf ogt, %85, %86 : vector<8x128xf32>
    %88 = arith.extui %87 : vector<8x128xi1> to vector<8x128xi32>
    %89 = arith.sitofp %88 : vector<8x128xi32> to vector<8x128xf32>
    %cst_40 = arith.constant 0.000000e+00 : f32
    %90 = vector.broadcast %cst_40 : f32 to vector<8x128xf32>
    %91 = arith.select %87, %90, %85 : vector<8x128xi1>, vector<8x128xf32>
    %cst_41 = arith.constant -1.000000e+00 : f32
    %92 = vector.broadcast %cst_41 : f32 to vector<8x128xf32>
    %93 = arith.maximumf %91, %92 : vector<8x128xf32>
    %c72 = arith.constant 72 : index
    %c0_42 = arith.constant 0 : index
    %94 = vector.load %arg6[%c72, %c0_42] : memref<200x128xf32, #tpu.memory_space<vmem>>, vector<8x128xf32>
    tpu.vector_store %arg6[%c72, %c0_42], %89 {strides = array<i32>} : memref<200x128xf32, #tpu.memory_space<vmem>>, vector<8x128xf32>,
    %95 = arith.addf %93, %0 : vector<8x128xf32>
    %cst_43 = arith.constant 1.000000e+00 : f32
    %96 = vector.broadcast %cst_43 : f32 to vector<8x128xf32>
    %97 = arith.cmpf ogt, %95, %96 : vector<8x128xf32>
    %98 = arith.extui %97 : vector<8x128xi1> to vector<8x128xi32>
    %99 = arith.sitofp %98 : vector<8x128xi32> to vector<8x128xf32>
    %cst_44 = arith.constant 0.000000e+00 : f32
    %100 = vector.broadcast %cst_44 : f32 to vector<8x128xf32>
    %101 = arith.select %97, %100, %95 : vector<8x128xi1>, vector<8x128xf32>
    %cst_45 = arith.constant -1.000000e+00 : f32
    %102 = vector.broadcast %cst_45 : f32 to vector<8x128xf32>
    %103 = arith.maximumf %101, %102 : vector<8x128xf32>
    %c80 = arith.constant 80 : index
    %c0_46 = arith.constant 0 : index
    %104 = vector.load %arg6[%c80, %c0_46] : memref<200x128xf32, #tpu.memory_space<vmem>>, vector<8x128xf32>
    tpu.vector_store %arg6[%c80, %c0_46], %99 {strides = array<i32>} : memref<200x128xf32, #tpu.memory_space<vmem>>, vector<8x128xf32>,
    %105 = arith.addf %103, %0 : vector<8x128xf32>
    %cst_47 = arith.constant 1.000000e+00 : f32
    %106 = vector.broadcast %cst_47 : f32 to vector<8x128xf32>
    %107 = arith.cmpf ogt, %105, %106 : vector<8x128xf32>
    %108 = arith.extui %107 : vector<8x128xi1> to vector<8x128xi32>
    %109 = arith.sitofp %108 : vector<8x128xi32> to vector<8x128xf32>
    %cst_48 = arith.constant 0.000000e+00 : f32
    %110 = vector.broadcast %cst_48 : f32 to vector<8x128xf32>
    %111 = arith.select %107, %110, %105 : vector<8x128xi1>, vector<8x128xf32>
    %cst_49 = arith.constant -1.000000e+00 : f32
    %112 = vector.broadcast %cst_49 : f32 to vector<8x128xf32>
    %113 = arith.maximumf %111, %112 : vector<8x128xf32>
    %c88 = arith.constant 88 : index
    %c0_50 = arith.constant 0 : index
    %114 = vector.load %arg6[%c88, %c0_50] : memref<200x128xf32, #tpu.memory_space<vmem>>, vector<8x128xf32>
    tpu.vector_store %arg6[%c88, %c0_50], %109 {strides = array<i32>} : memref<200x128xf32, #tpu.memory_space<vmem>>, vector<8x128xf32>,
    %115 = arith.addf %113, %0 : vector<8x128xf32>
    %cst_51 = arith.constant 1.000000e+00 : f32
    %116 = vector.broadcast %cst_51 : f32 to vector<8x128xf32>
    %117 = arith.cmpf ogt, %115, %116 : vector<8x128xf32>
    %118 = arith.extui %117 : vector<8x128xi1> to vector<8x128xi32>
    %119 = arith.sitofp %118 : vector<8x128xi32> to vector<8x128xf32>
    %cst_52 = arith.constant 0.000000e+00 : f32
    %120 = vector.broadcast %cst_52 : f32 to vector<8x128xf32>
    %121 = arith.select %117, %120, %115 : vector<8x128xi1>, vector<8x128xf32>
    %cst_53 = arith.constant -1.000000e+00 : f32
    %122 = vector.broadcast %cst_53 : f32 to vector<8x128xf32>
    %123 = arith.maximumf %121, %122 : vector<8x128xf32>
    %c96 = arith.constant 96 : index
    %c0_54 = arith.constant 0 : index
    %124 = vector.load %arg6[%c96, %c0_54] : memref<200x128xf32, #tpu.memory_space<vmem>>, vector<8x128xf32>
    tpu.vector_store %arg6[%c96, %c0_54], %119 {strides = array<i32>} : memref<200x128xf32, #tpu.memory_space<vmem>>, vector<8x128xf32>,
    %125 = arith.addf %123, %0 : vector<8x128xf32>
    %cst_55 = arith.constant 1.000000e+00 : f32
    %126 = vector.broadcast %cst_55 : f32 to vector<8x128xf32>
    %127 = arith.cmpf ogt, %125, %126 : vector<8x128xf32>
    %128 = arith.extui %127 : vector<8x128xi1> to vector<8x128xi32>
    %129 = arith.sitofp %128 : vector<8x128xi32> to vector<8x128xf32>
    %cst_56 = arith.constant 0.000000e+00 : f32
    %130 = vector.broadcast %cst_56 : f32 to vector<8x128xf32>
    %131 = arith.select %127, %130, %125 : vector<8x128xi1>, vector<8x128xf32>
    %cst_57 = arith.constant -1.000000e+00 : f32
    %132 = vector.broadcast %cst_57 : f32 to vector<8x128xf32>
    %133 = arith.maximumf %131, %132 : vector<8x128xf32>
    %c104 = arith.constant 104 : index
    %c0_58 = arith.constant 0 : index
    %134 = vector.load %arg6[%c104, %c0_58] : memref<200x128xf32, #tpu.memory_space<vmem>>, vector<8x128xf32>
    tpu.vector_store %arg6[%c104, %c0_58], %129 {strides = array<i32>} : memref<200x128xf32, #tpu.memory_space<vmem>>, vector<8x128xf32>,
    %135 = arith.addf %133, %0 : vector<8x128xf32>
    %cst_59 = arith.constant 1.000000e+00 : f32
    %136 = vector.broadcast %cst_59 : f32 to vector<8x128xf32>
    %137 = arith.cmpf ogt, %135, %136 : vector<8x128xf32>
    %138 = arith.extui %137 : vector<8x128xi1> to vector<8x128xi32>
    %139 = arith.sitofp %138 : vector<8x128xi32> to vector<8x128xf32>
    %cst_60 = arith.constant 0.000000e+00 : f32
    %140 = vector.broadcast %cst_60 : f32 to vector<8x128xf32>
    %141 = arith.select %137, %140, %135 : vector<8x128xi1>, vector<8x128xf32>
    %cst_61 = arith.constant -1.000000e+00 : f32
    %142 = vector.broadcast %cst_61 : f32 to vector<8x128xf32>
    %143 = arith.maximumf %141, %142 : vector<8x128xf32>
    %c112 = arith.constant 112 : index
    %c0_62 = arith.constant 0 : index
    %144 = vector.load %arg6[%c112, %c0_62] : memref<200x128xf32, #tpu.memory_space<vmem>>, vector<8x128xf32>
    tpu.vector_store %arg6[%c112, %c0_62], %139 {strides = array<i32>} : memref<200x128xf32, #tpu.memory_space<vmem>>, vector<8x128xf32>,
    %145 = arith.addf %143, %0 : vector<8x128xf32>
    %cst_63 = arith.constant 1.000000e+00 : f32
    %146 = vector.broadcast %cst_63 : f32 to vector<8x128xf32>
    %147 = arith.cmpf ogt, %145, %146 : vector<8x128xf32>
    %148 = arith.extui %147 : vector<8x128xi1> to vector<8x128xi32>
    %149 = arith.sitofp %148 : vector<8x128xi32> to vector<8x128xf32>
    %cst_64 = arith.constant 0.000000e+00 : f32
    %150 = vector.broadcast %cst_64 : f32 to vector<8x128xf32>
    %151 = arith.select %147, %150, %145 : vector<8x128xi1>, vector<8x128xf32>
    %cst_65 = arith.constant -1.000000e+00 : f32
    %152 = vector.broadcast %cst_65 : f32 to vector<8x128xf32>
    %153 = arith.maximumf %151, %152 : vector<8x128xf32>
    %c120 = arith.constant 120 : index
    %c0_66 = arith.constant 0 : index
    %154 = vector.load %arg6[%c120, %c0_66] : memref<200x128xf32, #tpu.memory_space<vmem>>, vector<8x128xf32>
    tpu.vector_store %arg6[%c120, %c0_66], %149 {strides = array<i32>} : memref<200x128xf32, #tpu.memory_space<vmem>>, vector<8x128xf32>,
    %155 = arith.addf %153, %0 : vector<8x128xf32>
    %cst_67 = arith.constant 1.000000e+00 : f32
    %156 = vector.broadcast %cst_67 : f32 to vector<8x128xf32>
    %157 = arith.cmpf ogt, %155, %156 : vector<8x128xf32>
    %158 = arith.extui %157 : vector<8x128xi1> to vector<8x128xi32>
    %159 = arith.sitofp %158 : vector<8x128xi32> to vector<8x128xf32>
    %cst_68 = arith.constant 0.000000e+00 : f32
    %160 = vector.broadcast %cst_68 : f32 to vector<8x128xf32>
    %161 = arith.select %157, %160, %155 : vector<8x128xi1>, vector<8x128xf32>
    %cst_69 = arith.constant -1.000000e+00 : f32
    %162 = vector.broadcast %cst_69 : f32 to vector<8x128xf32>
    %163 = arith.maximumf %161, %162 : vector<8x128xf32>
    %c128 = arith.constant 128 : index
    %c0_70 = arith.constant 0 : index
    %164 = vector.load %arg6[%c128, %c0_70] : memref<200x128xf32, #tpu.memory_space<vmem>>, vector<8x128xf32>
    tpu.vector_store %arg6[%c128, %c0_70], %159 {strides = array<i32>} : memref<200x128xf32, #tpu.memory_space<vmem>>, vector<8x128xf32>,
    %165 = arith.addf %163, %0 : vector<8x128xf32>
    %cst_71 = arith.constant 1.000000e+00 : f32
    %166 = vector.broadcast %cst_71 : f32 to vector<8x128xf32>
    %167 = arith.cmpf ogt, %165, %166 : vector<8x128xf32>
    %168 = arith.extui %167 : vector<8x128xi1> to vector<8x128xi32>
    %169 = arith.sitofp %168 : vector<8x128xi32> to vector<8x128xf32>
    %cst_72 = arith.constant 0.000000e+00 : f32
    %170 = vector.broadcast %cst_72 : f32 to vector<8x128xf32>
    %171 = arith.select %167, %170, %165 : vector<8x128xi1>, vector<8x128xf32>
    %cst_73 = arith.constant -1.000000e+00 : f32
    %172 = vector.broadcast %cst_73 : f32 to vector<8x128xf32>
    %173 = arith.maximumf %171, %172 : vector<8x128xf32>
    %c136 = arith.constant 136 : index
    %c0_74 = arith.constant 0 : index
    %174 = vector.load %arg6[%c136, %c0_74] : memref<200x128xf32, #tpu.memory_space<vmem>>, vector<8x128xf32>
    tpu.vector_store %arg6[%c136, %c0_74], %169 {strides = array<i32>} : memref<200x128xf32, #tpu.memory_space<vmem>>, vector<8x128xf32>,
    %175 = arith.addf %173, %0 : vector<8x128xf32>
    %cst_75 = arith.constant 1.000000e+00 : f32
    %176 = vector.broadcast %cst_75 : f32 to vector<8x128xf32>
    %177 = arith.cmpf ogt, %175, %176 : vector<8x128xf32>
    %178 = arith.extui %177 : vector<8x128xi1> to vector<8x128xi32>
    %179 = arith.sitofp %178 : vector<8x128xi32> to vector<8x128xf32>
    %cst_76 = arith.constant 0.000000e+00 : f32
    %180 = vector.broadcast %cst_76 : f32 to vector<8x128xf32>
    %181 = arith.select %177, %180, %175 : vector<8x128xi1>, vector<8x128xf32>
    %cst_77 = arith.constant -1.000000e+00 : f32
    %182 = vector.broadcast %cst_77 : f32 to vector<8x128xf32>
    %183 = arith.maximumf %181, %182 : vector<8x128xf32>
    %c144 = arith.constant 144 : index
    %c0_78 = arith.constant 0 : index
    %184 = vector.load %arg6[%c144, %c0_78] : memref<200x128xf32, #tpu.memory_space<vmem>>, vector<8x128xf32>
    tpu.vector_store %arg6[%c144, %c0_78], %179 {strides = array<i32>} : memref<200x128xf32, #tpu.memory_space<vmem>>, vector<8x128xf32>,
    %185 = arith.addf %183, %0 : vector<8x128xf32>
    %cst_79 = arith.constant 1.000000e+00 : f32
    %186 = vector.broadcast %cst_79 : f32 to vector<8x128xf32>
    %187 = arith.cmpf ogt, %185, %186 : vector<8x128xf32>
    %188 = arith.extui %187 : vector<8x128xi1> to vector<8x128xi32>
    %189 = arith.sitofp %188 : vector<8x128xi32> to vector<8x128xf32>
    %cst_80 = arith.constant 0.000000e+00 : f32
    %190 = vector.broadcast %cst_80 : f32 to vector<8x128xf32>
    %191 = arith.select %187, %190, %185 : vector<8x128xi1>, vector<8x128xf32>
    %cst_81 = arith.constant -1.000000e+00 : f32
    %192 = vector.broadcast %cst_81 : f32 to vector<8x128xf32>
    %193 = arith.maximumf %191, %192 : vector<8x128xf32>
    %c152 = arith.constant 152 : index
    %c0_82 = arith.constant 0 : index
    %194 = vector.load %arg6[%c152, %c0_82] : memref<200x128xf32, #tpu.memory_space<vmem>>, vector<8x128xf32>
    tpu.vector_store %arg6[%c152, %c0_82], %189 {strides = array<i32>} : memref<200x128xf32, #tpu.memory_space<vmem>>, vector<8x128xf32>,
    %195 = arith.addf %193, %0 : vector<8x128xf32>
    %cst_83 = arith.constant 1.000000e+00 : f32
    %196 = vector.broadcast %cst_83 : f32 to vector<8x128xf32>
    %197 = arith.cmpf ogt, %195, %196 : vector<8x128xf32>
    %198 = arith.extui %197 : vector<8x128xi1> to vector<8x128xi32>
    %199 = arith.sitofp %198 : vector<8x128xi32> to vector<8x128xf32>
    %cst_84 = arith.constant 0.000000e+00 : f32
    %200 = vector.broadcast %cst_84 : f32 to vector<8x128xf32>
    %201 = arith.select %197, %200, %195 : vector<8x128xi1>, vector<8x128xf32>
    %cst_85 = arith.constant -1.000000e+00 : f32
    %202 = vector.broadcast %cst_85 : f32 to vector<8x128xf32>
    %203 = arith.maximumf %201, %202 : vector<8x128xf32>
    %c160 = arith.constant 160 : index
    %c0_86 = arith.constant 0 : index
    %204 = vector.load %arg6[%c160, %c0_86] : memref<200x128xf32, #tpu.memory_space<vmem>>, vector<8x128xf32>
    tpu.vector_store %arg6[%c160, %c0_86], %199 {strides = array<i32>} : memref<200x128xf32, #tpu.memory_space<vmem>>, vector<8x128xf32>,
    %205 = arith.addf %203, %0 : vector<8x128xf32>
    %cst_87 = arith.constant 1.000000e+00 : f32
    %206 = vector.broadcast %cst_87 : f32 to vector<8x128xf32>
    %207 = arith.cmpf ogt, %205, %206 : vector<8x128xf32>
    %208 = arith.extui %207 : vector<8x128xi1> to vector<8x128xi32>
    %209 = arith.sitofp %208 : vector<8x128xi32> to vector<8x128xf32>
    %cst_88 = arith.constant 0.000000e+00 : f32
    %210 = vector.broadcast %cst_88 : f32 to vector<8x128xf32>
    %211 = arith.select %207, %210, %205 : vector<8x128xi1>, vector<8x128xf32>
    %cst_89 = arith.constant -1.000000e+00 : f32
    %212 = vector.broadcast %cst_89 : f32 to vector<8x128xf32>
    %213 = arith.maximumf %211, %212 : vector<8x128xf32>
    %c168 = arith.constant 168 : index
    %c0_90 = arith.constant 0 : index
    %214 = vector.load %arg6[%c168, %c0_90] : memref<200x128xf32, #tpu.memory_space<vmem>>, vector<8x128xf32>
    tpu.vector_store %arg6[%c168, %c0_90], %209 {strides = array<i32>} : memref<200x128xf32, #tpu.memory_space<vmem>>, vector<8x128xf32>,
    %215 = arith.addf %213, %0 : vector<8x128xf32>
    %cst_91 = arith.constant 1.000000e+00 : f32
    %216 = vector.broadcast %cst_91 : f32 to vector<8x128xf32>
    %217 = arith.cmpf ogt, %215, %216 : vector<8x128xf32>
    %218 = arith.extui %217 : vector<8x128xi1> to vector<8x128xi32>
    %219 = arith.sitofp %218 : vector<8x128xi32> to vector<8x128xf32>
    %cst_92 = arith.constant 0.000000e+00 : f32
    %220 = vector.broadcast %cst_92 : f32 to vector<8x128xf32>
    %221 = arith.select %217, %220, %215 : vector<8x128xi1>, vector<8x128xf32>
    %cst_93 = arith.constant -1.000000e+00 : f32
    %222 = vector.broadcast %cst_93 : f32 to vector<8x128xf32>
    %223 = arith.maximumf %221, %222 : vector<8x128xf32>
    %c176 = arith.constant 176 : index
    %c0_94 = arith.constant 0 : index
    %224 = vector.load %arg6[%c176, %c0_94] : memref<200x128xf32, #tpu.memory_space<vmem>>, vector<8x128xf32>
    tpu.vector_store %arg6[%c176, %c0_94], %219 {strides = array<i32>} : memref<200x128xf32, #tpu.memory_space<vmem>>, vector<8x128xf32>,
    %225 = arith.addf %223, %0 : vector<8x128xf32>
    %cst_95 = arith.constant 1.000000e+00 : f32
    %226 = vector.broadcast %cst_95 : f32 to vector<8x128xf32>
    %227 = arith.cmpf ogt, %225, %226 : vector<8x128xf32>
    %228 = arith.extui %227 : vector<8x128xi1> to vector<8x128xi32>
    %229 = arith.sitofp %228 : vector<8x128xi32> to vector<8x128xf32>
    %cst_96 = arith.constant 0.000000e+00 : f32
    %230 = vector.broadcast %cst_96 : f32 to vector<8x128xf32>
    %231 = arith.select %227, %230, %225 : vector<8x128xi1>, vector<8x128xf32>
    %cst_97 = arith.constant -1.000000e+00 : f32
    %232 = vector.broadcast %cst_97 : f32 to vector<8x128xf32>
    %233 = arith.maximumf %231, %232 : vector<8x128xf32>
    %c184 = arith.constant 184 : index
    %c0_98 = arith.constant 0 : index
    %234 = vector.load %arg6[%c184, %c0_98] : memref<200x128xf32, #tpu.memory_space<vmem>>, vector<8x128xf32>
    tpu.vector_store %arg6[%c184, %c0_98], %229 {strides = array<i32>} : memref<200x128xf32, #tpu.memory_space<vmem>>, vector<8x128xf32>,
    %235 = arith.addf %233, %0 : vector<8x128xf32>
    %cst_99 = arith.constant 1.000000e+00 : f32
    %236 = vector.broadcast %cst_99 : f32 to vector<8x128xf32>
    %237 = arith.cmpf ogt, %235, %236 : vector<8x128xf32>
    %238 = arith.extui %237 : vector<8x128xi1> to vector<8x128xi32>
    %239 = arith.sitofp %238 : vector<8x128xi32> to vector<8x128xf32>
    %c192 = arith.constant 192 : index
    %c0_100 = arith.constant 0 : index
    %240 = vector.load %arg6[%c192, %c0_100] : memref<200x128xf32, #tpu.memory_space<vmem>>, vector<8x128xf32>
    tpu.vector_store %arg6[%c192, %c0_100], %239 {strides = array<i32>} : memref<200x128xf32, #tpu.memory_space<vmem>>, vector<8x128xf32>,
    %c0_101 = arith.constant 0 : index
    %c0_102 = arith.constant 0 : index
    %241 = vector.load %arg6[%c0_101, %c0_102] : memref<200x128xf32, #tpu.memory_space<vmem>>, vector<200x128xf32>
    %cst_103 = arith.constant dense<0.000000e+00> : vector<200x128xf32>
    %242 = tpu.matmul %241, %1, %cst_103 {dimension_numbers = #tpu.dot_dimension_numbers<[1], [0], [0], [1], [0, 0, 1, 1], [], []>} : vector<200x128xf32>, vector<128x128xf32>, vector<200x128xf32> -> vector<200x128xf32>
    %c0_104 = arith.constant 0 : index
    %c0_105 = arith.constant 0 : index
    %243 = vector.load %arg6[%c0_104, %c0_105] : memref<200x128xf32, #tpu.memory_space<vmem>>, vector<200x128xf32>
    tpu.vector_store %arg6[%c0_104, %c0_105], %242 {strides = array<i32>} : memref<200x128xf32, #tpu.memory_space<vmem>>, vector<200x128xf32>,
    %c0_106 = arith.constant 0 : index
    %c0_107 = arith.constant 0 : index
    %244 = vector.load %arg6[%c0_106, %c0_107] : memref<200x128xf32, #tpu.memory_space<vmem>>, vector<8x128xf32>
    %c0_108 = arith.constant 0 : index
    %c0_109 = arith.constant 0 : index
    %245 = vector.load %arg6[%c0_108, %c0_109] : memref<200x128xf32, #tpu.memory_space<vmem>>, vector<8x128xf32>
    tpu.vector_store %arg6[%c0_108, %c0_109], %3 {strides = array<i32>} : memref<200x128xf32, #tpu.memory_space<vmem>>, vector<8x128xf32>,
    %246 = arith.addf %3, %244 : vector<8x128xf32>
    %cst_110 = arith.constant 1.000000e+00 : f32
    %247 = vector.broadcast %cst_110 : f32 to vector<8x128xf32>
    %248 = arith.cmpf ogt, %246, %247 : vector<8x128xf32>
    %249 = arith.extui %248 : vector<8x128xi1> to vector<8x128xi32>
    %250 = arith.sitofp %249 : vector<8x128xi32> to vector<8x128xf32>
    %cst_111 = arith.constant 0.000000e+00 : f32
    %251 = vector.broadcast %cst_111 : f32 to vector<8x128xf32>
    %252 = arith.select %248, %251, %246 : vector<8x128xi1>, vector<8x128xf32>
    %cst_112 = arith.constant -1.000000e+00 : f32
    %253 = vector.broadcast %cst_112 : f32 to vector<8x128xf32>
    %254 = arith.maximumf %252, %253 : vector<8x128xf32>
    %c8_113 = arith.constant 8 : index
    %c0_114 = arith.constant 0 : index
    %255 = vector.load %arg6[%c8_113, %c0_114] : memref<200x128xf32, #tpu.memory_space<vmem>>, vector<8x128xf32>
    %c8_115 = arith.constant 8 : index
    %c0_116 = arith.constant 0 : index
    %256 = vector.load %arg6[%c8_115, %c0_116] : memref<200x128xf32, #tpu.memory_space<vmem>>, vector<8x128xf32>
    tpu.vector_store %arg6[%c8_115, %c0_116], %250 {strides = array<i32>} : memref<200x128xf32, #tpu.memory_space<vmem>>, vector<8x128xf32>,
    %257 = arith.addf %254, %255 : vector<8x128xf32>
    %cst_117 = arith.constant 1.000000e+00 : f32
    %258 = vector.broadcast %cst_117 : f32 to vector<8x128xf32>
    %259 = arith.cmpf ogt, %257, %258 : vector<8x128xf32>
    %260 = arith.extui %259 : vector<8x128xi1> to vector<8x128xi32>
    %261 = arith.sitofp %260 : vector<8x128xi32> to vector<8x128xf32>
    %cst_118 = arith.constant 0.000000e+00 : f32
    %262 = vector.broadcast %cst_118 : f32 to vector<8x128xf32>
    %263 = arith.select %259, %262, %257 : vector<8x128xi1>, vector<8x128xf32>
    %cst_119 = arith.constant -1.000000e+00 : f32
    %264 = vector.broadcast %cst_119 : f32 to vector<8x128xf32>
    %265 = arith.maximumf %263, %264 : vector<8x128xf32>
    %c16_120 = arith.constant 16 : index
    %c0_121 = arith.constant 0 : index
    %266 = vector.load %arg6[%c16_120, %c0_121] : memref<200x128xf32, #tpu.memory_space<vmem>>, vector<8x128xf32>
    %c16_122 = arith.constant 16 : index
    %c0_123 = arith.constant 0 : index
    %267 = vector.load %arg6[%c16_122, %c0_123] : memref<200x128xf32, #tpu.memory_space<vmem>>, vector<8x128xf32>
    tpu.vector_store %arg6[%c16_122, %c0_123], %261 {strides = array<i32>} : memref<200x128xf32, #tpu.memory_space<vmem>>, vector<8x128xf32>,
    %268 = arith.addf %265, %266 : vector<8x128xf32>
    %cst_124 = arith.constant 1.000000e+00 : f32
    %269 = vector.broadcast %cst_124 : f32 to vector<8x128xf32>
    %270 = arith.cmpf ogt, %268, %269 : vector<8x128xf32>
    %271 = arith.extui %270 : vector<8x128xi1> to vector<8x128xi32>
    %272 = arith.sitofp %271 : vector<8x128xi32> to vector<8x128xf32>
    %cst_125 = arith.constant 0.000000e+00 : f32
    %273 = vector.broadcast %cst_125 : f32 to vector<8x128xf32>
    %274 = arith.select %270, %273, %268 : vector<8x128xi1>, vector<8x128xf32>
    %cst_126 = arith.constant -1.000000e+00 : f32
    %275 = vector.broadcast %cst_126 : f32 to vector<8x128xf32>
    %276 = arith.maximumf %274, %275 : vector<8x128xf32>
    %c24_127 = arith.constant 24 : index
    %c0_128 = arith.constant 0 : index
    %277 = vector.load %arg6[%c24_127, %c0_128] : memref<200x128xf32, #tpu.memory_space<vmem>>, vector<8x128xf32>
    %c24_129 = arith.constant 24 : index
    %c0_130 = arith.constant 0 : index
    %278 = vector.load %arg6[%c24_129, %c0_130] : memref<200x128xf32, #tpu.memory_space<vmem>>, vector<8x128xf32>
    tpu.vector_store %arg6[%c24_129, %c0_130], %272 {strides = array<i32>} : memref<200x128xf32, #tpu.memory_space<vmem>>, vector<8x128xf32>,
    %279 = arith.addf %276, %277 : vector<8x128xf32>
    %cst_131 = arith.constant 1.000000e+00 : f32
    %280 = vector.broadcast %cst_131 : f32 to vector<8x128xf32>
    %281 = arith.cmpf ogt, %279, %280 : vector<8x128xf32>
    %282 = arith.extui %281 : vector<8x128xi1> to vector<8x128xi32>
    %283 = arith.sitofp %282 : vector<8x128xi32> to vector<8x128xf32>
    %cst_132 = arith.constant 0.000000e+00 : f32
    %284 = vector.broadcast %cst_132 : f32 to vector<8x128xf32>
    %285 = arith.select %281, %284, %279 : vector<8x128xi1>, vector<8x128xf32>
    %cst_133 = arith.constant -1.000000e+00 : f32
    %286 = vector.broadcast %cst_133 : f32 to vector<8x128xf32>
    %287 = arith.maximumf %285, %286 : vector<8x128xf32>
    %c32_134 = arith.constant 32 : index
    %c0_135 = arith.constant 0 : index
    %288 = vector.load %arg6[%c32_134, %c0_135] : memref<200x128xf32, #tpu.memory_space<vmem>>, vector<8x128xf32>
    %c32_136 = arith.constant 32 : index
    %c0_137 = arith.constant 0 : index
    %289 = vector.load %arg6[%c32_136, %c0_137] : memref<200x128xf32, #tpu.memory_space<vmem>>, vector<8x128xf32>
    tpu.vector_store %arg6[%c32_136, %c0_137], %283 {strides = array<i32>} : memref<200x128xf32, #tpu.memory_space<vmem>>, vector<8x128xf32>,
    %290 = arith.addf %287, %288 : vector<8x128xf32>
    %cst_138 = arith.constant 1.000000e+00 : f32
    %291 = vector.broadcast %cst_138 : f32 to vector<8x128xf32>
    %292 = arith.cmpf ogt, %290, %291 : vector<8x128xf32>
    %293 = arith.extui %292 : vector<8x128xi1> to vector<8x128xi32>
    %294 = arith.sitofp %293 : vector<8x128xi32> to vector<8x128xf32>
    %cst_139 = arith.constant 0.000000e+00 : f32
    %295 = vector.broadcast %cst_139 : f32 to vector<8x128xf32>
    %296 = arith.select %292, %295, %290 : vector<8x128xi1>, vector<8x128xf32>
    %cst_140 = arith.constant -1.000000e+00 : f32
    %297 = vector.broadcast %cst_140 : f32 to vector<8x128xf32>
    %298 = arith.maximumf %296, %297 : vector<8x128xf32>
    %c40_141 = arith.constant 40 : index
    %c0_142 = arith.constant 0 : index
    %299 = vector.load %arg6[%c40_141, %c0_142] : memref<200x128xf32, #tpu.memory_space<vmem>>, vector<8x128xf32>
    %c40_143 = arith.constant 40 : index
    %c0_144 = arith.constant 0 : index
    %300 = vector.load %arg6[%c40_143, %c0_144] : memref<200x128xf32, #tpu.memory_space<vmem>>, vector<8x128xf32>
    tpu.vector_store %arg6[%c40_143, %c0_144], %294 {strides = array<i32>} : memref<200x128xf32, #tpu.memory_space<vmem>>, vector<8x128xf32>,
    %301 = arith.addf %298, %299 : vector<8x128xf32>
    %cst_145 = arith.constant 1.000000e+00 : f32
    %302 = vector.broadcast %cst_145 : f32 to vector<8x128xf32>
    %303 = arith.cmpf ogt, %301, %302 : vector<8x128xf32>
    %304 = arith.extui %303 : vector<8x128xi1> to vector<8x128xi32>
    %305 = arith.sitofp %304 : vector<8x128xi32> to vector<8x128xf32>
    %cst_146 = arith.constant 0.000000e+00 : f32
    %306 = vector.broadcast %cst_146 : f32 to vector<8x128xf32>
    %307 = arith.select %303, %306, %301 : vector<8x128xi1>, vector<8x128xf32>
    %cst_147 = arith.constant -1.000000e+00 : f32
    %308 = vector.broadcast %cst_147 : f32 to vector<8x128xf32>
    %309 = arith.maximumf %307, %308 : vector<8x128xf32>
    %c48_148 = arith.constant 48 : index
    %c0_149 = arith.constant 0 : index
    %310 = vector.load %arg6[%c48_148, %c0_149] : memref<200x128xf32, #tpu.memory_space<vmem>>, vector<8x128xf32>
    %c48_150 = arith.constant 48 : index
    %c0_151 = arith.constant 0 : index
    %311 = vector.load %arg6[%c48_150, %c0_151] : memref<200x128xf32, #tpu.memory_space<vmem>>, vector<8x128xf32>
    tpu.vector_store %arg6[%c48_150, %c0_151], %305 {strides = array<i32>} : memref<200x128xf32, #tpu.memory_space<vmem>>, vector<8x128xf32>,
    %312 = arith.addf %309, %310 : vector<8x128xf32>
    %cst_152 = arith.constant 1.000000e+00 : f32
    %313 = vector.broadcast %cst_152 : f32 to vector<8x128xf32>
    %314 = arith.cmpf ogt, %312, %313 : vector<8x128xf32>
    %315 = arith.extui %314 : vector<8x128xi1> to vector<8x128xi32>
    %316 = arith.sitofp %315 : vector<8x128xi32> to vector<8x128xf32>
    %cst_153 = arith.constant 0.000000e+00 : f32
    %317 = vector.broadcast %cst_153 : f32 to vector<8x128xf32>
    %318 = arith.select %314, %317, %312 : vector<8x128xi1>, vector<8x128xf32>
    %cst_154 = arith.constant -1.000000e+00 : f32
    %319 = vector.broadcast %cst_154 : f32 to vector<8x128xf32>
    %320 = arith.maximumf %318, %319 : vector<8x128xf32>
    %c56_155 = arith.constant 56 : index
    %c0_156 = arith.constant 0 : index
    %321 = vector.load %arg6[%c56_155, %c0_156] : memref<200x128xf32, #tpu.memory_space<vmem>>, vector<8x128xf32>
    %c56_157 = arith.constant 56 : index
    %c0_158 = arith.constant 0 : index
    %322 = vector.load %arg6[%c56_157, %c0_158] : memref<200x128xf32, #tpu.memory_space<vmem>>, vector<8x128xf32>
    tpu.vector_store %arg6[%c56_157, %c0_158], %316 {strides = array<i32>} : memref<200x128xf32, #tpu.memory_space<vmem>>, vector<8x128xf32>,
    %323 = arith.addf %320, %321 : vector<8x128xf32>
    %cst_159 = arith.constant 1.000000e+00 : f32
    %324 = vector.broadcast %cst_159 : f32 to vector<8x128xf32>
    %325 = arith.cmpf ogt, %323, %324 : vector<8x128xf32>
    %326 = arith.extui %325 : vector<8x128xi1> to vector<8x128xi32>
    %327 = arith.sitofp %326 : vector<8x128xi32> to vector<8x128xf32>
    %cst_160 = arith.constant 0.000000e+00 : f32
    %328 = vector.broadcast %cst_160 : f32 to vector<8x128xf32>
    %329 = arith.select %325, %328, %323 : vector<8x128xi1>, vector<8x128xf32>
    %cst_161 = arith.constant -1.000000e+00 : f32
    %330 = vector.broadcast %cst_161 : f32 to vector<8x128xf32>
    %331 = arith.maximumf %329, %330 : vector<8x128xf32>
    %c64_162 = arith.constant 64 : index
    %c0_163 = arith.constant 0 : index
    %332 = vector.load %arg6[%c64_162, %c0_163] : memref<200x128xf32, #tpu.memory_space<vmem>>, vector<8x128xf32>
    %c64_164 = arith.constant 64 : index
    %c0_165 = arith.constant 0 : index
    %333 = vector.load %arg6[%c64_164, %c0_165] : memref<200x128xf32, #tpu.memory_space<vmem>>, vector<8x128xf32>
    tpu.vector_store %arg6[%c64_164, %c0_165], %327 {strides = array<i32>} : memref<200x128xf32, #tpu.memory_space<vmem>>, vector<8x128xf32>,
    %334 = arith.addf %331, %332 : vector<8x128xf32>
    %cst_166 = arith.constant 1.000000e+00 : f32
    %335 = vector.broadcast %cst_166 : f32 to vector<8x128xf32>
    %336 = arith.cmpf ogt, %334, %335 : vector<8x128xf32>
    %337 = arith.extui %336 : vector<8x128xi1> to vector<8x128xi32>
    %338 = arith.sitofp %337 : vector<8x128xi32> to vector<8x128xf32>
    %cst_167 = arith.constant 0.000000e+00 : f32
    %339 = vector.broadcast %cst_167 : f32 to vector<8x128xf32>
    %340 = arith.select %336, %339, %334 : vector<8x128xi1>, vector<8x128xf32>
    %cst_168 = arith.constant -1.000000e+00 : f32
    %341 = vector.broadcast %cst_168 : f32 to vector<8x128xf32>
    %342 = arith.maximumf %340, %341 : vector<8x128xf32>
    %c72_169 = arith.constant 72 : index
    %c0_170 = arith.constant 0 : index
    %343 = vector.load %arg6[%c72_169, %c0_170] : memref<200x128xf32, #tpu.memory_space<vmem>>, vector<8x128xf32>
    %c72_171 = arith.constant 72 : index
    %c0_172 = arith.constant 0 : index
    %344 = vector.load %arg6[%c72_171, %c0_172] : memref<200x128xf32, #tpu.memory_space<vmem>>, vector<8x128xf32>
    tpu.vector_store %arg6[%c72_171, %c0_172], %338 {strides = array<i32>} : memref<200x128xf32, #tpu.memory_space<vmem>>, vector<8x128xf32>,
    %345 = arith.addf %342, %343 : vector<8x128xf32>
    %cst_173 = arith.constant 1.000000e+00 : f32
    %346 = vector.broadcast %cst_173 : f32 to vector<8x128xf32>
    %347 = arith.cmpf ogt, %345, %346 : vector<8x128xf32>
    %348 = arith.extui %347 : vector<8x128xi1> to vector<8x128xi32>
    %349 = arith.sitofp %348 : vector<8x128xi32> to vector<8x128xf32>
    %cst_174 = arith.constant 0.000000e+00 : f32
    %350 = vector.broadcast %cst_174 : f32 to vector<8x128xf32>
    %351 = arith.select %347, %350, %345 : vector<8x128xi1>, vector<8x128xf32>
    %cst_175 = arith.constant -1.000000e+00 : f32
    %352 = vector.broadcast %cst_175 : f32 to vector<8x128xf32>
    %353 = arith.maximumf %351, %352 : vector<8x128xf32>
    %c80_176 = arith.constant 80 : index
    %c0_177 = arith.constant 0 : index
    %354 = vector.load %arg6[%c80_176, %c0_177] : memref<200x128xf32, #tpu.memory_space<vmem>>, vector<8x128xf32>
    %c80_178 = arith.constant 80 : index
    %c0_179 = arith.constant 0 : index
    %355 = vector.load %arg6[%c80_178, %c0_179] : memref<200x128xf32, #tpu.memory_space<vmem>>, vector<8x128xf32>
    tpu.vector_store %arg6[%c80_178, %c0_179], %349 {strides = array<i32>} : memref<200x128xf32, #tpu.memory_space<vmem>>, vector<8x128xf32>,
    %356 = arith.addf %353, %354 : vector<8x128xf32>
    %cst_180 = arith.constant 1.000000e+00 : f32
    %357 = vector.broadcast %cst_180 : f32 to vector<8x128xf32>
    %358 = arith.cmpf ogt, %356, %357 : vector<8x128xf32>
    %359 = arith.extui %358 : vector<8x128xi1> to vector<8x128xi32>
    %360 = arith.sitofp %359 : vector<8x128xi32> to vector<8x128xf32>
    %cst_181 = arith.constant 0.000000e+00 : f32
    %361 = vector.broadcast %cst_181 : f32 to vector<8x128xf32>
    %362 = arith.select %358, %361, %356 : vector<8x128xi1>, vector<8x128xf32>
    %cst_182 = arith.constant -1.000000e+00 : f32
    %363 = vector.broadcast %cst_182 : f32 to vector<8x128xf32>
    %364 = arith.maximumf %362, %363 : vector<8x128xf32>
    %c88_183 = arith.constant 88 : index
    %c0_184 = arith.constant 0 : index
    %365 = vector.load %arg6[%c88_183, %c0_184] : memref<200x128xf32, #tpu.memory_space<vmem>>, vector<8x128xf32>
    %c88_185 = arith.constant 88 : index
    %c0_186 = arith.constant 0 : index
    %366 = vector.load %arg6[%c88_185, %c0_186] : memref<200x128xf32, #tpu.memory_space<vmem>>, vector<8x128xf32>
    tpu.vector_store %arg6[%c88_185, %c0_186], %360 {strides = array<i32>} : memref<200x128xf32, #tpu.memory_space<vmem>>, vector<8x128xf32>,
    %367 = arith.addf %364, %365 : vector<8x128xf32>
    %cst_187 = arith.constant 1.000000e+00 : f32
    %368 = vector.broadcast %cst_187 : f32 to vector<8x128xf32>
    %369 = arith.cmpf ogt, %367, %368 : vector<8x128xf32>
    %370 = arith.extui %369 : vector<8x128xi1> to vector<8x128xi32>
    %371 = arith.sitofp %370 : vector<8x128xi32> to vector<8x128xf32>
    %cst_188 = arith.constant 0.000000e+00 : f32
    %372 = vector.broadcast %cst_188 : f32 to vector<8x128xf32>
    %373 = arith.select %369, %372, %367 : vector<8x128xi1>, vector<8x128xf32>
    %cst_189 = arith.constant -1.000000e+00 : f32
    %374 = vector.broadcast %cst_189 : f32 to vector<8x128xf32>
    %375 = arith.maximumf %373, %374 : vector<8x128xf32>
    %c96_190 = arith.constant 96 : index
    %c0_191 = arith.constant 0 : index
    %376 = vector.load %arg6[%c96_190, %c0_191] : memref<200x128xf32, #tpu.memory_space<vmem>>, vector<8x128xf32>
    %c96_192 = arith.constant 96 : index
    %c0_193 = arith.constant 0 : index
    %377 = vector.load %arg6[%c96_192, %c0_193] : memref<200x128xf32, #tpu.memory_space<vmem>>, vector<8x128xf32>
    tpu.vector_store %arg6[%c96_192, %c0_193], %371 {strides = array<i32>} : memref<200x128xf32, #tpu.memory_space<vmem>>, vector<8x128xf32>,
    %378 = arith.addf %375, %376 : vector<8x128xf32>
    %cst_194 = arith.constant 1.000000e+00 : f32
    %379 = vector.broadcast %cst_194 : f32 to vector<8x128xf32>
    %380 = arith.cmpf ogt, %378, %379 : vector<8x128xf32>
    %381 = arith.extui %380 : vector<8x128xi1> to vector<8x128xi32>
    %382 = arith.sitofp %381 : vector<8x128xi32> to vector<8x128xf32>
    %cst_195 = arith.constant 0.000000e+00 : f32
    %383 = vector.broadcast %cst_195 : f32 to vector<8x128xf32>
    %384 = arith.select %380, %383, %378 : vector<8x128xi1>, vector<8x128xf32>
    %cst_196 = arith.constant -1.000000e+00 : f32
    %385 = vector.broadcast %cst_196 : f32 to vector<8x128xf32>
    %386 = arith.maximumf %384, %385 : vector<8x128xf32>
    %c104_197 = arith.constant 104 : index
    %c0_198 = arith.constant 0 : index
    %387 = vector.load %arg6[%c104_197, %c0_198] : memref<200x128xf32, #tpu.memory_space<vmem>>, vector<8x128xf32>
    %c104_199 = arith.constant 104 : index
    %c0_200 = arith.constant 0 : index
    %388 = vector.load %arg6[%c104_199, %c0_200] : memref<200x128xf32, #tpu.memory_space<vmem>>, vector<8x128xf32>
    tpu.vector_store %arg6[%c104_199, %c0_200], %382 {strides = array<i32>} : memref<200x128xf32, #tpu.memory_space<vmem>>, vector<8x128xf32>,
    %389 = arith.addf %386, %387 : vector<8x128xf32>
    %cst_201 = arith.constant 1.000000e+00 : f32
    %390 = vector.broadcast %cst_201 : f32 to vector<8x128xf32>
    %391 = arith.cmpf ogt, %389, %390 : vector<8x128xf32>
    %392 = arith.extui %391 : vector<8x128xi1> to vector<8x128xi32>
    %393 = arith.sitofp %392 : vector<8x128xi32> to vector<8x128xf32>
    %cst_202 = arith.constant 0.000000e+00 : f32
    %394 = vector.broadcast %cst_202 : f32 to vector<8x128xf32>
    %395 = arith.select %391, %394, %389 : vector<8x128xi1>, vector<8x128xf32>
    %cst_203 = arith.constant -1.000000e+00 : f32
    %396 = vector.broadcast %cst_203 : f32 to vector<8x128xf32>
    %397 = arith.maximumf %395, %396 : vector<8x128xf32>
    %c112_204 = arith.constant 112 : index
    %c0_205 = arith.constant 0 : index
    %398 = vector.load %arg6[%c112_204, %c0_205] : memref<200x128xf32, #tpu.memory_space<vmem>>, vector<8x128xf32>
    %c112_206 = arith.constant 112 : index
    %c0_207 = arith.constant 0 : index
    %399 = vector.load %arg6[%c112_206, %c0_207] : memref<200x128xf32, #tpu.memory_space<vmem>>, vector<8x128xf32>
    tpu.vector_store %arg6[%c112_206, %c0_207], %393 {strides = array<i32>} : memref<200x128xf32, #tpu.memory_space<vmem>>, vector<8x128xf32>,
    %400 = arith.addf %397, %398 : vector<8x128xf32>
    %cst_208 = arith.constant 1.000000e+00 : f32
    %401 = vector.broadcast %cst_208 : f32 to vector<8x128xf32>
    %402 = arith.cmpf ogt, %400, %401 : vector<8x128xf32>
    %403 = arith.extui %402 : vector<8x128xi1> to vector<8x128xi32>
    %404 = arith.sitofp %403 : vector<8x128xi32> to vector<8x128xf32>
    %cst_209 = arith.constant 0.000000e+00 : f32
    %405 = vector.broadcast %cst_209 : f32 to vector<8x128xf32>
    %406 = arith.select %402, %405, %400 : vector<8x128xi1>, vector<8x128xf32>
    %cst_210 = arith.constant -1.000000e+00 : f32
    %407 = vector.broadcast %cst_210 : f32 to vector<8x128xf32>
    %408 = arith.maximumf %406, %407 : vector<8x128xf32>
    %c120_211 = arith.constant 120 : index
    %c0_212 = arith.constant 0 : index
    %409 = vector.load %arg6[%c120_211, %c0_212] : memref<200x128xf32, #tpu.memory_space<vmem>>, vector<8x128xf32>
    %c120_213 = arith.constant 120 : index
    %c0_214 = arith.constant 0 : index
    %410 = vector.load %arg6[%c120_213, %c0_214] : memref<200x128xf32, #tpu.memory_space<vmem>>, vector<8x128xf32>
    tpu.vector_store %arg6[%c120_213, %c0_214], %404 {strides = array<i32>} : memref<200x128xf32, #tpu.memory_space<vmem>>, vector<8x128xf32>,
    %411 = arith.addf %408, %409 : vector<8x128xf32>
    %cst_215 = arith.constant 1.000000e+00 : f32
    %412 = vector.broadcast %cst_215 : f32 to vector<8x128xf32>
    %413 = arith.cmpf ogt, %411, %412 : vector<8x128xf32>
    %414 = arith.extui %413 : vector<8x128xi1> to vector<8x128xi32>
    %415 = arith.sitofp %414 : vector<8x128xi32> to vector<8x128xf32>
    %cst_216 = arith.constant 0.000000e+00 : f32
    %416 = vector.broadcast %cst_216 : f32 to vector<8x128xf32>
    %417 = arith.select %413, %416, %411 : vector<8x128xi1>, vector<8x128xf32>
    %cst_217 = arith.constant -1.000000e+00 : f32
    %418 = vector.broadcast %cst_217 : f32 to vector<8x128xf32>
    %419 = arith.maximumf %417, %418 : vector<8x128xf32>
    %c128_218 = arith.constant 128 : index
    %c0_219 = arith.constant 0 : index
    %420 = vector.load %arg6[%c128_218, %c0_219] : memref<200x128xf32, #tpu.memory_space<vmem>>, vector<8x128xf32>
    %c128_220 = arith.constant 128 : index
    %c0_221 = arith.constant 0 : index
    %421 = vector.load %arg6[%c128_220, %c0_221] : memref<200x128xf32, #tpu.memory_space<vmem>>, vector<8x128xf32>
    tpu.vector_store %arg6[%c128_220, %c0_221], %415 {strides = array<i32>} : memref<200x128xf32, #tpu.memory_space<vmem>>, vector<8x128xf32>,
    %422 = arith.addf %419, %420 : vector<8x128xf32>
    %cst_222 = arith.constant 1.000000e+00 : f32
    %423 = vector.broadcast %cst_222 : f32 to vector<8x128xf32>
    %424 = arith.cmpf ogt, %422, %423 : vector<8x128xf32>
    %425 = arith.extui %424 : vector<8x128xi1> to vector<8x128xi32>
    %426 = arith.sitofp %425 : vector<8x128xi32> to vector<8x128xf32>
    %cst_223 = arith.constant 0.000000e+00 : f32
    %427 = vector.broadcast %cst_223 : f32 to vector<8x128xf32>
    %428 = arith.select %424, %427, %422 : vector<8x128xi1>, vector<8x128xf32>
    %cst_224 = arith.constant -1.000000e+00 : f32
    %429 = vector.broadcast %cst_224 : f32 to vector<8x128xf32>
    %430 = arith.maximumf %428, %429 : vector<8x128xf32>
    %c136_225 = arith.constant 136 : index
    %c0_226 = arith.constant 0 : index
    %431 = vector.load %arg6[%c136_225, %c0_226] : memref<200x128xf32, #tpu.memory_space<vmem>>, vector<8x128xf32>
    %c136_227 = arith.constant 136 : index
    %c0_228 = arith.constant 0 : index
    %432 = vector.load %arg6[%c136_227, %c0_228] : memref<200x128xf32, #tpu.memory_space<vmem>>, vector<8x128xf32>
    tpu.vector_store %arg6[%c136_227, %c0_228], %426 {strides = array<i32>} : memref<200x128xf32, #tpu.memory_space<vmem>>, vector<8x128xf32>,
    %433 = arith.addf %430, %431 : vector<8x128xf32>
    %cst_229 = arith.constant 1.000000e+00 : f32
    %434 = vector.broadcast %cst_229 : f32 to vector<8x128xf32>
    %435 = arith.cmpf ogt, %433, %434 : vector<8x128xf32>
    %436 = arith.extui %435 : vector<8x128xi1> to vector<8x128xi32>
    %437 = arith.sitofp %436 : vector<8x128xi32> to vector<8x128xf32>
    %cst_230 = arith.constant 0.000000e+00 : f32
    %438 = vector.broadcast %cst_230 : f32 to vector<8x128xf32>
    %439 = arith.select %435, %438, %433 : vector<8x128xi1>, vector<8x128xf32>
    %cst_231 = arith.constant -1.000000e+00 : f32
    %440 = vector.broadcast %cst_231 : f32 to vector<8x128xf32>
    %441 = arith.maximumf %439, %440 : vector<8x128xf32>
    %c144_232 = arith.constant 144 : index
    %c0_233 = arith.constant 0 : index
    %442 = vector.load %arg6[%c144_232, %c0_233] : memref<200x128xf32, #tpu.memory_space<vmem>>, vector<8x128xf32>
    %c144_234 = arith.constant 144 : index
    %c0_235 = arith.constant 0 : index
    %443 = vector.load %arg6[%c144_234, %c0_235] : memref<200x128xf32, #tpu.memory_space<vmem>>, vector<8x128xf32>
    tpu.vector_store %arg6[%c144_234, %c0_235], %437 {strides = array<i32>} : memref<200x128xf32, #tpu.memory_space<vmem>>, vector<8x128xf32>,
    %444 = arith.addf %441, %442 : vector<8x128xf32>
    %cst_236 = arith.constant 1.000000e+00 : f32
    %445 = vector.broadcast %cst_236 : f32 to vector<8x128xf32>
    %446 = arith.cmpf ogt, %444, %445 : vector<8x128xf32>
    %447 = arith.extui %446 : vector<8x128xi1> to vector<8x128xi32>
    %448 = arith.sitofp %447 : vector<8x128xi32> to vector<8x128xf32>
    %cst_237 = arith.constant 0.000000e+00 : f32
    %449 = vector.broadcast %cst_237 : f32 to vector<8x128xf32>
    %450 = arith.select %446, %449, %444 : vector<8x128xi1>, vector<8x128xf32>
    %cst_238 = arith.constant -1.000000e+00 : f32
    %451 = vector.broadcast %cst_238 : f32 to vector<8x128xf32>
    %452 = arith.maximumf %450, %451 : vector<8x128xf32>
    %c152_239 = arith.constant 152 : index
    %c0_240 = arith.constant 0 : index
    %453 = vector.load %arg6[%c152_239, %c0_240] : memref<200x128xf32, #tpu.memory_space<vmem>>, vector<8x128xf32>
    %c152_241 = arith.constant 152 : index
    %c0_242 = arith.constant 0 : index
    %454 = vector.load %arg6[%c152_241, %c0_242] : memref<200x128xf32, #tpu.memory_space<vmem>>, vector<8x128xf32>
    tpu.vector_store %arg6[%c152_241, %c0_242], %448 {strides = array<i32>} : memref<200x128xf32, #tpu.memory_space<vmem>>, vector<8x128xf32>,
    %455 = arith.addf %452, %453 : vector<8x128xf32>
    %cst_243 = arith.constant 1.000000e+00 : f32
    %456 = vector.broadcast %cst_243 : f32 to vector<8x128xf32>
    %457 = arith.cmpf ogt, %455, %456 : vector<8x128xf32>
    %458 = arith.extui %457 : vector<8x128xi1> to vector<8x128xi32>
    %459 = arith.sitofp %458 : vector<8x128xi32> to vector<8x128xf32>
    %cst_244 = arith.constant 0.000000e+00 : f32
    %460 = vector.broadcast %cst_244 : f32 to vector<8x128xf32>
    %461 = arith.select %457, %460, %455 : vector<8x128xi1>, vector<8x128xf32>
    %cst_245 = arith.constant -1.000000e+00 : f32
    %462 = vector.broadcast %cst_245 : f32 to vector<8x128xf32>
    %463 = arith.maximumf %461, %462 : vector<8x128xf32>
    %c160_246 = arith.constant 160 : index
    %c0_247 = arith.constant 0 : index
    %464 = vector.load %arg6[%c160_246, %c0_247] : memref<200x128xf32, #tpu.memory_space<vmem>>, vector<8x128xf32>
    %c160_248 = arith.constant 160 : index
    %c0_249 = arith.constant 0 : index
    %465 = vector.load %arg6[%c160_248, %c0_249] : memref<200x128xf32, #tpu.memory_space<vmem>>, vector<8x128xf32>
    tpu.vector_store %arg6[%c160_248, %c0_249], %459 {strides = array<i32>} : memref<200x128xf32, #tpu.memory_space<vmem>>, vector<8x128xf32>,
    %466 = arith.addf %463, %464 : vector<8x128xf32>
    %cst_250 = arith.constant 1.000000e+00 : f32
    %467 = vector.broadcast %cst_250 : f32 to vector<8x128xf32>
    %468 = arith.cmpf ogt, %466, %467 : vector<8x128xf32>
    %469 = arith.extui %468 : vector<8x128xi1> to vector<8x128xi32>
    %470 = arith.sitofp %469 : vector<8x128xi32> to vector<8x128xf32>
    %cst_251 = arith.constant 0.000000e+00 : f32
    %471 = vector.broadcast %cst_251 : f32 to vector<8x128xf32>
    %472 = arith.select %468, %471, %466 : vector<8x128xi1>, vector<8x128xf32>
    %cst_252 = arith.constant -1.000000e+00 : f32
    %473 = vector.broadcast %cst_252 : f32 to vector<8x128xf32>
    %474 = arith.maximumf %472, %473 : vector<8x128xf32>
    %c168_253 = arith.constant 168 : index
    %c0_254 = arith.constant 0 : index
    %475 = vector.load %arg6[%c168_253, %c0_254] : memref<200x128xf32, #tpu.memory_space<vmem>>, vector<8x128xf32>
    %c168_255 = arith.constant 168 : index
    %c0_256 = arith.constant 0 : index
    %476 = vector.load %arg6[%c168_255, %c0_256] : memref<200x128xf32, #tpu.memory_space<vmem>>, vector<8x128xf32>
    tpu.vector_store %arg6[%c168_255, %c0_256], %470 {strides = array<i32>} : memref<200x128xf32, #tpu.memory_space<vmem>>, vector<8x128xf32>,
    %477 = arith.addf %474, %475 : vector<8x128xf32>
    %cst_257 = arith.constant 1.000000e+00 : f32
    %478 = vector.broadcast %cst_257 : f32 to vector<8x128xf32>
    %479 = arith.cmpf ogt, %477, %478 : vector<8x128xf32>
    %480 = arith.extui %479 : vector<8x128xi1> to vector<8x128xi32>
    %481 = arith.sitofp %480 : vector<8x128xi32> to vector<8x128xf32>
    %cst_258 = arith.constant 0.000000e+00 : f32
    %482 = vector.broadcast %cst_258 : f32 to vector<8x128xf32>
    %483 = arith.select %479, %482, %477 : vector<8x128xi1>, vector<8x128xf32>
    %cst_259 = arith.constant -1.000000e+00 : f32
    %484 = vector.broadcast %cst_259 : f32 to vector<8x128xf32>
    %485 = arith.maximumf %483, %484 : vector<8x128xf32>
    %c176_260 = arith.constant 176 : index
    %c0_261 = arith.constant 0 : index
    %486 = vector.load %arg6[%c176_260, %c0_261] : memref<200x128xf32, #tpu.memory_space<vmem>>, vector<8x128xf32>
    %c176_262 = arith.constant 176 : index
    %c0_263 = arith.constant 0 : index
    %487 = vector.load %arg6[%c176_262, %c0_263] : memref<200x128xf32, #tpu.memory_space<vmem>>, vector<8x128xf32>
    tpu.vector_store %arg6[%c176_262, %c0_263], %481 {strides = array<i32>} : memref<200x128xf32, #tpu.memory_space<vmem>>, vector<8x128xf32>,
    %488 = arith.addf %485, %486 : vector<8x128xf32>
    %cst_264 = arith.constant 1.000000e+00 : f32
    %489 = vector.broadcast %cst_264 : f32 to vector<8x128xf32>
    %490 = arith.cmpf ogt, %488, %489 : vector<8x128xf32>
    %491 = arith.extui %490 : vector<8x128xi1> to vector<8x128xi32>
    %492 = arith.sitofp %491 : vector<8x128xi32> to vector<8x128xf32>
    %cst_265 = arith.constant 0.000000e+00 : f32
    %493 = vector.broadcast %cst_265 : f32 to vector<8x128xf32>
    %494 = arith.select %490, %493, %488 : vector<8x128xi1>, vector<8x128xf32>
    %cst_266 = arith.constant -1.000000e+00 : f32
    %495 = vector.broadcast %cst_266 : f32 to vector<8x128xf32>
    %496 = arith.maximumf %494, %495 : vector<8x128xf32>
    %c184_267 = arith.constant 184 : index
    %c0_268 = arith.constant 0 : index
    %497 = vector.load %arg6[%c184_267, %c0_268] : memref<200x128xf32, #tpu.memory_space<vmem>>, vector<8x128xf32>
    %c184_269 = arith.constant 184 : index
    %c0_270 = arith.constant 0 : index
    %498 = vector.load %arg6[%c184_269, %c0_270] : memref<200x128xf32, #tpu.memory_space<vmem>>, vector<8x128xf32>
    tpu.vector_store %arg6[%c184_269, %c0_270], %492 {strides = array<i32>} : memref<200x128xf32, #tpu.memory_space<vmem>>, vector<8x128xf32>,
    %499 = arith.addf %496, %497 : vector<8x128xf32>
    %cst_271 = arith.constant 1.000000e+00 : f32
    %500 = vector.broadcast %cst_271 : f32 to vector<8x128xf32>
    %501 = arith.cmpf ogt, %499, %500 : vector<8x128xf32>
    %502 = arith.extui %501 : vector<8x128xi1> to vector<8x128xi32>
    %503 = arith.sitofp %502 : vector<8x128xi32> to vector<8x128xf32>
    %c192_272 = arith.constant 192 : index
    %c0_273 = arith.constant 0 : index
    %504 = vector.load %arg6[%c192_272, %c0_273] : memref<200x128xf32, #tpu.memory_space<vmem>>, vector<8x128xf32>
    tpu.vector_store %arg6[%c192_272, %c0_273], %503 {strides = array<i32>} : memref<200x128xf32, #tpu.memory_space<vmem>>, vector<8x128xf32>,
    %c0_274 = arith.constant 0 : index
    %c0_275 = arith.constant 0 : index
    %505 = vector.load %arg6[%c0_274, %c0_275] : memref<200x128xf32, #tpu.memory_space<vmem>>, vector<200x128xf32>
    %cst_276 = arith.constant dense<0.000000e+00> : vector<200x128xf32>
    %506 = tpu.matmul %505, %2, %cst_276 {dimension_numbers = #tpu.dot_dimension_numbers<[1], [0], [0], [1], [0, 0, 1, 1], [], []>} : vector<200x128xf32>, vector<128x128xf32>, vector<200x128xf32> -> vector<200x128xf32>
    %c0_277 = arith.constant 0 : index
    %c0_278 = arith.constant 0 : index
    %507 = vector.load %arg6[%c0_277, %c0_278] : memref<200x128xf32, #tpu.memory_space<vmem>>, vector<200x128xf32>
    tpu.vector_store %arg6[%c0_277, %c0_278], %506 {strides = array<i32>} : memref<200x128xf32, #tpu.memory_space<vmem>>, vector<200x128xf32>,
    %c0_279 = arith.constant 0 : index
    %c0_280 = arith.constant 0 : index
    %c0_281 = arith.constant 0 : index
    %508 = vector.load %arg4[%c0_279, %c0_280, %c0_281] : memref<25x8x128xf32, #tpu.memory_space<vmem>>, vector<1x8x128xf32>
    %509 = vector.shape_cast %508 : vector<1x8x128xf32> to vector<8x128xf32>
    %510 = vector.shape_cast %3 : vector<8x128xf32> to vector<1x8x128xf32>
    tpu.vector_store %arg4[%c0_279, %c0_280, %c0_281], %510 {strides = array<i32>} : memref<25x8x128xf32, #tpu.memory_space<vmem>>, vector<1x8x128xf32>,
    %c0_282 = arith.constant 0 : index
    %c0_283 = arith.constant 0 : index
    %511 = vector.load %arg6[%c0_282, %c0_283] : memref<200x128xf32, #tpu.memory_space<vmem>>, vector<8x128xf32>
    %512 = arith.addf %3, %511 : vector<8x128xf32>
    %cst_284 = arith.constant 1.000000e+00 : f32
    %513 = vector.broadcast %cst_284 : f32 to vector<8x128xf32>
    %514 = arith.cmpf ogt, %512, %513 : vector<8x128xf32>
    %515 = arith.extui %514 : vector<8x128xi1> to vector<8x128xi32>
    %516 = arith.sitofp %515 : vector<8x128xi32> to vector<8x128xf32>
    %cst_285 = arith.constant 0.000000e+00 : f32
    %517 = vector.broadcast %cst_285 : f32 to vector<8x128xf32>
    %518 = arith.select %514, %517, %512 : vector<8x128xi1>, vector<8x128xf32>
    %cst_286 = arith.constant -1.000000e+00 : f32
    %519 = vector.broadcast %cst_286 : f32 to vector<8x128xf32>
    %520 = arith.maximumf %518, %519 : vector<8x128xf32>
    %c0_287 = arith.constant 0 : index
    %c0_288 = arith.constant 0 : index
    %c0_289 = arith.constant 0 : index
    %521 = vector.load %arg5[%c0_287, %c0_288, %c0_289] : memref<25x8x128xf32, #tpu.memory_space<vmem>>, vector<1x8x128xf32>
    %522 = vector.shape_cast %521 : vector<1x8x128xf32> to vector<8x128xf32>
    %523 = vector.shape_cast %520 : vector<8x128xf32> to vector<1x8x128xf32>
    tpu.vector_store %arg5[%c0_287, %c0_288, %c0_289], %523 {strides = array<i32>} : memref<25x8x128xf32, #tpu.memory_space<vmem>>, vector<1x8x128xf32>,
    %c1 = arith.constant 1 : index
    %c0_290 = arith.constant 0 : index
    %c0_291 = arith.constant 0 : index
    %524 = vector.load %arg4[%c1, %c0_290, %c0_291] : memref<25x8x128xf32, #tpu.memory_space<vmem>>, vector<1x8x128xf32>
    %525 = vector.shape_cast %524 : vector<1x8x128xf32> to vector<8x128xf32>
    %526 = vector.shape_cast %516 : vector<8x128xf32> to vector<1x8x128xf32>
    tpu.vector_store %arg4[%c1, %c0_290, %c0_291], %526 {strides = array<i32>} : memref<25x8x128xf32, #tpu.memory_space<vmem>>, vector<1x8x128xf32>,
    %c8_292 = arith.constant 8 : index
    %c0_293 = arith.constant 0 : index
    %527 = vector.load %arg6[%c8_292, %c0_293] : memref<200x128xf32, #tpu.memory_space<vmem>>, vector<8x128xf32>
    %528 = arith.addf %520, %527 : vector<8x128xf32>
    %cst_294 = arith.constant 1.000000e+00 : f32
    %529 = vector.broadcast %cst_294 : f32 to vector<8x128xf32>
    %530 = arith.cmpf ogt, %528, %529 : vector<8x128xf32>
    %531 = arith.extui %530 : vector<8x128xi1> to vector<8x128xi32>
    %532 = arith.sitofp %531 : vector<8x128xi32> to vector<8x128xf32>
    %cst_295 = arith.constant 0.000000e+00 : f32
    %533 = vector.broadcast %cst_295 : f32 to vector<8x128xf32>
    %534 = arith.select %530, %533, %528 : vector<8x128xi1>, vector<8x128xf32>
    %cst_296 = arith.constant -1.000000e+00 : f32
    %535 = vector.broadcast %cst_296 : f32 to vector<8x128xf32>
    %536 = arith.maximumf %534, %535 : vector<8x128xf32>
    %c1_297 = arith.constant 1 : index
    %c0_298 = arith.constant 0 : index
    %c0_299 = arith.constant 0 : index
    %537 = vector.load %arg5[%c1_297, %c0_298, %c0_299] : memref<25x8x128xf32, #tpu.memory_space<vmem>>, vector<1x8x128xf32>
    %538 = vector.shape_cast %537 : vector<1x8x128xf32> to vector<8x128xf32>
    %539 = vector.shape_cast %536 : vector<8x128xf32> to vector<1x8x128xf32>
    tpu.vector_store %arg5[%c1_297, %c0_298, %c0_299], %539 {strides = array<i32>} : memref<25x8x128xf32, #tpu.memory_space<vmem>>, vector<1x8x128xf32>,
    %c2 = arith.constant 2 : index
    %c0_300 = arith.constant 0 : index
    %c0_301 = arith.constant 0 : index
    %540 = vector.load %arg4[%c2, %c0_300, %c0_301] : memref<25x8x128xf32, #tpu.memory_space<vmem>>, vector<1x8x128xf32>
    %541 = vector.shape_cast %540 : vector<1x8x128xf32> to vector<8x128xf32>
    %542 = vector.shape_cast %532 : vector<8x128xf32> to vector<1x8x128xf32>
    tpu.vector_store %arg4[%c2, %c0_300, %c0_301], %542 {strides = array<i32>} : memref<25x8x128xf32, #tpu.memory_space<vmem>>, vector<1x8x128xf32>,
    %c16_302 = arith.constant 16 : index
    %c0_303 = arith.constant 0 : index
    %543 = vector.load %arg6[%c16_302, %c0_303] : memref<200x128xf32, #tpu.memory_space<vmem>>, vector<8x128xf32>
    %544 = arith.addf %536, %543 : vector<8x128xf32>
    %cst_304 = arith.constant 1.000000e+00 : f32
    %545 = vector.broadcast %cst_304 : f32 to vector<8x128xf32>
    %546 = arith.cmpf ogt, %544, %545 : vector<8x128xf32>
    %547 = arith.extui %546 : vector<8x128xi1> to vector<8x128xi32>
    %548 = arith.sitofp %547 : vector<8x128xi32> to vector<8x128xf32>
    %cst_305 = arith.constant 0.000000e+00 : f32
    %549 = vector.broadcast %cst_305 : f32 to vector<8x128xf32>
    %550 = arith.select %546, %549, %544 : vector<8x128xi1>, vector<8x128xf32>
    %cst_306 = arith.constant -1.000000e+00 : f32
    %551 = vector.broadcast %cst_306 : f32 to vector<8x128xf32>
    %552 = arith.maximumf %550, %551 : vector<8x128xf32>
    %c2_307 = arith.constant 2 : index
    %c0_308 = arith.constant 0 : index
    %c0_309 = arith.constant 0 : index
    %553 = vector.load %arg5[%c2_307, %c0_308, %c0_309] : memref<25x8x128xf32, #tpu.memory_space<vmem>>, vector<1x8x128xf32>
    %554 = vector.shape_cast %553 : vector<1x8x128xf32> to vector<8x128xf32>
    %555 = vector.shape_cast %552 : vector<8x128xf32> to vector<1x8x128xf32>
    tpu.vector_store %arg5[%c2_307, %c0_308, %c0_309], %555 {strides = array<i32>} : memref<25x8x128xf32, #tpu.memory_space<vmem>>, vector<1x8x128xf32>,
    %c3 = arith.constant 3 : index
    %c0_310 = arith.constant 0 : index
    %c0_311 = arith.constant 0 : index
    %556 = vector.load %arg4[%c3, %c0_310, %c0_311] : memref<25x8x128xf32, #tpu.memory_space<vmem>>, vector<1x8x128xf32>
    %557 = vector.shape_cast %556 : vector<1x8x128xf32> to vector<8x128xf32>
    %558 = vector.shape_cast %548 : vector<8x128xf32> to vector<1x8x128xf32>
    tpu.vector_store %arg4[%c3, %c0_310, %c0_311], %558 {strides = array<i32>} : memref<25x8x128xf32, #tpu.memory_space<vmem>>, vector<1x8x128xf32>,
    %c24_312 = arith.constant 24 : index
    %c0_313 = arith.constant 0 : index
    %559 = vector.load %arg6[%c24_312, %c0_313] : memref<200x128xf32, #tpu.memory_space<vmem>>, vector<8x128xf32>
    %560 = arith.addf %552, %559 : vector<8x128xf32>
    %cst_314 = arith.constant 1.000000e+00 : f32
    %561 = vector.broadcast %cst_314 : f32 to vector<8x128xf32>
    %562 = arith.cmpf ogt, %560, %561 : vector<8x128xf32>
    %563 = arith.extui %562 : vector<8x128xi1> to vector<8x128xi32>
    %564 = arith.sitofp %563 : vector<8x128xi32> to vector<8x128xf32>
    %cst_315 = arith.constant 0.000000e+00 : f32
    %565 = vector.broadcast %cst_315 : f32 to vector<8x128xf32>
    %566 = arith.select %562, %565, %560 : vector<8x128xi1>, vector<8x128xf32>
    %cst_316 = arith.constant -1.000000e+00 : f32
    %567 = vector.broadcast %cst_316 : f32 to vector<8x128xf32>
    %568 = arith.maximumf %566, %567 : vector<8x128xf32>
    %c3_317 = arith.constant 3 : index
    %c0_318 = arith.constant 0 : index
    %c0_319 = arith.constant 0 : index
    %569 = vector.load %arg5[%c3_317, %c0_318, %c0_319] : memref<25x8x128xf32, #tpu.memory_space<vmem>>, vector<1x8x128xf32>
    %570 = vector.shape_cast %569 : vector<1x8x128xf32> to vector<8x128xf32>
    %571 = vector.shape_cast %568 : vector<8x128xf32> to vector<1x8x128xf32>
    tpu.vector_store %arg5[%c3_317, %c0_318, %c0_319], %571 {strides = array<i32>} : memref<25x8x128xf32, #tpu.memory_space<vmem>>, vector<1x8x128xf32>,
    %c4 = arith.constant 4 : index
    %c0_320 = arith.constant 0 : index
    %c0_321 = arith.constant 0 : index
    %572 = vector.load %arg4[%c4, %c0_320, %c0_321] : memref<25x8x128xf32, #tpu.memory_space<vmem>>, vector<1x8x128xf32>
    %573 = vector.shape_cast %572 : vector<1x8x128xf32> to vector<8x128xf32>
    %574 = vector.shape_cast %564 : vector<8x128xf32> to vector<1x8x128xf32>
    tpu.vector_store %arg4[%c4, %c0_320, %c0_321], %574 {strides = array<i32>} : memref<25x8x128xf32, #tpu.memory_space<vmem>>, vector<1x8x128xf32>,
    %c32_322 = arith.constant 32 : index
    %c0_323 = arith.constant 0 : index
    %575 = vector.load %arg6[%c32_322, %c0_323] : memref<200x128xf32, #tpu.memory_space<vmem>>, vector<8x128xf32>
    %576 = arith.addf %568, %575 : vector<8x128xf32>
    %cst_324 = arith.constant 1.000000e+00 : f32
    %577 = vector.broadcast %cst_324 : f32 to vector<8x128xf32>
    %578 = arith.cmpf ogt, %576, %577 : vector<8x128xf32>
    %579 = arith.extui %578 : vector<8x128xi1> to vector<8x128xi32>
    %580 = arith.sitofp %579 : vector<8x128xi32> to vector<8x128xf32>
    %cst_325 = arith.constant 0.000000e+00 : f32
    %581 = vector.broadcast %cst_325 : f32 to vector<8x128xf32>
    %582 = arith.select %578, %581, %576 : vector<8x128xi1>, vector<8x128xf32>
    %cst_326 = arith.constant -1.000000e+00 : f32
    %583 = vector.broadcast %cst_326 : f32 to vector<8x128xf32>
    %584 = arith.maximumf %582, %583 : vector<8x128xf32>
    %c4_327 = arith.constant 4 : index
    %c0_328 = arith.constant 0 : index
    %c0_329 = arith.constant 0 : index
    %585 = vector.load %arg5[%c4_327, %c0_328, %c0_329] : memref<25x8x128xf32, #tpu.memory_space<vmem>>, vector<1x8x128xf32>
    %586 = vector.shape_cast %585 : vector<1x8x128xf32> to vector<8x128xf32>
    %587 = vector.shape_cast %584 : vector<8x128xf32> to vector<1x8x128xf32>
    tpu.vector_store %arg5[%c4_327, %c0_328, %c0_329], %587 {strides = array<i32>} : memref<25x8x128xf32, #tpu.memory_space<vmem>>, vector<1x8x128xf32>,
    %c5 = arith.constant 5 : index
    %c0_330 = arith.constant 0 : index
    %c0_331 = arith.constant 0 : index
    %588 = vector.load %arg4[%c5, %c0_330, %c0_331] : memref<25x8x128xf32, #tpu.memory_space<vmem>>, vector<1x8x128xf32>
    %589 = vector.shape_cast %588 : vector<1x8x128xf32> to vector<8x128xf32>
    %590 = vector.shape_cast %580 : vector<8x128xf32> to vector<1x8x128xf32>
    tpu.vector_store %arg4[%c5, %c0_330, %c0_331], %590 {strides = array<i32>} : memref<25x8x128xf32, #tpu.memory_space<vmem>>, vector<1x8x128xf32>,
    %c40_332 = arith.constant 40 : index
    %c0_333 = arith.constant 0 : index
    %591 = vector.load %arg6[%c40_332, %c0_333] : memref<200x128xf32, #tpu.memory_space<vmem>>, vector<8x128xf32>
    %592 = arith.addf %584, %591 : vector<8x128xf32>
    %cst_334 = arith.constant 1.000000e+00 : f32
    %593 = vector.broadcast %cst_334 : f32 to vector<8x128xf32>
    %594 = arith.cmpf ogt, %592, %593 : vector<8x128xf32>
    %595 = arith.extui %594 : vector<8x128xi1> to vector<8x128xi32>
    %596 = arith.sitofp %595 : vector<8x128xi32> to vector<8x128xf32>
    %cst_335 = arith.constant 0.000000e+00 : f32
    %597 = vector.broadcast %cst_335 : f32 to vector<8x128xf32>
    %598 = arith.select %594, %597, %592 : vector<8x128xi1>, vector<8x128xf32>
    %cst_336 = arith.constant -1.000000e+00 : f32
    %599 = vector.broadcast %cst_336 : f32 to vector<8x128xf32>
    %600 = arith.maximumf %598, %599 : vector<8x128xf32>
    %c5_337 = arith.constant 5 : index
    %c0_338 = arith.constant 0 : index
    %c0_339 = arith.constant 0 : index
    %601 = vector.load %arg5[%c5_337, %c0_338, %c0_339] : memref<25x8x128xf32, #tpu.memory_space<vmem>>, vector<1x8x128xf32>
    %602 = vector.shape_cast %601 : vector<1x8x128xf32> to vector<8x128xf32>
    %603 = vector.shape_cast %600 : vector<8x128xf32> to vector<1x8x128xf32>
    tpu.vector_store %arg5[%c5_337, %c0_338, %c0_339], %603 {strides = array<i32>} : memref<25x8x128xf32, #tpu.memory_space<vmem>>, vector<1x8x128xf32>,
    %c6 = arith.constant 6 : index
    %c0_340 = arith.constant 0 : index
    %c0_341 = arith.constant 0 : index
    %604 = vector.load %arg4[%c6, %c0_340, %c0_341] : memref<25x8x128xf32, #tpu.memory_space<vmem>>, vector<1x8x128xf32>
    %605 = vector.shape_cast %604 : vector<1x8x128xf32> to vector<8x128xf32>
    %606 = vector.shape_cast %596 : vector<8x128xf32> to vector<1x8x128xf32>
    tpu.vector_store %arg4[%c6, %c0_340, %c0_341], %606 {strides = array<i32>} : memref<25x8x128xf32, #tpu.memory_space<vmem>>, vector<1x8x128xf32>,
    %c48_342 = arith.constant 48 : index
    %c0_343 = arith.constant 0 : index
    %607 = vector.load %arg6[%c48_342, %c0_343] : memref<200x128xf32, #tpu.memory_space<vmem>>, vector<8x128xf32>
    %608 = arith.addf %600, %607 : vector<8x128xf32>
    %cst_344 = arith.constant 1.000000e+00 : f32
    %609 = vector.broadcast %cst_344 : f32 to vector<8x128xf32>
    %610 = arith.cmpf ogt, %608, %609 : vector<8x128xf32>
    %611 = arith.extui %610 : vector<8x128xi1> to vector<8x128xi32>
    %612 = arith.sitofp %611 : vector<8x128xi32> to vector<8x128xf32>
    %cst_345 = arith.constant 0.000000e+00 : f32
    %613 = vector.broadcast %cst_345 : f32 to vector<8x128xf32>
    %614 = arith.select %610, %613, %608 : vector<8x128xi1>, vector<8x128xf32>
    %cst_346 = arith.constant -1.000000e+00 : f32
    %615 = vector.broadcast %cst_346 : f32 to vector<8x128xf32>
    %616 = arith.maximumf %614, %615 : vector<8x128xf32>
    %c6_347 = arith.constant 6 : index
    %c0_348 = arith.constant 0 : index
    %c0_349 = arith.constant 0 : index
    %617 = vector.load %arg5[%c6_347, %c0_348, %c0_349] : memref<25x8x128xf32, #tpu.memory_space<vmem>>, vector<1x8x128xf32>
    %618 = vector.shape_cast %617 : vector<1x8x128xf32> to vector<8x128xf32>
    %619 = vector.shape_cast %616 : vector<8x128xf32> to vector<1x8x128xf32>
    tpu.vector_store %arg5[%c6_347, %c0_348, %c0_349], %619 {strides = array<i32>} : memref<25x8x128xf32, #tpu.memory_space<vmem>>, vector<1x8x128xf32>,
    %c7 = arith.constant 7 : index
    %c0_350 = arith.constant 0 : index
    %c0_351 = arith.constant 0 : index
    %620 = vector.load %arg4[%c7, %c0_350, %c0_351] : memref<25x8x128xf32, #tpu.memory_space<vmem>>, vector<1x8x128xf32>
    %621 = vector.shape_cast %620 : vector<1x8x128xf32> to vector<8x128xf32>
    %622 = vector.shape_cast %612 : vector<8x128xf32> to vector<1x8x128xf32>
    tpu.vector_store %arg4[%c7, %c0_350, %c0_351], %622 {strides = array<i32>} : memref<25x8x128xf32, #tpu.memory_space<vmem>>, vector<1x8x128xf32>,
    %c56_352 = arith.constant 56 : index
    %c0_353 = arith.constant 0 : index
    %623 = vector.load %arg6[%c56_352, %c0_353] : memref<200x128xf32, #tpu.memory_space<vmem>>, vector<8x128xf32>
    %624 = arith.addf %616, %623 : vector<8x128xf32>
    %cst_354 = arith.constant 1.000000e+00 : f32
    %625 = vector.broadcast %cst_354 : f32 to vector<8x128xf32>
    %626 = arith.cmpf ogt, %624, %625 : vector<8x128xf32>
    %627 = arith.extui %626 : vector<8x128xi1> to vector<8x128xi32>
    %628 = arith.sitofp %627 : vector<8x128xi32> to vector<8x128xf32>
    %cst_355 = arith.constant 0.000000e+00 : f32
    %629 = vector.broadcast %cst_355 : f32 to vector<8x128xf32>
    %630 = arith.select %626, %629, %624 : vector<8x128xi1>, vector<8x128xf32>
    %cst_356 = arith.constant -1.000000e+00 : f32
    %631 = vector.broadcast %cst_356 : f32 to vector<8x128xf32>
    %632 = arith.maximumf %630, %631 : vector<8x128xf32>
    %c7_357 = arith.constant 7 : index
    %c0_358 = arith.constant 0 : index
    %c0_359 = arith.constant 0 : index
    %633 = vector.load %arg5[%c7_357, %c0_358, %c0_359] : memref<25x8x128xf32, #tpu.memory_space<vmem>>, vector<1x8x128xf32>
    %634 = vector.shape_cast %633 : vector<1x8x128xf32> to vector<8x128xf32>
    %635 = vector.shape_cast %632 : vector<8x128xf32> to vector<1x8x128xf32>
    tpu.vector_store %arg5[%c7_357, %c0_358, %c0_359], %635 {strides = array<i32>} : memref<25x8x128xf32, #tpu.memory_space<vmem>>, vector<1x8x128xf32>,
    %c8_360 = arith.constant 8 : index
    %c0_361 = arith.constant 0 : index
    %c0_362 = arith.constant 0 : index
    %636 = vector.load %arg4[%c8_360, %c0_361, %c0_362] : memref<25x8x128xf32, #tpu.memory_space<vmem>>, vector<1x8x128xf32>
    %637 = vector.shape_cast %636 : vector<1x8x128xf32> to vector<8x128xf32>
    %638 = vector.shape_cast %628 : vector<8x128xf32> to vector<1x8x128xf32>
    tpu.vector_store %arg4[%c8_360, %c0_361, %c0_362], %638 {strides = array<i32>} : memref<25x8x128xf32, #tpu.memory_space<vmem>>, vector<1x8x128xf32>,
    %c64_363 = arith.constant 64 : index
    %c0_364 = arith.constant 0 : index
    %639 = vector.load %arg6[%c64_363, %c0_364] : memref<200x128xf32, #tpu.memory_space<vmem>>, vector<8x128xf32>
    %640 = arith.addf %632, %639 : vector<8x128xf32>
    %cst_365 = arith.constant 1.000000e+00 : f32
    %641 = vector.broadcast %cst_365 : f32 to vector<8x128xf32>
    %642 = arith.cmpf ogt, %640, %641 : vector<8x128xf32>
    %643 = arith.extui %642 : vector<8x128xi1> to vector<8x128xi32>
    %644 = arith.sitofp %643 : vector<8x128xi32> to vector<8x128xf32>
    %cst_366 = arith.constant 0.000000e+00 : f32
    %645 = vector.broadcast %cst_366 : f32 to vector<8x128xf32>
    %646 = arith.select %642, %645, %640 : vector<8x128xi1>, vector<8x128xf32>
    %cst_367 = arith.constant -1.000000e+00 : f32
    %647 = vector.broadcast %cst_367 : f32 to vector<8x128xf32>
    %648 = arith.maximumf %646, %647 : vector<8x128xf32>
    %c8_368 = arith.constant 8 : index
    %c0_369 = arith.constant 0 : index
    %c0_370 = arith.constant 0 : index
    %649 = vector.load %arg5[%c8_368, %c0_369, %c0_370] : memref<25x8x128xf32, #tpu.memory_space<vmem>>, vector<1x8x128xf32>
    %650 = vector.shape_cast %649 : vector<1x8x128xf32> to vector<8x128xf32>
    %651 = vector.shape_cast %648 : vector<8x128xf32> to vector<1x8x128xf32>
    tpu.vector_store %arg5[%c8_368, %c0_369, %c0_370], %651 {strides = array<i32>} : memref<25x8x128xf32, #tpu.memory_space<vmem>>, vector<1x8x128xf32>,
    %c9 = arith.constant 9 : index
    %c0_371 = arith.constant 0 : index
    %c0_372 = arith.constant 0 : index
    %652 = vector.load %arg4[%c9, %c0_371, %c0_372] : memref<25x8x128xf32, #tpu.memory_space<vmem>>, vector<1x8x128xf32>
    %653 = vector.shape_cast %652 : vector<1x8x128xf32> to vector<8x128xf32>
    %654 = vector.shape_cast %644 : vector<8x128xf32> to vector<1x8x128xf32>
    tpu.vector_store %arg4[%c9, %c0_371, %c0_372], %654 {strides = array<i32>} : memref<25x8x128xf32, #tpu.memory_space<vmem>>, vector<1x8x128xf32>,
    %c72_373 = arith.constant 72 : index
    %c0_374 = arith.constant 0 : index
    %655 = vector.load %arg6[%c72_373, %c0_374] : memref<200x128xf32, #tpu.memory_space<vmem>>, vector<8x128xf32>
    %656 = arith.addf %648, %655 : vector<8x128xf32>
    %cst_375 = arith.constant 1.000000e+00 : f32
    %657 = vector.broadcast %cst_375 : f32 to vector<8x128xf32>
    %658 = arith.cmpf ogt, %656, %657 : vector<8x128xf32>
    %659 = arith.extui %658 : vector<8x128xi1> to vector<8x128xi32>
    %660 = arith.sitofp %659 : vector<8x128xi32> to vector<8x128xf32>
    %cst_376 = arith.constant 0.000000e+00 : f32
    %661 = vector.broadcast %cst_376 : f32 to vector<8x128xf32>
    %662 = arith.select %658, %661, %656 : vector<8x128xi1>, vector<8x128xf32>
    %cst_377 = arith.constant -1.000000e+00 : f32
    %663 = vector.broadcast %cst_377 : f32 to vector<8x128xf32>
    %664 = arith.maximumf %662, %663 : vector<8x128xf32>
    %c9_378 = arith.constant 9 : index
    %c0_379 = arith.constant 0 : index
    %c0_380 = arith.constant 0 : index
    %665 = vector.load %arg5[%c9_378, %c0_379, %c0_380] : memref<25x8x128xf32, #tpu.memory_space<vmem>>, vector<1x8x128xf32>
    %666 = vector.shape_cast %665 : vector<1x8x128xf32> to vector<8x128xf32>
    %667 = vector.shape_cast %664 : vector<8x128xf32> to vector<1x8x128xf32>
    tpu.vector_store %arg5[%c9_378, %c0_379, %c0_380], %667 {strides = array<i32>} : memref<25x8x128xf32, #tpu.memory_space<vmem>>, vector<1x8x128xf32>,
    %c10 = arith.constant 10 : index
    %c0_381 = arith.constant 0 : index
    %c0_382 = arith.constant 0 : index
    %668 = vector.load %arg4[%c10, %c0_381, %c0_382] : memref<25x8x128xf32, #tpu.memory_space<vmem>>, vector<1x8x128xf32>
    %669 = vector.shape_cast %668 : vector<1x8x128xf32> to vector<8x128xf32>
    %670 = vector.shape_cast %660 : vector<8x128xf32> to vector<1x8x128xf32>
    tpu.vector_store %arg4[%c10, %c0_381, %c0_382], %670 {strides = array<i32>} : memref<25x8x128xf32, #tpu.memory_space<vmem>>, vector<1x8x128xf32>,
    %c80_383 = arith.constant 80 : index
    %c0_384 = arith.constant 0 : index
    %671 = vector.load %arg6[%c80_383, %c0_384] : memref<200x128xf32, #tpu.memory_space<vmem>>, vector<8x128xf32>
    %672 = arith.addf %664, %671 : vector<8x128xf32>
    %cst_385 = arith.constant 1.000000e+00 : f32
    %673 = vector.broadcast %cst_385 : f32 to vector<8x128xf32>
    %674 = arith.cmpf ogt, %672, %673 : vector<8x128xf32>
    %675 = arith.extui %674 : vector<8x128xi1> to vector<8x128xi32>
    %676 = arith.sitofp %675 : vector<8x128xi32> to vector<8x128xf32>
    %cst_386 = arith.constant 0.000000e+00 : f32
    %677 = vector.broadcast %cst_386 : f32 to vector<8x128xf32>
    %678 = arith.select %674, %677, %672 : vector<8x128xi1>, vector<8x128xf32>
    %cst_387 = arith.constant -1.000000e+00 : f32
    %679 = vector.broadcast %cst_387 : f32 to vector<8x128xf32>
    %680 = arith.maximumf %678, %679 : vector<8x128xf32>
    %c10_388 = arith.constant 10 : index
    %c0_389 = arith.constant 0 : index
    %c0_390 = arith.constant 0 : index
    %681 = vector.load %arg5[%c10_388, %c0_389, %c0_390] : memref<25x8x128xf32, #tpu.memory_space<vmem>>, vector<1x8x128xf32>
    %682 = vector.shape_cast %681 : vector<1x8x128xf32> to vector<8x128xf32>
    %683 = vector.shape_cast %680 : vector<8x128xf32> to vector<1x8x128xf32>
    tpu.vector_store %arg5[%c10_388, %c0_389, %c0_390], %683 {strides = array<i32>} : memref<25x8x128xf32, #tpu.memory_space<vmem>>, vector<1x8x128xf32>,
    %c11 = arith.constant 11 : index
    %c0_391 = arith.constant 0 : index
    %c0_392 = arith.constant 0 : index
    %684 = vector.load %arg4[%c11, %c0_391, %c0_392] : memref<25x8x128xf32, #tpu.memory_space<vmem>>, vector<1x8x128xf32>
    %685 = vector.shape_cast %684 : vector<1x8x128xf32> to vector<8x128xf32>
    %686 = vector.shape_cast %676 : vector<8x128xf32> to vector<1x8x128xf32>
    tpu.vector_store %arg4[%c11, %c0_391, %c0_392], %686 {strides = array<i32>} : memref<25x8x128xf32, #tpu.memory_space<vmem>>, vector<1x8x128xf32>,
    %c88_393 = arith.constant 88 : index
    %c0_394 = arith.constant 0 : index
    %687 = vector.load %arg6[%c88_393, %c0_394] : memref<200x128xf32, #tpu.memory_space<vmem>>, vector<8x128xf32>
    %688 = arith.addf %680, %687 : vector<8x128xf32>
    %cst_395 = arith.constant 1.000000e+00 : f32
    %689 = vector.broadcast %cst_395 : f32 to vector<8x128xf32>
    %690 = arith.cmpf ogt, %688, %689 : vector<8x128xf32>
    %691 = arith.extui %690 : vector<8x128xi1> to vector<8x128xi32>
    %692 = arith.sitofp %691 : vector<8x128xi32> to vector<8x128xf32>
    %cst_396 = arith.constant 0.000000e+00 : f32
    %693 = vector.broadcast %cst_396 : f32 to vector<8x128xf32>
    %694 = arith.select %690, %693, %688 : vector<8x128xi1>, vector<8x128xf32>
    %cst_397 = arith.constant -1.000000e+00 : f32
    %695 = vector.broadcast %cst_397 : f32 to vector<8x128xf32>
    %696 = arith.maximumf %694, %695 : vector<8x128xf32>
    %c11_398 = arith.constant 11 : index
    %c0_399 = arith.constant 0 : index
    %c0_400 = arith.constant 0 : index
    %697 = vector.load %arg5[%c11_398, %c0_399, %c0_400] : memref<25x8x128xf32, #tpu.memory_space<vmem>>, vector<1x8x128xf32>
    %698 = vector.shape_cast %697 : vector<1x8x128xf32> to vector<8x128xf32>
    %699 = vector.shape_cast %696 : vector<8x128xf32> to vector<1x8x128xf32>
    tpu.vector_store %arg5[%c11_398, %c0_399, %c0_400], %699 {strides = array<i32>} : memref<25x8x128xf32, #tpu.memory_space<vmem>>, vector<1x8x128xf32>,
    %c12 = arith.constant 12 : index
    %c0_401 = arith.constant 0 : index
    %c0_402 = arith.constant 0 : index
    %700 = vector.load %arg4[%c12, %c0_401, %c0_402] : memref<25x8x128xf32, #tpu.memory_space<vmem>>, vector<1x8x128xf32>
    %701 = vector.shape_cast %700 : vector<1x8x128xf32> to vector<8x128xf32>
    %702 = vector.shape_cast %692 : vector<8x128xf32> to vector<1x8x128xf32>
    tpu.vector_store %arg4[%c12, %c0_401, %c0_402], %702 {strides = array<i32>} : memref<25x8x128xf32, #tpu.memory_space<vmem>>, vector<1x8x128xf32>,
    %c96_403 = arith.constant 96 : index
    %c0_404 = arith.constant 0 : index
    %703 = vector.load %arg6[%c96_403, %c0_404] : memref<200x128xf32, #tpu.memory_space<vmem>>, vector<8x128xf32>
    %704 = arith.addf %696, %703 : vector<8x128xf32>
    %cst_405 = arith.constant 1.000000e+00 : f32
    %705 = vector.broadcast %cst_405 : f32 to vector<8x128xf32>
    %706 = arith.cmpf ogt, %704, %705 : vector<8x128xf32>
    %707 = arith.extui %706 : vector<8x128xi1> to vector<8x128xi32>
    %708 = arith.sitofp %707 : vector<8x128xi32> to vector<8x128xf32>
    %cst_406 = arith.constant 0.000000e+00 : f32
    %709 = vector.broadcast %cst_406 : f32 to vector<8x128xf32>
    %710 = arith.select %706, %709, %704 : vector<8x128xi1>, vector<8x128xf32>
    %cst_407 = arith.constant -1.000000e+00 : f32
    %711 = vector.broadcast %cst_407 : f32 to vector<8x128xf32>
    %712 = arith.maximumf %710, %711 : vector<8x128xf32>
    %c12_408 = arith.constant 12 : index
    %c0_409 = arith.constant 0 : index
    %c0_410 = arith.constant 0 : index
    %713 = vector.load %arg5[%c12_408, %c0_409, %c0_410] : memref<25x8x128xf32, #tpu.memory_space<vmem>>, vector<1x8x128xf32>
    %714 = vector.shape_cast %713 : vector<1x8x128xf32> to vector<8x128xf32>
    %715 = vector.shape_cast %712 : vector<8x128xf32> to vector<1x8x128xf32>
    tpu.vector_store %arg5[%c12_408, %c0_409, %c0_410], %715 {strides = array<i32>} : memref<25x8x128xf32, #tpu.memory_space<vmem>>, vector<1x8x128xf32>,
    %c13 = arith.constant 13 : index
    %c0_411 = arith.constant 0 : index
    %c0_412 = arith.constant 0 : index
    %716 = vector.load %arg4[%c13, %c0_411, %c0_412] : memref<25x8x128xf32, #tpu.memory_space<vmem>>, vector<1x8x128xf32>
    %717 = vector.shape_cast %716 : vector<1x8x128xf32> to vector<8x128xf32>
    %718 = vector.shape_cast %708 : vector<8x128xf32> to vector<1x8x128xf32>
    tpu.vector_store %arg4[%c13, %c0_411, %c0_412], %718 {strides = array<i32>} : memref<25x8x128xf32, #tpu.memory_space<vmem>>, vector<1x8x128xf32>,
    %c104_413 = arith.constant 104 : index
    %c0_414 = arith.constant 0 : index
    %719 = vector.load %arg6[%c104_413, %c0_414] : memref<200x128xf32, #tpu.memory_space<vmem>>, vector<8x128xf32>
    %720 = arith.addf %712, %719 : vector<8x128xf32>
    %cst_415 = arith.constant 1.000000e+00 : f32
    %721 = vector.broadcast %cst_415 : f32 to vector<8x128xf32>
    %722 = arith.cmpf ogt, %720, %721 : vector<8x128xf32>
    %723 = arith.extui %722 : vector<8x128xi1> to vector<8x128xi32>
    %724 = arith.sitofp %723 : vector<8x128xi32> to vector<8x128xf32>
    %cst_416 = arith.constant 0.000000e+00 : f32
    %725 = vector.broadcast %cst_416 : f32 to vector<8x128xf32>
    %726 = arith.select %722, %725, %720 : vector<8x128xi1>, vector<8x128xf32>
    %cst_417 = arith.constant -1.000000e+00 : f32
    %727 = vector.broadcast %cst_417 : f32 to vector<8x128xf32>
    %728 = arith.maximumf %726, %727 : vector<8x128xf32>
    %c13_418 = arith.constant 13 : index
    %c0_419 = arith.constant 0 : index
    %c0_420 = arith.constant 0 : index
    %729 = vector.load %arg5[%c13_418, %c0_419, %c0_420] : memref<25x8x128xf32, #tpu.memory_space<vmem>>, vector<1x8x128xf32>
    %730 = vector.shape_cast %729 : vector<1x8x128xf32> to vector<8x128xf32>
    %731 = vector.shape_cast %728 : vector<8x128xf32> to vector<1x8x128xf32>
    tpu.vector_store %arg5[%c13_418, %c0_419, %c0_420], %731 {strides = array<i32>} : memref<25x8x128xf32, #tpu.memory_space<vmem>>, vector<1x8x128xf32>,
    %c14 = arith.constant 14 : index
    %c0_421 = arith.constant 0 : index
    %c0_422 = arith.constant 0 : index
    %732 = vector.load %arg4[%c14, %c0_421, %c0_422] : memref<25x8x128xf32, #tpu.memory_space<vmem>>, vector<1x8x128xf32>
    %733 = vector.shape_cast %732 : vector<1x8x128xf32> to vector<8x128xf32>
    %734 = vector.shape_cast %724 : vector<8x128xf32> to vector<1x8x128xf32>
    tpu.vector_store %arg4[%c14, %c0_421, %c0_422], %734 {strides = array<i32>} : memref<25x8x128xf32, #tpu.memory_space<vmem>>, vector<1x8x128xf32>,
    %c112_423 = arith.constant 112 : index
    %c0_424 = arith.constant 0 : index
    %735 = vector.load %arg6[%c112_423, %c0_424] : memref<200x128xf32, #tpu.memory_space<vmem>>, vector<8x128xf32>
    %736 = arith.addf %728, %735 : vector<8x128xf32>
    %cst_425 = arith.constant 1.000000e+00 : f32
    %737 = vector.broadcast %cst_425 : f32 to vector<8x128xf32>
    %738 = arith.cmpf ogt, %736, %737 : vector<8x128xf32>
    %739 = arith.extui %738 : vector<8x128xi1> to vector<8x128xi32>
    %740 = arith.sitofp %739 : vector<8x128xi32> to vector<8x128xf32>
    %cst_426 = arith.constant 0.000000e+00 : f32
    %741 = vector.broadcast %cst_426 : f32 to vector<8x128xf32>
    %742 = arith.select %738, %741, %736 : vector<8x128xi1>, vector<8x128xf32>
    %cst_427 = arith.constant -1.000000e+00 : f32
    %743 = vector.broadcast %cst_427 : f32 to vector<8x128xf32>
    %744 = arith.maximumf %742, %743 : vector<8x128xf32>
    %c14_428 = arith.constant 14 : index
    %c0_429 = arith.constant 0 : index
    %c0_430 = arith.constant 0 : index
    %745 = vector.load %arg5[%c14_428, %c0_429, %c0_430] : memref<25x8x128xf32, #tpu.memory_space<vmem>>, vector<1x8x128xf32>
    %746 = vector.shape_cast %745 : vector<1x8x128xf32> to vector<8x128xf32>
    %747 = vector.shape_cast %744 : vector<8x128xf32> to vector<1x8x128xf32>
    tpu.vector_store %arg5[%c14_428, %c0_429, %c0_430], %747 {strides = array<i32>} : memref<25x8x128xf32, #tpu.memory_space<vmem>>, vector<1x8x128xf32>,
    %c15 = arith.constant 15 : index
    %c0_431 = arith.constant 0 : index
    %c0_432 = arith.constant 0 : index
    %748 = vector.load %arg4[%c15, %c0_431, %c0_432] : memref<25x8x128xf32, #tpu.memory_space<vmem>>, vector<1x8x128xf32>
    %749 = vector.shape_cast %748 : vector<1x8x128xf32> to vector<8x128xf32>
    %750 = vector.shape_cast %740 : vector<8x128xf32> to vector<1x8x128xf32>
    tpu.vector_store %arg4[%c15, %c0_431, %c0_432], %750 {strides = array<i32>} : memref<25x8x128xf32, #tpu.memory_space<vmem>>, vector<1x8x128xf32>,
    %c120_433 = arith.constant 120 : index
    %c0_434 = arith.constant 0 : index
    %751 = vector.load %arg6[%c120_433, %c0_434] : memref<200x128xf32, #tpu.memory_space<vmem>>, vector<8x128xf32>
    %752 = arith.addf %744, %751 : vector<8x128xf32>
    %cst_435 = arith.constant 1.000000e+00 : f32
    %753 = vector.broadcast %cst_435 : f32 to vector<8x128xf32>
    %754 = arith.cmpf ogt, %752, %753 : vector<8x128xf32>
    %755 = arith.extui %754 : vector<8x128xi1> to vector<8x128xi32>
    %756 = arith.sitofp %755 : vector<8x128xi32> to vector<8x128xf32>
    %cst_436 = arith.constant 0.000000e+00 : f32
    %757 = vector.broadcast %cst_436 : f32 to vector<8x128xf32>
    %758 = arith.select %754, %757, %752 : vector<8x128xi1>, vector<8x128xf32>
    %cst_437 = arith.constant -1.000000e+00 : f32
    %759 = vector.broadcast %cst_437 : f32 to vector<8x128xf32>
    %760 = arith.maximumf %758, %759 : vector<8x128xf32>
    %c15_438 = arith.constant 15 : index
    %c0_439 = arith.constant 0 : index
    %c0_440 = arith.constant 0 : index
    %761 = vector.load %arg5[%c15_438, %c0_439, %c0_440] : memref<25x8x128xf32, #tpu.memory_space<vmem>>, vector<1x8x128xf32>
    %762 = vector.shape_cast %761 : vector<1x8x128xf32> to vector<8x128xf32>
    %763 = vector.shape_cast %760 : vector<8x128xf32> to vector<1x8x128xf32>
    tpu.vector_store %arg5[%c15_438, %c0_439, %c0_440], %763 {strides = array<i32>} : memref<25x8x128xf32, #tpu.memory_space<vmem>>, vector<1x8x128xf32>,
    %c16_441 = arith.constant 16 : index
    %c0_442 = arith.constant 0 : index
    %c0_443 = arith.constant 0 : index
    %764 = vector.load %arg4[%c16_441, %c0_442, %c0_443] : memref<25x8x128xf32, #tpu.memory_space<vmem>>, vector<1x8x128xf32>
    %765 = vector.shape_cast %764 : vector<1x8x128xf32> to vector<8x128xf32>
    %766 = vector.shape_cast %756 : vector<8x128xf32> to vector<1x8x128xf32>
    tpu.vector_store %arg4[%c16_441, %c0_442, %c0_443], %766 {strides = array<i32>} : memref<25x8x128xf32, #tpu.memory_space<vmem>>, vector<1x8x128xf32>,
    %c128_444 = arith.constant 128 : index
    %c0_445 = arith.constant 0 : index
    %767 = vector.load %arg6[%c128_444, %c0_445] : memref<200x128xf32, #tpu.memory_space<vmem>>, vector<8x128xf32>
    %768 = arith.addf %760, %767 : vector<8x128xf32>
    %cst_446 = arith.constant 1.000000e+00 : f32
    %769 = vector.broadcast %cst_446 : f32 to vector<8x128xf32>
    %770 = arith.cmpf ogt, %768, %769 : vector<8x128xf32>
    %771 = arith.extui %770 : vector<8x128xi1> to vector<8x128xi32>
    %772 = arith.sitofp %771 : vector<8x128xi32> to vector<8x128xf32>
    %cst_447 = arith.constant 0.000000e+00 : f32
    %773 = vector.broadcast %cst_447 : f32 to vector<8x128xf32>
    %774 = arith.select %770, %773, %768 : vector<8x128xi1>, vector<8x128xf32>
    %cst_448 = arith.constant -1.000000e+00 : f32
    %775 = vector.broadcast %cst_448 : f32 to vector<8x128xf32>
    %776 = arith.maximumf %774, %775 : vector<8x128xf32>
    %c16_449 = arith.constant 16 : index
    %c0_450 = arith.constant 0 : index
    %c0_451 = arith.constant 0 : index
    %777 = vector.load %arg5[%c16_449, %c0_450, %c0_451] : memref<25x8x128xf32, #tpu.memory_space<vmem>>, vector<1x8x128xf32>
    %778 = vector.shape_cast %777 : vector<1x8x128xf32> to vector<8x128xf32>
    %779 = vector.shape_cast %776 : vector<8x128xf32> to vector<1x8x128xf32>
    tpu.vector_store %arg5[%c16_449, %c0_450, %c0_451], %779 {strides = array<i32>} : memref<25x8x128xf32, #tpu.memory_space<vmem>>, vector<1x8x128xf32>,
    %c17 = arith.constant 17 : index
    %c0_452 = arith.constant 0 : index
    %c0_453 = arith.constant 0 : index
    %780 = vector.load %arg4[%c17, %c0_452, %c0_453] : memref<25x8x128xf32, #tpu.memory_space<vmem>>, vector<1x8x128xf32>
    %781 = vector.shape_cast %780 : vector<1x8x128xf32> to vector<8x128xf32>
    %782 = vector.shape_cast %772 : vector<8x128xf32> to vector<1x8x128xf32>
    tpu.vector_store %arg4[%c17, %c0_452, %c0_453], %782 {strides = array<i32>} : memref<25x8x128xf32, #tpu.memory_space<vmem>>, vector<1x8x128xf32>,
    %c136_454 = arith.constant 136 : index
    %c0_455 = arith.constant 0 : index
    %783 = vector.load %arg6[%c136_454, %c0_455] : memref<200x128xf32, #tpu.memory_space<vmem>>, vector<8x128xf32>
    %784 = arith.addf %776, %783 : vector<8x128xf32>
    %cst_456 = arith.constant 1.000000e+00 : f32
    %785 = vector.broadcast %cst_456 : f32 to vector<8x128xf32>
    %786 = arith.cmpf ogt, %784, %785 : vector<8x128xf32>
    %787 = arith.extui %786 : vector<8x128xi1> to vector<8x128xi32>
    %788 = arith.sitofp %787 : vector<8x128xi32> to vector<8x128xf32>
    %cst_457 = arith.constant 0.000000e+00 : f32
    %789 = vector.broadcast %cst_457 : f32 to vector<8x128xf32>
    %790 = arith.select %786, %789, %784 : vector<8x128xi1>, vector<8x128xf32>
    %cst_458 = arith.constant -1.000000e+00 : f32
    %791 = vector.broadcast %cst_458 : f32 to vector<8x128xf32>
    %792 = arith.maximumf %790, %791 : vector<8x128xf32>
    %c17_459 = arith.constant 17 : index
    %c0_460 = arith.constant 0 : index
    %c0_461 = arith.constant 0 : index
    %793 = vector.load %arg5[%c17_459, %c0_460, %c0_461] : memref<25x8x128xf32, #tpu.memory_space<vmem>>, vector<1x8x128xf32>
    %794 = vector.shape_cast %793 : vector<1x8x128xf32> to vector<8x128xf32>
    %795 = vector.shape_cast %792 : vector<8x128xf32> to vector<1x8x128xf32>
    tpu.vector_store %arg5[%c17_459, %c0_460, %c0_461], %795 {strides = array<i32>} : memref<25x8x128xf32, #tpu.memory_space<vmem>>, vector<1x8x128xf32>,
    %c18 = arith.constant 18 : index
    %c0_462 = arith.constant 0 : index
    %c0_463 = arith.constant 0 : index
    %796 = vector.load %arg4[%c18, %c0_462, %c0_463] : memref<25x8x128xf32, #tpu.memory_space<vmem>>, vector<1x8x128xf32>
    %797 = vector.shape_cast %796 : vector<1x8x128xf32> to vector<8x128xf32>
    %798 = vector.shape_cast %788 : vector<8x128xf32> to vector<1x8x128xf32>
    tpu.vector_store %arg4[%c18, %c0_462, %c0_463], %798 {strides = array<i32>} : memref<25x8x128xf32, #tpu.memory_space<vmem>>, vector<1x8x128xf32>,
    %c144_464 = arith.constant 144 : index
    %c0_465 = arith.constant 0 : index
    %799 = vector.load %arg6[%c144_464, %c0_465] : memref<200x128xf32, #tpu.memory_space<vmem>>, vector<8x128xf32>
    %800 = arith.addf %792, %799 : vector<8x128xf32>
    %cst_466 = arith.constant 1.000000e+00 : f32
    %801 = vector.broadcast %cst_466 : f32 to vector<8x128xf32>
    %802 = arith.cmpf ogt, %800, %801 : vector<8x128xf32>
    %803 = arith.extui %802 : vector<8x128xi1> to vector<8x128xi32>
    %804 = arith.sitofp %803 : vector<8x128xi32> to vector<8x128xf32>
    %cst_467 = arith.constant 0.000000e+00 : f32
    %805 = vector.broadcast %cst_467 : f32 to vector<8x128xf32>
    %806 = arith.select %802, %805, %800 : vector<8x128xi1>, vector<8x128xf32>
    %cst_468 = arith.constant -1.000000e+00 : f32
    %807 = vector.broadcast %cst_468 : f32 to vector<8x128xf32>
    %808 = arith.maximumf %806, %807 : vector<8x128xf32>
    %c18_469 = arith.constant 18 : index
    %c0_470 = arith.constant 0 : index
    %c0_471 = arith.constant 0 : index
    %809 = vector.load %arg5[%c18_469, %c0_470, %c0_471] : memref<25x8x128xf32, #tpu.memory_space<vmem>>, vector<1x8x128xf32>
    %810 = vector.shape_cast %809 : vector<1x8x128xf32> to vector<8x128xf32>
    %811 = vector.shape_cast %808 : vector<8x128xf32> to vector<1x8x128xf32>
    tpu.vector_store %arg5[%c18_469, %c0_470, %c0_471], %811 {strides = array<i32>} : memref<25x8x128xf32, #tpu.memory_space<vmem>>, vector<1x8x128xf32>,
    %c19 = arith.constant 19 : index
    %c0_472 = arith.constant 0 : index
    %c0_473 = arith.constant 0 : index
    %812 = vector.load %arg4[%c19, %c0_472, %c0_473] : memref<25x8x128xf32, #tpu.memory_space<vmem>>, vector<1x8x128xf32>
    %813 = vector.shape_cast %812 : vector<1x8x128xf32> to vector<8x128xf32>
    %814 = vector.shape_cast %804 : vector<8x128xf32> to vector<1x8x128xf32>
    tpu.vector_store %arg4[%c19, %c0_472, %c0_473], %814 {strides = array<i32>} : memref<25x8x128xf32, #tpu.memory_space<vmem>>, vector<1x8x128xf32>,
    %c152_474 = arith.constant 152 : index
    %c0_475 = arith.constant 0 : index
    %815 = vector.load %arg6[%c152_474, %c0_475] : memref<200x128xf32, #tpu.memory_space<vmem>>, vector<8x128xf32>
    %816 = arith.addf %808, %815 : vector<8x128xf32>
    %cst_476 = arith.constant 1.000000e+00 : f32
    %817 = vector.broadcast %cst_476 : f32 to vector<8x128xf32>
    %818 = arith.cmpf ogt, %816, %817 : vector<8x128xf32>
    %819 = arith.extui %818 : vector<8x128xi1> to vector<8x128xi32>
    %820 = arith.sitofp %819 : vector<8x128xi32> to vector<8x128xf32>
    %cst_477 = arith.constant 0.000000e+00 : f32
    %821 = vector.broadcast %cst_477 : f32 to vector<8x128xf32>
    %822 = arith.select %818, %821, %816 : vector<8x128xi1>, vector<8x128xf32>
    %cst_478 = arith.constant -1.000000e+00 : f32
    %823 = vector.broadcast %cst_478 : f32 to vector<8x128xf32>
    %824 = arith.maximumf %822, %823 : vector<8x128xf32>
    %c19_479 = arith.constant 19 : index
    %c0_480 = arith.constant 0 : index
    %c0_481 = arith.constant 0 : index
    %825 = vector.load %arg5[%c19_479, %c0_480, %c0_481] : memref<25x8x128xf32, #tpu.memory_space<vmem>>, vector<1x8x128xf32>
    %826 = vector.shape_cast %825 : vector<1x8x128xf32> to vector<8x128xf32>
    %827 = vector.shape_cast %824 : vector<8x128xf32> to vector<1x8x128xf32>
    tpu.vector_store %arg5[%c19_479, %c0_480, %c0_481], %827 {strides = array<i32>} : memref<25x8x128xf32, #tpu.memory_space<vmem>>, vector<1x8x128xf32>,
    %c20 = arith.constant 20 : index
    %c0_482 = arith.constant 0 : index
    %c0_483 = arith.constant 0 : index
    %828 = vector.load %arg4[%c20, %c0_482, %c0_483] : memref<25x8x128xf32, #tpu.memory_space<vmem>>, vector<1x8x128xf32>
    %829 = vector.shape_cast %828 : vector<1x8x128xf32> to vector<8x128xf32>
    %830 = vector.shape_cast %820 : vector<8x128xf32> to vector<1x8x128xf32>
    tpu.vector_store %arg4[%c20, %c0_482, %c0_483], %830 {strides = array<i32>} : memref<25x8x128xf32, #tpu.memory_space<vmem>>, vector<1x8x128xf32>,
    %c160_484 = arith.constant 160 : index
    %c0_485 = arith.constant 0 : index
    %831 = vector.load %arg6[%c160_484, %c0_485] : memref<200x128xf32, #tpu.memory_space<vmem>>, vector<8x128xf32>
    %832 = arith.addf %824, %831 : vector<8x128xf32>
    %cst_486 = arith.constant 1.000000e+00 : f32
    %833 = vector.broadcast %cst_486 : f32 to vector<8x128xf32>
    %834 = arith.cmpf ogt, %832, %833 : vector<8x128xf32>
    %835 = arith.extui %834 : vector<8x128xi1> to vector<8x128xi32>
    %836 = arith.sitofp %835 : vector<8x128xi32> to vector<8x128xf32>
    %cst_487 = arith.constant 0.000000e+00 : f32
    %837 = vector.broadcast %cst_487 : f32 to vector<8x128xf32>
    %838 = arith.select %834, %837, %832 : vector<8x128xi1>, vector<8x128xf32>
    %cst_488 = arith.constant -1.000000e+00 : f32
    %839 = vector.broadcast %cst_488 : f32 to vector<8x128xf32>
    %840 = arith.maximumf %838, %839 : vector<8x128xf32>
    %c20_489 = arith.constant 20 : index
    %c0_490 = arith.constant 0 : index
    %c0_491 = arith.constant 0 : index
    %841 = vector.load %arg5[%c20_489, %c0_490, %c0_491] : memref<25x8x128xf32, #tpu.memory_space<vmem>>, vector<1x8x128xf32>
    %842 = vector.shape_cast %841 : vector<1x8x128xf32> to vector<8x128xf32>
    %843 = vector.shape_cast %840 : vector<8x128xf32> to vector<1x8x128xf32>
    tpu.vector_store %arg5[%c20_489, %c0_490, %c0_491], %843 {strides = array<i32>} : memref<25x8x128xf32, #tpu.memory_space<vmem>>, vector<1x8x128xf32>,
    %c21 = arith.constant 21 : index
    %c0_492 = arith.constant 0 : index
    %c0_493 = arith.constant 0 : index
    %844 = vector.load %arg4[%c21, %c0_492, %c0_493] : memref<25x8x128xf32, #tpu.memory_space<vmem>>, vector<1x8x128xf32>
    %845 = vector.shape_cast %844 : vector<1x8x128xf32> to vector<8x128xf32>
    %846 = vector.shape_cast %836 : vector<8x128xf32> to vector<1x8x128xf32>
    tpu.vector_store %arg4[%c21, %c0_492, %c0_493], %846 {strides = array<i32>} : memref<25x8x128xf32, #tpu.memory_space<vmem>>, vector<1x8x128xf32>,
    %c168_494 = arith.constant 168 : index
    %c0_495 = arith.constant 0 : index
    %847 = vector.load %arg6[%c168_494, %c0_495] : memref<200x128xf32, #tpu.memory_space<vmem>>, vector<8x128xf32>
    %848 = arith.addf %840, %847 : vector<8x128xf32>
    %cst_496 = arith.constant 1.000000e+00 : f32
    %849 = vector.broadcast %cst_496 : f32 to vector<8x128xf32>
    %850 = arith.cmpf ogt, %848, %849 : vector<8x128xf32>
    %851 = arith.extui %850 : vector<8x128xi1> to vector<8x128xi32>
    %852 = arith.sitofp %851 : vector<8x128xi32> to vector<8x128xf32>
    %cst_497 = arith.constant 0.000000e+00 : f32
    %853 = vector.broadcast %cst_497 : f32 to vector<8x128xf32>
    %854 = arith.select %850, %853, %848 : vector<8x128xi1>, vector<8x128xf32>
    %cst_498 = arith.constant -1.000000e+00 : f32
    %855 = vector.broadcast %cst_498 : f32 to vector<8x128xf32>
    %856 = arith.maximumf %854, %855 : vector<8x128xf32>
    %c21_499 = arith.constant 21 : index
    %c0_500 = arith.constant 0 : index
    %c0_501 = arith.constant 0 : index
    %857 = vector.load %arg5[%c21_499, %c0_500, %c0_501] : memref<25x8x128xf32, #tpu.memory_space<vmem>>, vector<1x8x128xf32>
    %858 = vector.shape_cast %857 : vector<1x8x128xf32> to vector<8x128xf32>
    %859 = vector.shape_cast %856 : vector<8x128xf32> to vector<1x8x128xf32>
    tpu.vector_store %arg5[%c21_499, %c0_500, %c0_501], %859 {strides = array<i32>} : memref<25x8x128xf32, #tpu.memory_space<vmem>>, vector<1x8x128xf32>,
    %c22 = arith.constant 22 : index
    %c0_502 = arith.constant 0 : index
    %c0_503 = arith.constant 0 : index
    %860 = vector.load %arg4[%c22, %c0_502, %c0_503] : memref<25x8x128xf32, #tpu.memory_space<vmem>>, vector<1x8x128xf32>
    %861 = vector.shape_cast %860 : vector<1x8x128xf32> to vector<8x128xf32>
    %862 = vector.shape_cast %852 : vector<8x128xf32> to vector<1x8x128xf32>
    tpu.vector_store %arg4[%c22, %c0_502, %c0_503], %862 {strides = array<i32>} : memref<25x8x128xf32, #tpu.memory_space<vmem>>, vector<1x8x128xf32>,
    %c176_504 = arith.constant 176 : index
    %c0_505 = arith.constant 0 : index
    %863 = vector.load %arg6[%c176_504, %c0_505] : memref<200x128xf32, #tpu.memory_space<vmem>>, vector<8x128xf32>
    %864 = arith.addf %856, %863 : vector<8x128xf32>
    %cst_506 = arith.constant 1.000000e+00 : f32
    %865 = vector.broadcast %cst_506 : f32 to vector<8x128xf32>
    %866 = arith.cmpf ogt, %864, %865 : vector<8x128xf32>
    %867 = arith.extui %866 : vector<8x128xi1> to vector<8x128xi32>
    %868 = arith.sitofp %867 : vector<8x128xi32> to vector<8x128xf32>
    %cst_507 = arith.constant 0.000000e+00 : f32
    %869 = vector.broadcast %cst_507 : f32 to vector<8x128xf32>
    %870 = arith.select %866, %869, %864 : vector<8x128xi1>, vector<8x128xf32>
    %cst_508 = arith.constant -1.000000e+00 : f32
    %871 = vector.broadcast %cst_508 : f32 to vector<8x128xf32>
    %872 = arith.maximumf %870, %871 : vector<8x128xf32>
    %c22_509 = arith.constant 22 : index
    %c0_510 = arith.constant 0 : index
    %c0_511 = arith.constant 0 : index
    %873 = vector.load %arg5[%c22_509, %c0_510, %c0_511] : memref<25x8x128xf32, #tpu.memory_space<vmem>>, vector<1x8x128xf32>
    %874 = vector.shape_cast %873 : vector<1x8x128xf32> to vector<8x128xf32>
    %875 = vector.shape_cast %872 : vector<8x128xf32> to vector<1x8x128xf32>
    tpu.vector_store %arg5[%c22_509, %c0_510, %c0_511], %875 {strides = array<i32>} : memref<25x8x128xf32, #tpu.memory_space<vmem>>, vector<1x8x128xf32>,
    %c23 = arith.constant 23 : index
    %c0_512 = arith.constant 0 : index
    %c0_513 = arith.constant 0 : index
    %876 = vector.load %arg4[%c23, %c0_512, %c0_513] : memref<25x8x128xf32, #tpu.memory_space<vmem>>, vector<1x8x128xf32>
    %877 = vector.shape_cast %876 : vector<1x8x128xf32> to vector<8x128xf32>
    %878 = vector.shape_cast %868 : vector<8x128xf32> to vector<1x8x128xf32>
    tpu.vector_store %arg4[%c23, %c0_512, %c0_513], %878 {strides = array<i32>} : memref<25x8x128xf32, #tpu.memory_space<vmem>>, vector<1x8x128xf32>,
    %c184_514 = arith.constant 184 : index
    %c0_515 = arith.constant 0 : index
    %879 = vector.load %arg6[%c184_514, %c0_515] : memref<200x128xf32, #tpu.memory_space<vmem>>, vector<8x128xf32>
    %880 = arith.addf %872, %879 : vector<8x128xf32>
    %cst_516 = arith.constant 1.000000e+00 : f32
    %881 = vector.broadcast %cst_516 : f32 to vector<8x128xf32>
    %882 = arith.cmpf ogt, %880, %881 : vector<8x128xf32>
    %883 = arith.extui %882 : vector<8x128xi1> to vector<8x128xi32>
    %884 = arith.sitofp %883 : vector<8x128xi32> to vector<8x128xf32>
    %cst_517 = arith.constant 0.000000e+00 : f32
    %885 = vector.broadcast %cst_517 : f32 to vector<8x128xf32>
    %886 = arith.select %882, %885, %880 : vector<8x128xi1>, vector<8x128xf32>
    %cst_518 = arith.constant -1.000000e+00 : f32
    %887 = vector.broadcast %cst_518 : f32 to vector<8x128xf32>
    %888 = arith.maximumf %886, %887 : vector<8x128xf32>
    %c23_519 = arith.constant 23 : index
    %c0_520 = arith.constant 0 : index
    %c0_521 = arith.constant 0 : index
    %889 = vector.load %arg5[%c23_519, %c0_520, %c0_521] : memref<25x8x128xf32, #tpu.memory_space<vmem>>, vector<1x8x128xf32>
    %890 = vector.shape_cast %889 : vector<1x8x128xf32> to vector<8x128xf32>
    %891 = vector.shape_cast %888 : vector<8x128xf32> to vector<1x8x128xf32>
    tpu.vector_store %arg5[%c23_519, %c0_520, %c0_521], %891 {strides = array<i32>} : memref<25x8x128xf32, #tpu.memory_space<vmem>>, vector<1x8x128xf32>,
    %c24_522 = arith.constant 24 : index
    %c0_523 = arith.constant 0 : index
    %c0_524 = arith.constant 0 : index
    %892 = vector.load %arg4[%c24_522, %c0_523, %c0_524] : memref<25x8x128xf32, #tpu.memory_space<vmem>>, vector<1x8x128xf32>
    %893 = vector.shape_cast %892 : vector<1x8x128xf32> to vector<8x128xf32>
    %894 = vector.shape_cast %884 : vector<8x128xf32> to vector<1x8x128xf32>
    tpu.vector_store %arg4[%c24_522, %c0_523, %c0_524], %894 {strides = array<i32>} : memref<25x8x128xf32, #tpu.memory_space<vmem>>, vector<1x8x128xf32>,
    %c192_525 = arith.constant 192 : index
    %c0_526 = arith.constant 0 : index
    %895 = vector.load %arg6[%c192_525, %c0_526] : memref<200x128xf32, #tpu.memory_space<vmem>>, vector<8x128xf32>
    %896 = arith.addf %888, %895 : vector<8x128xf32>
    %cst_527 = arith.constant 1.000000e+00 : f32
    %897 = vector.broadcast %cst_527 : f32 to vector<8x128xf32>
    %898 = arith.cmpf ogt, %896, %897 : vector<8x128xf32>
    %cst_528 = arith.constant 0.000000e+00 : f32
    %899 = vector.broadcast %cst_528 : f32 to vector<8x128xf32>
    %900 = arith.select %898, %899, %896 : vector<8x128xi1>, vector<8x128xf32>
    %cst_529 = arith.constant -1.000000e+00 : f32
    %901 = vector.broadcast %cst_529 : f32 to vector<8x128xf32>
    %902 = arith.maximumf %900, %901 : vector<8x128xf32>
    %c24_530 = arith.constant 24 : index
    %c0_531 = arith.constant 0 : index
    %c0_532 = arith.constant 0 : index
    %903 = vector.load %arg5[%c24_530, %c0_531, %c0_532] : memref<25x8x128xf32, #tpu.memory_space<vmem>>, vector<1x8x128xf32>
    %904 = vector.shape_cast %903 : vector<1x8x128xf32> to vector<8x128xf32>
    %905 = vector.shape_cast %902 : vector<8x128xf32> to vector<1x8x128xf32>
    tpu.vector_store %arg5[%c24_530, %c0_531, %c0_532], %905 {strides = array<i32>} : memref<25x8x128xf32, #tpu.memory_space<vmem>>, vector<1x8x128xf32>,
    return
  }
  func.func @transform_0(%arg0: i32) -> (i32, i32) {
    %c0_i32 = arith.constant 0 : i32
    %c0_i32_0 = arith.constant 0 : i32
    return %arg0, %c0_i32 : i32, i32
  }
  func.func @transform_1(%arg0: i32) -> (i32, i32) {
    %c0_i32 = arith.constant 0 : i32
    %c0_i32_0 = arith.constant 0 : i32
    %c0_i32_1 = arith.constant 0 : i32
    return %c0_i32, %c0_i32_0 : i32, i32
  }
  func.func @transform_2(%arg0: i32) -> (i32, i32) {
    %c0_i32 = arith.constant 0 : i32
    %c0_i32_0 = arith.constant 0 : i32
    %c0_i32_1 = arith.constant 0 : i32
    return %c0_i32, %c0_i32_0 : i32, i32
  }
  func.func @transform_3(%arg0: i32) -> (i32, i32, i32) {
    %c0_i32 = arith.constant 0 : i32
    %c0_i32_0 = arith.constant 0 : i32
    %c0_i32_1 = arith.constant 0 : i32
    return %c0_i32, %arg0, %c0_i32_0 : i32, i32, i32
  }
  func.func @transform_4(%arg0: i32) -> (i32, i32, i32) {
    %c0_i32 = arith.constant 0 : i32
    %c0_i32_0 = arith.constant 0 : i32
    %c0_i32_1 = arith.constant 0 : i32
    return %c0_i32, %arg0, %c0_i32_0 : i32, i32, i32
  }
}

</mosaic_0001>

<bundles_post_ra>
// kernel: tpu_custom_call.1
= control target key start
LH: loop header
LB: loop body
LE: loop exit
PB: predicated region body
PF: predicated region fallthrough
CT: control target
= control target key end

     0   :  { %10 = vsyncpa [#allocation4], 0  ;;  %s2202_s0 = inlined_call_operand.hbm [shape: f32[8,128], index: 0, kind: input, shape index: {}]   ;;  %s2203_s1 = inlined_call_operand.hbm [shape: f32[128,128], index: 1, kind: input, shape index: {}]   ;;  %s2204_s2 = inlined_call_operand.hbm [shape: f32[128,128], index: 2, kind: input, shape index: {}]   ;;  %s2205_s3 = inlined_call_operand.hbm [shape: f32[25,8,128], index: 3, kind: output, shape index: {0}]   ;;  %s2206_s4 = inlined_call_operand.hbm [shape: f32[25,8,128], index: 4, kind: output, shape index: {1}]  }
   0x1   :  { %11 = vsyncpa [#allocation7], 0 }
   0x2   :  { %12 = vsyncpa [#allocation5], 0 }
   0x3   :  { %13 = vsyncpa [#allocation11], 0  ;;  %s1827_s15 = smov [#allocation6]   ;;  %s1709_s19 = scalar_lea.hbm %s2203_s1, 2048 }
   0x4   :  { %s29_s16 = sshll.u32 %s1827_s15, 4  ;;  %p1710_p0 = scmp.ne.s32.totalorder %s2203_s1, %s1709_s19  ;;  %s30_s16 = int_to_ptr.vmem [resolvable:$true] %s29_s16 }
   0x5   :  { %p1713_p1 = scmp.lt.u32.totalorder %s1709_s19, %s2203_s1 }
   0x7   :  { %p1715_p2 = pnand %p1713_p1, %p1710_p0 }
   0x9   :  { %1718 = shalt.err (!%p1715_p2)
}
   0xa   :  { %s1719_s24 = scalar_lea.vmem %s30_s16, 2048  ;;  %p1724_p4 = scmp.lt.s32.totalorder %s30_s16, %s30_s16 }
   0xb   :  { %p1720_p3 = scmp.ne.s32.totalorder %s30_s16, %s1719_s24  ;;  %p1725_p5 = scmp.lt.s32.totalorder %s1719_s24, %s1719_s24 }
   0xd   :  { %p1726_p6 = por %p1725_p5, %p1724_p4 }
   0xf   :  { %p1727_p7 = pnand %p1726_p6, %p1720_p3 }
  0x11   :  { %1730 = shalt.err (!%p1727_p7)
}
  0x12   :  { %s1828_s25 = smov 128   ;;  %s1829_s26 = smov 8  }
  0x13   :  { %35 = dma.hbm_to_vmem [thread:$0]  %s2203_s1, 2048, %s30_s16, [#allocation7], %s1828_s25, %s1828_s25, %s1829_s26  }
  0x14   :  { %s1830_s29 = smov [#allocation3]   ;;  %s1831_s5 = smov [#allocation8]  }
  0x15   :  { %s20_s30 = sshll.u32 %s1830_s29, 4  ;;  %s41_s6 = sshll.u32 %s1831_s5, 4  ;;  %s21_s30 = int_to_ptr.vmem [resolvable:$true] %s20_s30  ;;  %s42_s6 = int_to_ptr.vmem [resolvable:$true] %s41_s6 }
  0x16   :  { %s1731_s9 = scalar_lea.hbm %s2202_s0, 128 }
  0x17   :  { %p1732_p8 = scmp.ne.s32.totalorder %s2202_s0, %s1731_s9  ;;  %p1735_p9 = scmp.lt.u32.totalorder %s1731_s9, %s2202_s0 }
  0x19   :  { %p1737_p10 = pnand %p1735_p9, %p1732_p8 }
  0x1b   :  { %1740 = shalt.err (!%p1737_p10)
}
  0x1c   :  { %s1741_s1 = scalar_lea.vmem %s21_s30, 128  ;;  %p1746_p12 = scmp.lt.s32.totalorder %s21_s30, %s21_s30 }
  0x1d   :  { %p1742_p11 = scmp.ne.s32.totalorder %s21_s30, %s1741_s1  ;;  %p1747_p13 = scmp.lt.s32.totalorder %s1741_s1, %s1741_s1 }
  0x1f   :  { %p1748_p0 = por %p1747_p13, %p1746_p12 }
  0x21   :  { %p1749_p1 = pnand %p1748_p0, %p1742_p11 }
  0x23   :  { %1752 = shalt.err (!%p1749_p1)
}
  0x24   :  { %23 = dma.hbm_to_vmem [thread:$0]  %s2202_s0, 128, %s21_s30, [#allocation4]  }
  0x25   :  { %s1753_s18 = scalar_lea.hbm %s2204_s2, 2048 }
  0x26   :  { %p1754_p2 = scmp.ne.s32.totalorder %s2204_s2, %s1753_s18  ;;  %p1757_p3 = scmp.lt.u32.totalorder %s1753_s18, %s2204_s2 }
  0x28   :  { %p1759_p4 = pnand %p1757_p3, %p1754_p2 }
  0x2a   :  { %1762 = shalt.err (!%p1759_p4)
}
  0x2b   :  { %s1763_s23 = scalar_lea.vmem %s42_s6, 2048  ;;  %p1768_p6 = scmp.lt.s32.totalorder %s42_s6, %s42_s6 }
  0x2c   :  { %p1764_p5 = scmp.ne.s32.totalorder %s42_s6, %s1763_s23  ;;  %p1769_p7 = scmp.lt.s32.totalorder %s1763_s23, %s1763_s23 }
  0x2e   :  { %p1770_p8 = por %p1769_p7, %p1768_p6 }
  0x30   :  { %p1771_p9 = pnand %p1770_p8, %p1764_p5 }
  0x32   :  { %1774 = shalt.err (!%p1771_p9)
}
  0x33   :  { %47 = dma.hbm_to_vmem [thread:$0]  %s2204_s2, 2048, %s42_s6, [#allocation7], %s1828_s25, %s1828_s25, %s1829_s26  }
  0x34   :  { %1819 = dma.done.wait [#allocation4], 128  }
  0x35   :  { %1820 = vsyncadd [#allocation4], 4294967168 }
  0x36   :  { %1821 = dma.done.wait [#allocation7], 4096  }
  0x37   :  { %1822 = vsyncadd [#allocation7], 4294963200  ;;  %v1832_v0 = vmov 0.0|0.0   ;;  %vm1833_vm0 = vmmov 0   ;;  %v1834_v1 = vmov 0.0   ;;  %v58_v2 = vld [vmem:[#allocation6] sm:$0xff] }
  0x38   :  { %1649 = vmatprep.subr.bf16.mxu0 %v1832_v0  ;;  %1467 = vmatprep.mubr.msk.f32.mxu0 %vm1833_vm0, %v1834_v1  ;;  %928 = vst [vmem:[#allocation9] sm:$0xff] %v1834_v1  ;;  %v59_v3 = vld [vmem:[#allocation6 + $0x8] sm:$0xff]  ;;  %v60_v4 = vld [vmem:[#allocation6 + $0x10] sm:$0xff]  ;;  %v61_v6 = vld [vmem:[#allocation6 + $0x18] sm:$0xff]  ;;  %s1836_s2 = smov [#allocation9]  }
  0x39   :  { %1673 = vmatprep.subr.bf16.mxu1 %v1832_v0  ;;  %1574 = vmatprep.mubr.msk.f32.mxu1 %vm1833_vm0, %v1834_v1  ;;  %v1650_v5 = vpack.c.bf16 %v59_v3, %v58_v2  ;;  %v1653_v7 = vpack.c.bf16 %v61_v6, %v60_v4  ;;  %v62_v8 = vld [vmem:[#allocation6 + $0x20] sm:$0xff]  ;;  %v63_v9 = vld [vmem:[#allocation6 + $0x28] sm:$0xff]  ;;  %v1913_v10 = vld [vmem:[#allocation3] sm:$0xff]  ;;  %v1835_v4 = vmov 1.0   ;;  %s1204_s27 = sshll.u32 %s1836_s2, 4  ;;  %s1205_s27 = int_to_ptr.vmem [resolvable:$true] %s1204_s27 }
  0x3a   :  { %vm92_vm1 = vcmp.gt.f32.partialorder %v1913_v10, 1.0  ;;  %v1656_v11 = vpack.c.bf16 %v63_v9, %v62_v8  ;;  %v64_v13 = vld [vmem:[#allocation6 + $0x30] sm:$0xff]  ;;  %v65_v14 = vld [vmem:[#allocation6 + $0x38] sm:$0xff]  ;;  %v66_v18 = vld [vmem:[#allocation6 + $0x40] sm:$0xff]  ;;  %s1775_s28 = scalar_lea.vmem %s1205_s27, 3200  ;;  %p1780_p11 = scmp.lt.s32.totalorder %s1205_s27, %s1205_s27 }
  0x3b   :  { %1651 = vmatpush3.bf16.msra.mxu0 %v1650_v5  ;;  %v95_v12 = vsel %vm92_vm1, 0.0, %v1913_v10  ;;  %v1659_v17 = vpack.c.bf16 %v65_v14, %v64_v13  ;;  %v67_v19 = vld [vmem:[#allocation6 + $0x48] sm:$0xff]  ;;  %v74_v20 = vld [vmem:[#allocation8] sm:$0xff]  ;;  %v76_v22 = vld [vmem:[#allocation8 + $0x10] sm:$0xff]  ;;  %p1776_p10 = scmp.ne.s32.totalorder %s1205_s27, %s1775_s28  ;;  %p1781_p12 = scmp.lt.s32.totalorder %s1775_s28, %s1775_s28 }
  0x3c   :  { %1652 = vmatprep.subr.bf16.mxu0 %v1832_v0  ;;  %v96_v15 = vmax.f32 %v95_v12, -1.0  ;;  %v75_v21 = vld [vmem:[#allocation8 + $0x8] sm:$0xff]  ;;  %v77_v25 = vld [vmem:[#allocation8 + $0x18] sm:$0xff]  ;;  %v1662_v27 = vpack.c.bf16 %v67_v19, %v66_v18  ;;  %v68_v28 = vld [vmem:[#allocation6 + $0x50] sm:$0xff] }
  0x3d   :  { %v1674_v24 = vpack.c.bf16 %v75_v21, %v74_v20  ;;  %v1677_v29 = vpack.c.bf16 %v77_v25, %v76_v22  ;;  %v69_v30 = vld [vmem:[#allocation6 + $0x58] sm:$0xff]  ;;  %v78_v32 = vld [vmem:[#allocation8 + $0x20] sm:$0xff]  ;;  %v79_v33 = vld [vmem:[#allocation8 + $0x28] sm:$0xff]  ;;  %p1782_p13 = por %p1781_p12, %p1780_p11 }
  0x3e   :  { %v1921_v16 = vadd.f32 %v96_v15, %v1913_v10  ;;  %v1665_v34 = vpack.c.bf16 %v69_v30, %v68_v28  ;;  %v70_v35 = vld [vmem:[#allocation6 + $0x60] sm:$0xff]  ;;  %v1680_v37 = vpack.c.bf16 %v79_v33, %v78_v32  ;;  %v71_v38 = vld [vmem:[#allocation6 + $0x68] sm:$0xff]  ;;  %v80_v40 = vld [vmem:[#allocation8 + $0x30] sm:$0xff] }
  0x3f   :  { %1654 = vmatpush3.bf16.msra.mxu0 %v1653_v7  ;;  %1675 = vmatpush3.bf16.msra.mxu1 %v1674_v24  ;;  %v81_v41 = vld [vmem:[#allocation8 + $0x38] sm:$0xff]  ;;  %v1668_v43 = vpack.c.bf16 %v71_v38, %v70_v35  ;;  %v72_v44 = vld [vmem:[#allocation6 + $0x70] sm:$0xff]  ;;  %v82_v47 = vld [vmem:[#allocation8 + $0x40] sm:$0xff]  ;;  %p1783_p0 = pnand %p1782_p13, %p1776_p10 }
  0x40   :  { %1655 = vmatprep.subr.bf16.mxu0 %v1832_v0  ;;  %vm99_vm2 = vcmp.gt.f32.partialorder %v1921_v16, 1.0  ;;  %1676 = vmatprep.subr.bf16.mxu1 %v1832_v0  ;;  %v1683_v45 = vpack.c.bf16 %v81_v41, %v80_v40  ;;  %v73_v46 = vld [vmem:[#allocation6 + $0x78] sm:$0xff]  ;;  %v83_v48 = vld [vmem:[#allocation8 + $0x48] sm:$0xff]  ;;  %v84_v54 = vld [vmem:[#allocation8 + $0x50] sm:$0xff] }
  0x41   :  { %v102_v23 = vsel %vm99_vm2, 0.0, %v1921_v16  ;;  %v1671_v51 = vpack.c.bf16 %v73_v46, %v72_v44  ;;  %v1686_v52 = vpack.c.bf16 %v83_v48, %v82_v47  ;;  %v85_v55 = vld [vmem:[#allocation8 + $0x58] sm:$0xff]  ;;  %v86_v59 = vld [vmem:[#allocation8 + $0x60] sm:$0xff]  ;;  %v87_v60 = vld [vmem:[#allocation8 + $0x68] sm:$0xff] }
  0x42   :  { %v103_v26 = vmax.f32 %v102_v23, -1.0  ;;  %v1689_v57 = vpack.c.bf16 %v85_v55, %v84_v54  ;;  %v1692_v62 = vpack.c.bf16 %v87_v60, %v86_v59  ;;  %v88_v63 = vld [vmem:[#allocation8 + $0x70] sm:$0xff]  ;;  %v89_v2 = vld [vmem:[#allocation8 + $0x78] sm:$0xff] }
  0x43   :  { %1657 = vmatpush3.bf16.msra.mxu0 %v1656_v11  ;;  %1678 = vmatpush3.bf16.msra.mxu1 %v1677_v29  ;;  %v1695_v6 = vpack.c.bf16 %v89_v2, %v88_v63 }
  0x44   :  { %1658 = vmatprep.subr.bf16.mxu0 %v1832_v0  ;;  %v1930_v31 = vadd.f32 %v103_v26, %v1913_v10  ;;  %1679 = vmatprep.subr.bf16.mxu1 %v1832_v0 }
  0x46   :  { %vm106_vm3 = vcmp.gt.f32.partialorder %v1930_v31, 1.0 }
  0x47   :  { %1660 = vmatpush3.bf16.msra.mxu0 %v1659_v17  ;;  %v109_v36 = vsel %vm106_vm3, 0.0, %v1930_v31  ;;  %1681 = vmatpush3.bf16.msra.mxu1 %v1680_v37 }
  0x48   :  { %1661 = vmatprep.subr.bf16.mxu0 %v1832_v0  ;;  %v110_v39 = vmax.f32 %v109_v36, -1.0  ;;  %1682 = vmatprep.subr.bf16.mxu1 %v1832_v0 }
  0x4a   :  { %v1940_v42 = vadd.f32 %v110_v39, %v1913_v10 }
  0x4b   :  { %1663 = vmatpush3.bf16.msra.mxu0 %v1662_v27  ;;  %1684 = vmatpush3.bf16.msra.mxu1 %v1683_v45 }
  0x4c   :  { %1664 = vmatprep.subr.bf16.mxu0 %v1832_v0  ;;  %vm113_vm4 = vcmp.gt.f32.partialorder %v1940_v42, 1.0  ;;  %1685 = vmatprep.subr.bf16.mxu1 %v1832_v0 }
  0x4d   :  { %v116_v49 = vsel %vm113_vm4, 0.0, %v1940_v42 }
  0x4e   :  { %v117_v50 = vmax.f32 %v116_v49, -1.0 }
  0x4f   :  { %1666 = vmatpush3.bf16.msra.mxu0 %v1665_v34  ;;  %1687 = vmatpush3.bf16.msra.mxu1 %v1686_v52 }
  0x50   :  { %1667 = vmatprep.subr.bf16.mxu0 %v1832_v0  ;;  %v119_v53 = vadd.f32 %v117_v50, %v1913_v10  ;;  %1688 = vmatprep.subr.bf16.mxu1 %v1832_v0 }
  0x52   :  { %vm120_vm5 = vcmp.gt.f32.partialorder %v119_v53, 1.0 }
  0x53   :  { %1669 = vmatpush3.bf16.msra.mxu0 %v1668_v43  ;;  %v123_v56 = vsel %vm120_vm5, 0.0, %v119_v53  ;;  %1690 = vmatpush3.bf16.msra.mxu1 %v1689_v57 }
  0x54   :  { %1670 = vmatprep.subr.bf16.mxu0 %v1832_v0  ;;  %v124_v58 = vmax.f32 %v123_v56, -1.0  ;;  %1691 = vmatprep.subr.bf16.mxu1 %v1832_v0 }
  0x56   :  { %v126_v61 = vadd.f32 %v124_v58, %v1913_v10 }
  0x57   :  { %1672 = vmatpush3.bf16.msra.mxu0 %v1671_v51  ;;  %1693 = vmatpush3.bf16.msra.mxu1 %v1692_v62 }
  0x58   :  { %vm127_vm6 = vcmp.gt.f32.partialorder %v126_v61, 1.0  ;;  %1694 = vmatprep.subr.bf16.mxu1 %v1832_v0 }
  0x59   :  { %v130_v3 = vsel %vm127_vm6, 0.0, %v126_v61 }
  0x5a   :  { %1468 = vmatmul.mubr.f32.vlgmr.msra.gmra.mrb[0].mxu0 %v1834_v1  ;;  %v131_v5 = vmax.f32 %v130_v3, -1.0 }
  0x5b   :  { %1470 = vmatprep.mubr.msk.f32.mxu0 %vm1833_vm0, %v1834_v1  ;;  %1696 = vmatpush3.bf16.msra.mxu1 %v1695_v6 }
  0x5c   :  { %v133_v7 = vadd.f32 %v131_v5, %v1913_v10 }
  0x5e   :  { %1471 = vmatmul.mubr.msk.f32.gmra.mrb[2].mxu0 %vm92_vm1, %v1835_v4  ;;  %vm134_vm7 = vcmp.gt.f32.partialorder %v133_v7, 1.0  ;;  %1575 = vmatmul.mubr.f32.vlgmr.msra.gmra.mrb[0].mxu1 %v1834_v1 }
  0x5f   :  { %1473 = vmatprep.mubr.msk.f32.mxu0 %vm1833_vm0, %v1834_v1  ;;  %v137_v8 = vsel %vm134_vm7, 0.0, %v133_v7  ;;  %1577 = vmatprep.mubr.msk.f32.mxu1 %vm1833_vm0, %v1834_v1 }
  0x60   :  { %v138_v9 = vmax.f32 %v137_v8, -1.0 }
  0x62   :  { %1474 = vmatmul.mubr.msk.f32.gmra.mrb[4].mxu0 %vm99_vm2, %v1835_v4  ;;  %v140_v11 = vadd.f32 %v138_v9, %v1913_v10 }
  0x63   :  { %1476 = vmatprep.mubr.msk.f32.mxu0 %vm1833_vm0, %v1834_v1 }
  0x64   :  { %vm141_vm8 = vcmp.gt.f32.partialorder %v140_v11, 1.0 }
  0x65   :  { %v144_v0 = vsel %vm141_vm8, 0.0, %v140_v11 }
  0x66   :  { %1477 = vmatmul.mubr.msk.f32.gmra.mrb[6].mxu0 %vm106_vm3, %v1835_v4  ;;  %v145_v12 = vmax.f32 %v144_v0, -1.0 }
  0x67   :  { %1479 = vmatprep.mubr.msk.f32.mxu0 %vm1833_vm0, %v1834_v1 }
  0x68   :  { %v147_v13 = vadd.f32 %v145_v12, %v1913_v10 }
  0x6a   :  { %1480 = vmatmul.mubr.msk.f32.gmra.mrb[8].mxu0 %vm113_vm4, %v1835_v4  ;;  %vm148_vm9 = vcmp.gt.f32.partialorder %v147_v13, 1.0 }
  0x6b   :  { %1482 = vmatprep.mubr.msk.f32.mxu0 %vm1833_vm0, %v1834_v1  ;;  %v151_v14 = vsel %vm148_vm9, 0.0, %v147_v13 }
  0x6c   :  { %v152_v15 = vmax.f32 %v151_v14, -1.0 }
  0x6e   :  { %1483 = vmatmul.mubr.msk.f32.gmra.mrb[10].mxu0 %vm120_vm5, %v1835_v4  ;;  %v154_v16 = vadd.f32 %v152_v15, %v1913_v10 }
  0x6f   :  { %1485 = vmatprep.mubr.msk.f32.mxu0 %vm1833_vm0, %v1834_v1 }
  0x70   :  { %vm155_vm10 = vcmp.gt.f32.partialorder %v154_v16, 1.0 }
  0x71   :  { %v158_v17 = vsel %vm155_vm10, 0.0, %v154_v16 }
  0x72   :  { %1486 = vmatmul.mubr.msk.f32.gmra.mrb[12].mxu0 %vm127_vm6, %v1835_v4  ;;  %v159_v18 = vmax.f32 %v158_v17, -1.0 }
  0x73   :  { %1488 = vmatprep.mubr.msk.f32.mxu0 %vm1833_vm0, %v1834_v1 }
  0x74   :  { %v161_v19 = vadd.f32 %v159_v18, %v1913_v10 }
  0x76   :  { %1489 = vmatmul.mubr.msk.f32.gmra.mrb[14].mxu0 %vm134_vm7, %v1835_v4  ;;  %vm162_vm11 = vcmp.gt.f32.partialorder %v161_v19, 1.0 }
  0x77   :  { %1491 = vmatprep.mubr.msk.f32.mxu0 %vm1833_vm0, %v1834_v1  ;;  %v165_v20 = vsel %vm162_vm11, 0.0, %v161_v19 }
  0x78   :  { %v166_v21 = vmax.f32 %v165_v20, -1.0 }
  0x7a   :  { %1492 = vmatmul.mubr.msk.f32.gmra.mrb[16].mxu0 %vm141_vm8, %v1835_v4  ;;  %v168_v22 = vadd.f32 %v166_v21, %v1913_v10 }
  0x7b   :  { %1494 = vmatprep.mubr.msk.f32.mxu0 %vm1833_vm0, %v1834_v1 }
  0x7c   :  { %vm169_vm12 = vcmp.gt.f32.partialorder %v168_v22, 1.0 }
  0x7d   :  { %v172_v23 = vsel %vm169_vm12, 0.0, %v168_v22 }
  0x7e   :  { %1495 = vmatmul.mubr.msk.f32.gmra.mrb[18].mxu0 %vm148_vm9, %v1835_v4  ;;  %v173_v24 = vmax.f32 %v172_v23, -1.0 }
  0x7f   :  { %1497 = vmatprep.mubr.msk.f32.mxu0 %vm1833_vm0, %v1834_v1 }
  0x80   :  { %v175_v25 = vadd.f32 %v173_v24, %v1913_v10 }
  0x82   :  { %1498 = vmatmul.mubr.msk.f32.gmra.mrb[20].mxu0 %vm155_vm10, %v1835_v4  ;;  %vm176_vm13 = vcmp.gt.f32.partialorder %v175_v25, 1.0 }
  0x83   :  { %1500 = vmatprep.mubr.msk.f32.mxu0 %vm1833_vm0, %v1834_v1  ;;  %v179_v26 = vsel %vm176_vm13, 0.0, %v175_v25 }
  0x84   :  { %v180_v27 = vmax.f32 %v179_v26, -1.0 }
  0x86   :  { %1501 = vmatmul.mubr.msk.f32.gmra.mrb[22].mxu0 %vm162_vm11, %v1835_v4  ;;  %v182_v28 = vadd.f32 %v180_v27, %v1913_v10 }
  0x87   :  { %1503 = vmatprep.mubr.msk.f32.mxu0 %vm1833_vm0, %v1834_v1 }
  0x88   :  { %vm183_vm14 = vcmp.gt.f32.partialorder %v182_v28, 1.0 }
  0x89   :  { %v186_v29 = vsel %vm183_vm14, 0.0, %v182_v28 }
  0x8a   :  { %1504 = vmatmul.mubr.msk.f32.gmra.mrb[24].mxu0 %vm169_vm12, %v1835_v4  ;;  %v187_v30 = vmax.f32 %v186_v29, -1.0 }
  0x8b   :  { %1506 = vmatprep.mubr.msk.f32.mxu0 %vm1833_vm0, %v1834_v1 }
  0x8c   :  { %v189_v31 = vadd.f32 %v187_v30, %v1913_v10 }
  0x8e   :  { %1507 = vmatmul.mubr.msk.f32.gmra.mrb[26].mxu0 %vm176_vm13, %v1835_v4  ;;  %vm190_vm15 = vcmp.gt.f32.partialorder %v189_v31, 1.0 }
  0x8f   :  { %1509 = vmatprep.mubr.msk.f32.mxu0 %vm1833_vm0, %v1834_v1  ;;  %v193_v32 = vsel %vm190_vm15, 0.0, %v189_v31 }
  0x90   :  { %v194_v33 = vmax.f32 %v193_v32, -1.0 }
  0x92   :  { %1510 = vmatmul.mubr.msk.f32.gmra.mrb[28].mxu0 %vm183_vm14, %v1835_v4  ;;  %v196_v34 = vadd.f32 %v194_v33, %v1913_v10 }
  0x93   :  { %1512 = vmatprep.mubr.msk.f32.mxu0 %vm1833_vm0, %v1834_v1 }
  0x94   :  { %vm197_vm1 = vcmp.gt.f32.partialorder %v196_v34, 1.0 }
  0x95   :  { %v200_v35 = vsel %vm197_vm1, 0.0, %v196_v34 }
  0x96   :  { %1513 = vmatmul.mubr.msk.f32.gmra.mrb[30].mxu0 %vm190_vm15, %v1835_v4  ;;  %v201_v36 = vmax.f32 %v200_v35, -1.0 }
  0x97   :  { %1515 = vmatprep.mubr.msk.f32.mxu0 %vm1833_vm0, %v1834_v1 }
  0x98   :  { %v203_v37 = vadd.f32 %v201_v36, %v1913_v10 }
  0x9a   :  { %1516 = vmatmul.mubr.msk.f32.gmra.mrb[32].mxu0 %vm197_vm1, %v1835_v4  ;;  %vm204_vm2 = vcmp.gt.f32.partialorder %v203_v37, 1.0 }
  0x9b   :  { %1518 = vmatprep.mubr.msk.f32.mxu0 %vm1833_vm0, %v1834_v1  ;;  %v207_v38 = vsel %vm204_vm2, 0.0, %v203_v37 }
  0x9c   :  { %v208_v39 = vmax.f32 %v207_v38, -1.0 }
  0x9e   :  { %1519 = vmatmul.mubr.msk.f32.gmra.mrb[34].mxu0 %vm204_vm2, %v1835_v4  ;;  %v210_v40 = vadd.f32 %v208_v39, %v1913_v10 }
  0x9f   :  { %1521 = vmatprep.mubr.msk.f32.mxu0 %vm1833_vm0, %v1834_v1 }
  0xa0   :  { %vm211_vm3 = vcmp.gt.f32.partialorder %v210_v40, 1.0 }
  0xa1   :  { %v214_v41 = vsel %vm211_vm3, 0.0, %v210_v40 }
  0xa2   :  { %1522 = vmatmul.mubr.msk.f32.gmra.mrb[36].mxu0 %vm211_vm3, %v1835_v4  ;;  %v215_v42 = vmax.f32 %v214_v41, -1.0 }
  0xa3   :  { %1524 = vmatprep.mubr.msk.f32.mxu0 %vm1833_vm0, %v1834_v1 }
  0xa4   :  { %v217_v43 = vadd.f32 %v215_v42, %v1913_v10 }
  0xa6   :  { %vm218_vm4 = vcmp.gt.f32.partialorder %v217_v43, 1.0 }
  0xa7   :  { %v221_v44 = vsel %vm218_vm4, 0.0, %v217_v43  ;;  %1525 = vmatmul.mubr.msk.f32.gmra.mrb[38].mxu0 %vm218_vm4, %v1835_v4 }
  0xa8   :  { %v222_v45 = vmax.f32 %v221_v44, -1.0  ;;  %1527 = vmatprep.mubr.msk.f32.mxu0 %vm1833_vm0, %v1834_v1 }
  0xaa   :  { %v224_v46 = vadd.f32 %v222_v45, %v1913_v10 }
  0xac   :  { %vm225_vm5 = vcmp.gt.f32.partialorder %v224_v46, 1.0 }
  0xad   :  { %v228_v47 = vsel %vm225_vm5, 0.0, %v224_v46  ;;  %1528 = vmatmul.mubr.msk.f32.gmra.mrb[40].mxu0 %vm225_vm5, %v1835_v4 }
  0xae   :  { %v229_v48 = vmax.f32 %v228_v47, -1.0  ;;  %1530 = vmatprep.mubr.msk.f32.mxu0 %vm1833_vm0, %v1834_v1 }
  0xb0   :  { %v231_v49 = vadd.f32 %v229_v48, %v1913_v10 }
  0xb2   :  { %vm232_vm6 = vcmp.gt.f32.partialorder %v231_v49, 1.0 }
  0xb3   :  { %v235_v50 = vsel %vm232_vm6, 0.0, %v231_v49  ;;  %1531 = vmatmul.mubr.msk.f32.gmra.mrb[42].mxu0 %vm232_vm6, %v1835_v4 }
  0xb4   :  { %v236_v51 = vmax.f32 %v235_v50, -1.0  ;;  %1533 = vmatprep.mubr.msk.f32.mxu0 %vm1833_vm0, %v1834_v1 }
  0xb6   :  { %v238_v52 = vadd.f32 %v236_v51, %v1913_v10 }
  0xb8   :  { %vm239_vm7 = vcmp.gt.f32.partialorder %v238_v52, 1.0 }
  0xb9   :  { %v242_v53 = vsel %vm239_vm7, 0.0, %v238_v52  ;;  %1534 = vmatmul.mubr.msk.f32.gmra.mrb[44].mxu0 %vm239_vm7, %v1835_v4 }
  0xba   :  { %v243_v54 = vmax.f32 %v242_v53, -1.0  ;;  %1536 = vmatprep.mubr.msk.f32.mxu0 %vm1833_vm0, %v1834_v1 }
  0xbc   :  { %v245_v55 = vadd.f32 %v243_v54, %v1913_v10 }
  0xbe   :  { %vm246_vm8 = vcmp.gt.f32.partialorder %v245_v55, 1.0 }
  0xbf   :  { %v249_v56 = vsel %vm246_vm8, 0.0, %v245_v55  ;;  %1537 = vmatmul.mubr.msk.f32.gmra.mrb[46].mxu0 %vm246_vm8, %v1835_v4 }
  0xc0   :  { %1539 = vmatprep.mubr.msk.f32.mxu0 %vm1833_vm0, %v1834_v1  ;;  %v250_v2 = vmax.f32 %v249_v56, -1.0 }
  0xc2   :  { %v252_v11 = vadd.f32 %v250_v2, %v1913_v10 }
  0xc4   :  { %vm253_vm13 = vcmp.gt.f32.partialorder %v252_v11, 1.0 }
  0xc5   :  { %1540 = vmatmul.mubr.msk.f32.gmra.mrb[48].mxu0 %vm253_vm13, %v1835_v4 }
 0x12d   :  { %v348_v57 = vpop.f32.mrb[0].mxu0 }
 0x12e   :  { %vm500_vm9 = vcmp.gt.f32.partialorder %v348_v57, 1.0  ;;  %v1469_v58 = vpop.f32.mrb[1].mxu0 }
 0x12f   :  { %v503_v59 = vsel %vm500_vm9, 0.0, %v348_v57  ;;  %1578 = vmatmul.mubr.msk.f32.gmra.mrb[2].mxu1 %vm500_vm9, %v1835_v4 }
 0x130   :  { %v504_v60 = vmax.f32 %v503_v59, -1.0  ;;  %1580 = vmatprep.mubr.msk.f32.mxu1 %vm1833_vm0, %v1834_v1 }
 0x131   :  { %v353_v61 = vpop.f32.mrb[2].mxu0  ;;  %v779_v0 = vpop.f32.mrb[0].mxu1 }
 0x132   :  { %v507_v62 = vadd.f32 %v504_v60, %v353_v61  ;;  %v1472_v63 = vpop.f32.mrb[3].mxu0  ;;  %vm931_vm12 = vcmp.gt.f32.partialorder %v779_v0, 1.0  ;;  %v1576_v13 = vpop.f32.mrb[1].mxu1 }
 0x133   :  { %v1281_v15 = vsel %vm931_vm12, 1.0, %v1834_v1  ;;  %v2076_v16 = vsel %vm931_vm12, 0.0, %v779_v0 }
 0x134   :  { %vm508_vm10 = vcmp.gt.f32.partialorder %v507_v62, 1.0  ;;  %v935_v10 = vmax.f32 %v2076_v16, -1.0  ;;  %938 = vst [vmem:[#allocation9 + $0x8] sm:$0xff] %v1281_v15 }
 0x135   :  { %v511_v3 = vsel %vm508_vm10, 0.0, %v507_v62  ;;  %1581 = vmatmul.mubr.msk.f32.gmra.mrb[4].mxu1 %vm508_vm10, %v1835_v4  ;;  %v358_v5 = vpop.f32.mrb[4].mxu0 }
 0x136   :  { %v512_v6 = vmax.f32 %v511_v3, -1.0  ;;  %v1475_v7 = vpop.f32.mrb[5].mxu0  ;;  %1583 = vmatprep.mubr.msk.f32.mxu1 %vm1833_vm0, %v1834_v1  ;;  %936 = vst [vmem:[#allocation10] sm:$0xff] %v935_v10 }
 0x138   :  { %v515_v8 = vadd.f32 %v512_v6, %v358_v5 }
 0x139   :  { %v363_v9 = vpop.f32.mrb[6].mxu0 }
 0x13a   :  { %vm516_vm11 = vcmp.gt.f32.partialorder %v515_v8, 1.0  ;;  %v1478_v12 = vpop.f32.mrb[7].mxu0 }
 0x13b   :  { %v519_v14 = vsel %vm516_vm11, 0.0, %v515_v8  ;;  %1584 = vmatmul.mubr.msk.f32.gmra.mrb[6].mxu1 %vm516_vm11, %v1835_v4 }
 0x13c   :  { %v520_v17 = vmax.f32 %v519_v14, -1.0  ;;  %1586 = vmatprep.mubr.msk.f32.mxu1 %vm1833_vm0, %v1834_v1 }
 0x13d   :  { %v368_v18 = vpop.f32.mrb[8].mxu0 }
 0x13e   :  { %v523_v19 = vadd.f32 %v520_v17, %v363_v9  ;;  %v1481_v20 = vpop.f32.mrb[9].mxu0 }
 0x140   :  { %vm524_vm14 = vcmp.gt.f32.partialorder %v523_v19, 1.0 }
 0x141   :  { %v527_v21 = vsel %vm524_vm14, 0.0, %v523_v19  ;;  %1587 = vmatmul.mubr.msk.f32.gmra.mrb[8].mxu1 %vm524_vm14, %v1835_v4  ;;  %v373_v22 = vpop.f32.mrb[10].mxu0 }
 0x142   :  { %v528_v23 = vmax.f32 %v527_v21, -1.0  ;;  %1589 = vmatprep.mubr.msk.f32.mxu1 %vm1833_vm0, %v1834_v1  ;;  %v1484_v24 = vpop.f32.mrb[11].mxu0 }
 0x144   :  { %v531_v25 = vadd.f32 %v528_v23, %v368_v18 }
 0x145   :  { %v378_v26 = vpop.f32.mrb[12].mxu0 }
 0x146   :  { %vm532_vm15 = vcmp.gt.f32.partialorder %v531_v25, 1.0  ;;  %v1487_v27 = vpop.f32.mrb[13].mxu0 }
 0x147   :  { %v535_v28 = vsel %vm532_vm15, 0.0, %v531_v25  ;;  %1590 = vmatmul.mubr.msk.f32.gmra.mrb[10].mxu1 %vm532_vm15, %v1835_v4 }
 0x148   :  { %v536_v29 = vmax.f32 %v535_v28, -1.0  ;;  %1592 = vmatprep.mubr.msk.f32.mxu1 %vm1833_vm0, %v1834_v1 }
 0x149   :  { %v383_v30 = vpop.f32.mrb[14].mxu0 }
 0x14a   :  { %v539_v31 = vadd.f32 %v536_v29, %v373_v22  ;;  %v1490_v32 = vpop.f32.mrb[15].mxu0 }
 0x14c   :  { %vm540_vm1 = vcmp.gt.f32.partialorder %v539_v31, 1.0 }
 0x14d   :  { %v543_v33 = vsel %vm540_vm1, 0.0, %v539_v31  ;;  %1593 = vmatmul.mubr.msk.f32.gmra.mrb[12].mxu1 %vm540_vm1, %v1835_v4  ;;  %v388_v34 = vpop.f32.mrb[16].mxu0 }
 0x14e   :  { %v544_v35 = vmax.f32 %v543_v33, -1.0  ;;  %1595 = vmatprep.mubr.msk.f32.mxu1 %vm1833_vm0, %v1834_v1  ;;  %v1493_v36 = vpop.f32.mrb[17].mxu0 }
 0x150   :  { %v547_v37 = vadd.f32 %v544_v35, %v378_v26 }
 0x151   :  { %v393_v38 = vpop.f32.mrb[18].mxu0 }
 0x152   :  { %vm548_vm2 = vcmp.gt.f32.partialorder %v547_v37, 1.0  ;;  %v1496_v39 = vpop.f32.mrb[19].mxu0 }
 0x153   :  { %v551_v40 = vsel %vm548_vm2, 0.0, %v547_v37  ;;  %1596 = vmatmul.mubr.msk.f32.gmra.mrb[14].mxu1 %vm548_vm2, %v1835_v4 }
 0x154   :  { %v552_v41 = vmax.f32 %v551_v40, -1.0  ;;  %1598 = vmatprep.mubr.msk.f32.mxu1 %vm1833_vm0, %v1834_v1 }
 0x155   :  { %v398_v42 = vpop.f32.mrb[20].mxu0 }
 0x156   :  { %v555_v43 = vadd.f32 %v552_v41, %v383_v30  ;;  %v1499_v44 = vpop.f32.mrb[21].mxu0 }
 0x158   :  { %vm556_vm3 = vcmp.gt.f32.partialorder %v555_v43, 1.0 }
 0x159   :  { %v559_v45 = vsel %vm556_vm3, 0.0, %v555_v43  ;;  %1599 = vmatmul.mubr.msk.f32.gmra.mrb[16].mxu1 %vm556_vm3, %v1835_v4  ;;  %v403_v46 = vpop.f32.mrb[22].mxu0 }
 0x15a   :  { %v560_v47 = vmax.f32 %v559_v45, -1.0  ;;  %1601 = vmatprep.mubr.msk.f32.mxu1 %vm1833_vm0, %v1834_v1  ;;  %v1502_v48 = vpop.f32.mrb[23].mxu0 }
 0x15c   :  { %v563_v49 = vadd.f32 %v560_v47, %v388_v34 }
 0x15d   :  { %v408_v50 = vpop.f32.mrb[24].mxu0 }
 0x15e   :  { %vm564_vm4 = vcmp.gt.f32.partialorder %v563_v49, 1.0  ;;  %v1505_v51 = vpop.f32.mrb[25].mxu0 }
 0x15f   :  { %v567_v52 = vsel %vm564_vm4, 0.0, %v563_v49  ;;  %1602 = vmatmul.mubr.msk.f32.gmra.mrb[18].mxu1 %vm564_vm4, %v1835_v4 }
 0x160   :  { %v568_v53 = vmax.f32 %v567_v52, -1.0  ;;  %1604 = vmatprep.mubr.msk.f32.mxu1 %vm1833_vm0, %v1834_v1 }
 0x161   :  { %v413_v54 = vpop.f32.mrb[26].mxu0 }
 0x162   :  { %v571_v55 = vadd.f32 %v568_v53, %v393_v38  ;;  %v1508_v56 = vpop.f32.mrb[27].mxu0 }
 0x164   :  { %vm572_vm5 = vcmp.gt.f32.partialorder %v571_v55, 1.0 }
 0x165   :  { %v575_v57 = vsel %vm572_vm5, 0.0, %v571_v55  ;;  %1605 = vmatmul.mubr.msk.f32.gmra.mrb[20].mxu1 %vm572_vm5, %v1835_v4  ;;  %v418_v58 = vpop.f32.mrb[28].mxu0 }
 0x166   :  { %v576_v59 = vmax.f32 %v575_v57, -1.0  ;;  %1607 = vmatprep.mubr.msk.f32.mxu1 %vm1833_vm0, %v1834_v1  ;;  %v1511_v60 = vpop.f32.mrb[29].mxu0 }
 0x168   :  { %v579_v61 = vadd.f32 %v576_v59, %v398_v42 }
 0x169   :  { %v423_v62 = vpop.f32.mrb[30].mxu0 }
 0x16a   :  { %vm580_vm6 = vcmp.gt.f32.partialorder %v579_v61, 1.0  ;;  %v1514_v63 = vpop.f32.mrb[31].mxu0 }
 0x16b   :  { %v583_v2 = vsel %vm580_vm6, 0.0, %v579_v61  ;;  %1608 = vmatmul.mubr.msk.f32.gmra.mrb[22].mxu1 %vm580_vm6, %v1835_v4 }
 0x16c   :  { %v584_v3 = vmax.f32 %v583_v2, -1.0  ;;  %1610 = vmatprep.mubr.msk.f32.mxu1 %vm1833_vm0, %v1834_v1 }
 0x16d   :  { %v428_v5 = vpop.f32.mrb[32].mxu0 }
 0x16e   :  { %v587_v6 = vadd.f32 %v584_v3, %v403_v46  ;;  %v1517_v7 = vpop.f32.mrb[33].mxu0 }
 0x170   :  { %vm588_vm7 = vcmp.gt.f32.partialorder %v587_v6, 1.0 }
 0x171   :  { %v591_v8 = vsel %vm588_vm7, 0.0, %v587_v6  ;;  %1611 = vmatmul.mubr.msk.f32.gmra.mrb[24].mxu1 %vm588_vm7, %v1835_v4  ;;  %v433_v11 = vpop.f32.mrb[34].mxu0 }
 0x172   :  { %v592_v9 = vmax.f32 %v591_v8, -1.0  ;;  %1613 = vmatprep.mubr.msk.f32.mxu1 %vm1833_vm0, %v1834_v1  ;;  %v1520_v0 = vpop.f32.mrb[35].mxu0 }
 0x174   :  { %v595_v12 = vadd.f32 %v592_v9, %v408_v50 }
 0x175   :  { %v438_v15 = vpop.f32.mrb[36].mxu0 }
 0x176   :  { %vm596_vm8 = vcmp.gt.f32.partialorder %v595_v12, 1.0  ;;  %v1523_v17 = vpop.f32.mrb[37].mxu0 }
 0x177   :  { %v599_v13 = vsel %vm596_vm8, 0.0, %v595_v12  ;;  %1614 = vmatmul.mubr.msk.f32.gmra.mrb[26].mxu1 %vm596_vm8, %v1835_v4 }
 0x178   :  { %v600_v14 = vmax.f32 %v599_v13, -1.0  ;;  %1616 = vmatprep.mubr.msk.f32.mxu1 %vm1833_vm0, %v1834_v1 }
 0x17a   :  { %v603_v18 = vadd.f32 %v600_v14, %v413_v54  ;;  %v443_v21 = vpop.f32.mrb[38].mxu0 }
 0x17b   :  { %v1526_v22 = vpop.f32.mrb[39].mxu0 }
 0x17c   :  { %vm604_vm9 = vcmp.gt.f32.partialorder %v603_v18, 1.0 }
 0x17d   :  { %v607_v19 = vsel %vm604_vm9, 0.0, %v603_v18  ;;  %1617 = vmatmul.mubr.msk.f32.gmra.mrb[28].mxu1 %vm604_vm9, %v1835_v4 }
 0x17e   :  { %v608_v20 = vmax.f32 %v607_v19, -1.0  ;;  %1619 = vmatprep.mubr.msk.f32.mxu1 %vm1833_vm0, %v1834_v1 }
 0x180   :  { %v611_v23 = vadd.f32 %v608_v20, %v418_v58  ;;  %v448_v26 = vpop.f32.mrb[40].mxu0 }
 0x181   :  { %v1529_v27 = vpop.f32.mrb[41].mxu0 }
 0x182   :  { %vm612_vm10 = vcmp.gt.f32.partialorder %v611_v23, 1.0 }
 0x183   :  { %v615_v24 = vsel %vm612_vm10, 0.0, %v611_v23  ;;  %1620 = vmatmul.mubr.msk.f32.gmra.mrb[30].mxu1 %vm612_vm10, %v1835_v4 }
 0x184   :  { %v616_v25 = vmax.f32 %v615_v24, -1.0  ;;  %1622 = vmatprep.mubr.msk.f32.mxu1 %vm1833_vm0, %v1834_v1 }
 0x186   :  { %v619_v28 = vadd.f32 %v616_v25, %v423_v62  ;;  %v453_v31 = vpop.f32.mrb[42].mxu0 }
 0x187   :  { %v1532_v32 = vpop.f32.mrb[43].mxu0 }
 0x188   :  { %vm620_vm11 = vcmp.gt.f32.partialorder %v619_v28, 1.0 }
 0x189   :  { %v623_v29 = vsel %vm620_vm11, 0.0, %v619_v28  ;;  %1623 = vmatmul.mubr.msk.f32.gmra.mrb[32].mxu1 %vm620_vm11, %v1835_v4 }
 0x18a   :  { %v624_v30 = vmax.f32 %v623_v29, -1.0  ;;  %1625 = vmatprep.mubr.msk.f32.mxu1 %vm1833_vm0, %v1834_v1 }
 0x18c   :  { %v627_v33 = vadd.f32 %v624_v30, %v428_v5  ;;  %v458_v36 = vpop.f32.mrb[44].mxu0 }
 0x18d   :  { %v1535_v37 = vpop.f32.mrb[45].mxu0 }
 0x18e   :  { %vm628_vm12 = vcmp.gt.f32.partialorder %v627_v33, 1.0 }
 0x18f   :  { %v631_v34 = vsel %vm628_vm12, 0.0, %v627_v33  ;;  %1626 = vmatmul.mubr.msk.f32.gmra.mrb[34].mxu1 %vm628_vm12, %v1835_v4 }
 0x190   :  { %v632_v35 = vmax.f32 %v631_v34, -1.0  ;;  %1628 = vmatprep.mubr.msk.f32.mxu1 %vm1833_vm0, %v1834_v1 }
 0x192   :  { %v635_v38 = vadd.f32 %v632_v35, %v433_v11  ;;  %v463_v41 = vpop.f32.mrb[46].mxu0 }
 0x193   :  { %v1538_v42 = vpop.f32.mrb[47].mxu0 }
 0x194   :  { %vm636_vm13 = vcmp.gt.f32.partialorder %v635_v38, 1.0 }
 0x195   :  { %v639_v39 = vsel %vm636_vm13, 0.0, %v635_v38  ;;  %1629 = vmatmul.mubr.msk.f32.gmra.mrb[36].mxu1 %vm636_vm13, %v1835_v4 }
 0x196   :  { %v640_v40 = vmax.f32 %v639_v39, -1.0  ;;  %1631 = vmatprep.mubr.msk.f32.mxu1 %vm1833_vm0, %v1834_v1 }
 0x198   :  { %v643_v43 = vadd.f32 %v640_v40, %v438_v15  ;;  %v468_v11 = vpop.f32.mrb[48].mxu0 }
 0x199   :  { %v1541_v0 = vpop.f32.mrb[49].mxu0 }
 0x19a   :  { %vm644_vm14 = vcmp.gt.f32.partialorder %v643_v43, 1.0 }
 0x19b   :  { %v647_v44 = vsel %vm644_vm14, 0.0, %v643_v43  ;;  %1632 = vmatmul.mubr.msk.f32.gmra.mrb[38].mxu1 %vm644_vm14, %v1835_v4 }
 0x19c   :  { %v648_v45 = vmax.f32 %v647_v44, -1.0  ;;  %1634 = vmatprep.mubr.msk.f32.mxu1 %vm1833_vm0, %v1834_v1 }
 0x19e   :  { %v651_v46 = vadd.f32 %v648_v45, %v443_v21 }
 0x1a0   :  { %vm652_vm15 = vcmp.gt.f32.partialorder %v651_v46, 1.0 }
 0x1a1   :  { %v655_v47 = vsel %vm652_vm15, 0.0, %v651_v46  ;;  %1635 = vmatmul.mubr.msk.f32.gmra.mrb[40].mxu1 %vm652_vm15, %v1835_v4 }
 0x1a2   :  { %v656_v48 = vmax.f32 %v655_v47, -1.0  ;;  %1637 = vmatprep.mubr.msk.f32.mxu1 %vm1833_vm0, %v1834_v1 }
 0x1a4   :  { %v659_v49 = vadd.f32 %v656_v48, %v448_v26 }
 0x1a6   :  { %vm660_vm1 = vcmp.gt.f32.partialorder %v659_v49, 1.0 }
 0x1a7   :  { %v663_v50 = vsel %vm660_vm1, 0.0, %v659_v49  ;;  %1638 = vmatmul.mubr.msk.f32.gmra.mrb[42].mxu1 %vm660_vm1, %v1835_v4 }
 0x1a8   :  { %v664_v51 = vmax.f32 %v663_v50, -1.0  ;;  %1640 = vmatprep.mubr.msk.f32.mxu1 %vm1833_vm0, %v1834_v1 }
 0x1aa   :  { %v667_v52 = vadd.f32 %v664_v51, %v453_v31 }
 0x1ac   :  { %vm668_vm2 = vcmp.gt.f32.partialorder %v667_v52, 1.0 }
 0x1ad   :  { %v671_v53 = vsel %vm668_vm2, 0.0, %v667_v52  ;;  %1641 = vmatmul.mubr.msk.f32.gmra.mrb[44].mxu1 %vm668_vm2, %v1835_v4 }
 0x1ae   :  { %v672_v54 = vmax.f32 %v671_v53, -1.0  ;;  %1643 = vmatprep.mubr.msk.f32.mxu1 %vm1833_vm0, %v1834_v1 }
 0x1b0   :  { %v675_v55 = vadd.f32 %v672_v54, %v458_v36 }
 0x1b2   :  { %vm676_vm3 = vcmp.gt.f32.partialorder %v675_v55, 1.0 }
 0x1b3   :  { %v679_v56 = vsel %vm676_vm3, 0.0, %v675_v55  ;;  %1644 = vmatmul.mubr.msk.f32.gmra.mrb[46].mxu1 %vm676_vm3, %v1835_v4 }
 0x1b4   :  { %v680_v57 = vmax.f32 %v679_v56, -1.0  ;;  %1646 = vmatprep.mubr.msk.f32.mxu1 %vm1833_vm0, %v1834_v1 }
 0x1b6   :  { %v683_v58 = vadd.f32 %v680_v57, %v463_v41 }
 0x1b8   :  { %vm684_vm4 = vcmp.gt.f32.partialorder %v683_v58, 1.0 }
 0x1b9   :  { %1647 = vmatmul.mubr.msk.f32.gmra.mrb[48].mxu1 %vm684_vm4, %v1835_v4 }
 0x202   :  { %v784_v59 = vpop.f32.mrb[2].mxu1 }
 0x203   :  { %v940_v60 = vadd.f32 %v935_v10, %v784_v59  ;;  %v1579_v61 = vpop.f32.mrb[3].mxu1 }
 0x204   :  { %v2157_v61 = vld [vmem:[#allocation9] sm:$0xff] }
 0x205   :  { %vm941_vm5 = vcmp.gt.f32.partialorder %v940_v60, 1.0 }
 0x206   :  { %v1282_v62 = vsel %vm941_vm5, 1.0, %v1834_v1  ;;  %v944_v63 = vsel %vm941_vm5, 0.0, %v940_v60 }
 0x207   :  { %v945_v2 = vmax.f32 %v944_v63, -1.0  ;;  %949 = vst [vmem:[#allocation9 + $0x10] sm:$0xff] %v1282_v62 }
 0x208   :  { %v789_v3 = vpop.f32.mrb[4].mxu1 }
 0x209   :  { %947 = vst [vmem:[#allocation10 + $0x8] sm:$0xff] %v945_v2  ;;  %v951_v5 = vadd.f32 %v945_v2, %v789_v3  ;;  %v1582_v6 = vpop.f32.mrb[5].mxu1 }
 0x20b   :  { %vm952_vm0 = vcmp.gt.f32.partialorder %v951_v5, 1.0 }
 0x20c   :  { %v1283_v7 = vsel %vm952_vm0, 1.0, %v1834_v1  ;;  %v955_v8 = vsel %vm952_vm0, 0.0, %v951_v5 }
 0x20d   :  { %v956_v4 = vmax.f32 %v955_v8, -1.0  ;;  %960 = vst [vmem:[#allocation9 + $0x18] sm:$0xff] %v1283_v7 }
 0x20e   :  { %v794_v9 = vpop.f32.mrb[6].mxu1 }
 0x20f   :  { %958 = vst [vmem:[#allocation10 + $0x10] sm:$0xff] %v956_v4  ;;  %v962_v16 = vadd.f32 %v956_v4, %v794_v9  ;;  %v1585_v10 = vpop.f32.mrb[7].mxu1 }
 0x211   :  { %vm963_vm6 = vcmp.gt.f32.partialorder %v962_v16, 1.0 }
 0x212   :  { %v1284_v12 = vsel %vm963_vm6, 1.0, %v1834_v1  ;;  %v966_v13 = vsel %vm963_vm6, 0.0, %v962_v16 }
 0x213   :  { %v967_v14 = vmax.f32 %v966_v13, -1.0  ;;  %971 = vst [vmem:[#allocation9 + $0x20] sm:$0xff] %v1284_v12 }
 0x214   :  { %v799_v15 = vpop.f32.mrb[8].mxu1 }
 0x215   :  { %969 = vst [vmem:[#allocation10 + $0x18] sm:$0xff] %v967_v14  ;;  %v973_v17 = vadd.f32 %v967_v14, %v799_v15  ;;  %v1588_v18 = vpop.f32.mrb[9].mxu1 }
 0x217   :  { %vm974_vm7 = vcmp.gt.f32.partialorder %v973_v17, 1.0 }
 0x218   :  { %v1285_v19 = vsel %vm974_vm7, 1.0, %v1834_v1  ;;  %v977_v20 = vsel %vm974_vm7, 0.0, %v973_v17 }
 0x219   :  { %v978_v21 = vmax.f32 %v977_v20, -1.0  ;;  %982 = vst [vmem:[#allocation9 + $0x28] sm:$0xff] %v1285_v19 }
 0x21a   :  { %v804_v22 = vpop.f32.mrb[10].mxu1 }
 0x21b   :  { %980 = vst [vmem:[#allocation10 + $0x20] sm:$0xff] %v978_v21  ;;  %v984_v23 = vadd.f32 %v978_v21, %v804_v22  ;;  %v1591_v24 = vpop.f32.mrb[11].mxu1 }
 0x21d   :  { %vm985_vm8 = vcmp.gt.f32.partialorder %v984_v23, 1.0 }
 0x21e   :  { %v1286_v25 = vsel %vm985_vm8, 1.0, %v1834_v1  ;;  %v988_v26 = vsel %vm985_vm8, 0.0, %v984_v23 }
 0x21f   :  { %v989_v27 = vmax.f32 %v988_v26, -1.0  ;;  %993 = vst [vmem:[#allocation9 + $0x30] sm:$0xff] %v1286_v25 }
 0x220   :  { %v809_v28 = vpop.f32.mrb[12].mxu1 }
 0x221   :  { %991 = vst [vmem:[#allocation10 + $0x28] sm:$0xff] %v989_v27  ;;  %v995_v29 = vadd.f32 %v989_v27, %v809_v28  ;;  %v1594_v30 = vpop.f32.mrb[13].mxu1 }
 0x223   :  { %vm996_vm9 = vcmp.gt.f32.partialorder %v995_v29, 1.0 }
 0x224   :  { %v1287_v31 = vsel %vm996_vm9, 1.0, %v1834_v1  ;;  %v999_v32 = vsel %vm996_vm9, 0.0, %v995_v29 }
 0x225   :  { %v1000_v33 = vmax.f32 %v999_v32, -1.0  ;;  %1004 = vst [vmem:[#allocation9 + $0x38] sm:$0xff] %v1287_v31 }
 0x226   :  { %v814_v34 = vpop.f32.mrb[14].mxu1 }
 0x227   :  { %1002 = vst [vmem:[#allocation10 + $0x30] sm:$0xff] %v1000_v33  ;;  %v1006_v35 = vadd.f32 %v1000_v33, %v814_v34  ;;  %v1597_v36 = vpop.f32.mrb[15].mxu1 }
 0x229   :  { %vm1007_vm10 = vcmp.gt.f32.partialorder %v1006_v35, 1.0 }
 0x22a   :  { %v1288_v37 = vsel %vm1007_vm10, 1.0, %v1834_v1  ;;  %v1010_v38 = vsel %vm1007_vm10, 0.0, %v1006_v35 }
 0x22b   :  { %v1011_v39 = vmax.f32 %v1010_v38, -1.0  ;;  %1015 = vst [vmem:[#allocation9 + $0x40] sm:$0xff] %v1288_v37 }
 0x22c   :  { %v819_v40 = vpop.f32.mrb[16].mxu1 }
 0x22d   :  { %1013 = vst [vmem:[#allocation10 + $0x38] sm:$0xff] %v1011_v39  ;;  %v1017_v41 = vadd.f32 %v1011_v39, %v819_v40  ;;  %v1600_v42 = vpop.f32.mrb[17].mxu1 }
 0x22f   :  { %vm1018_vm11 = vcmp.gt.f32.partialorder %v1017_v41, 1.0 }
 0x230   :  { %v1289_v43 = vsel %vm1018_vm11, 1.0, %v1834_v1  ;;  %v1021_v44 = vsel %vm1018_vm11, 0.0, %v1017_v41 }
 0x231   :  { %v1022_v45 = vmax.f32 %v1021_v44, -1.0  ;;  %1026 = vst [vmem:[#allocation9 + $0x48] sm:$0xff] %v1289_v43 }
 0x232   :  { %v824_v46 = vpop.f32.mrb[18].mxu1 }
 0x233   :  { %1024 = vst [vmem:[#allocation10 + $0x40] sm:$0xff] %v1022_v45  ;;  %v1028_v47 = vadd.f32 %v1022_v45, %v824_v46  ;;  %v1603_v48 = vpop.f32.mrb[19].mxu1 }
 0x235   :  { %vm1029_vm12 = vcmp.gt.f32.partialorder %v1028_v47, 1.0 }
 0x236   :  { %v1290_v49 = vsel %vm1029_vm12, 1.0, %v1834_v1  ;;  %v1032_v50 = vsel %vm1029_vm12, 0.0, %v1028_v47 }
 0x237   :  { %v1033_v51 = vmax.f32 %v1032_v50, -1.0  ;;  %1037 = vst [vmem:[#allocation9 + $0x50] sm:$0xff] %v1290_v49 }
 0x238   :  { %v829_v52 = vpop.f32.mrb[20].mxu1 }
 0x239   :  { %1035 = vst [vmem:[#allocation10 + $0x48] sm:$0xff] %v1033_v51  ;;  %v1039_v53 = vadd.f32 %v1033_v51, %v829_v52  ;;  %v1606_v54 = vpop.f32.mrb[21].mxu1 }
 0x23b   :  { %vm1040_vm13 = vcmp.gt.f32.partialorder %v1039_v53, 1.0 }
 0x23c   :  { %v1291_v55 = vsel %vm1040_vm13, 1.0, %v1834_v1  ;;  %v1043_v56 = vsel %vm1040_vm13, 0.0, %v1039_v53 }
 0x23d   :  { %1048 = vst [vmem:[#allocation9 + $0x58] sm:$0xff] %v1291_v55  ;;  %v1044_v57 = vmax.f32 %v1043_v56, -1.0 }
 0x23e   :  { %v834_v58 = vpop.f32.mrb[22].mxu1 }
 0x23f   :  { %1046 = vst [vmem:[#allocation10 + $0x50] sm:$0xff] %v1044_v57  ;;  %v1050_v59 = vadd.f32 %v1044_v57, %v834_v58  ;;  %v1609_v60 = vpop.f32.mrb[23].mxu1 }
 0x241   :  { %vm1051_vm14 = vcmp.gt.f32.partialorder %v1050_v59, 1.0 }
 0x242   :  { %v1292_v62 = vsel %vm1051_vm14, 1.0, %v2157_v61  ;;  %v1054_v63 = vsel %vm1051_vm14, 0.0, %v1050_v59 }
 0x243   :  { %1059 = vst [vmem:[#allocation9 + $0x60] sm:$0xff] %v1292_v62  ;;  %v1055_v2 = vmax.f32 %v1054_v63, -1.0 }
 0x244   :  { %v839_v3 = vpop.f32.mrb[24].mxu1 }
 0x245   :  { %1057 = vst [vmem:[#allocation10 + $0x58] sm:$0xff] %v1055_v2  ;;  %v1061_v5 = vadd.f32 %v1055_v2, %v839_v3  ;;  %v1612_v6 = vpop.f32.mrb[25].mxu1 }
 0x247   :  { %vm1062_vm15 = vcmp.gt.f32.partialorder %v1061_v5, 1.0 }
 0x248   :  { %v1293_v1 = vsel %vm1062_vm15, 1.0, %v2157_v61  ;;  %v1065_v7 = vsel %vm1062_vm15, 0.0, %v1061_v5 }
 0x249   :  { %1070 = vst [vmem:[#allocation9 + $0x68] sm:$0xff] %v1293_v1  ;;  %v1066_v8 = vmax.f32 %v1065_v7, -1.0 }
 0x24a   :  { %v844_v4 = vpop.f32.mrb[26].mxu1 }
 0x24b   :  { %1068 = vst [vmem:[#allocation10 + $0x60] sm:$0xff] %v1066_v8  ;;  %v1072_v9 = vadd.f32 %v1066_v8, %v844_v4  ;;  %v1615_v16 = vpop.f32.mrb[27].mxu1 }
 0x24d   :  { %vm1073_vm1 = vcmp.gt.f32.partialorder %v1072_v9, 1.0 }
 0x24e   :  { %v1294_v10 = vsel %vm1073_vm1, 1.0, %v2157_v61  ;;  %v1076_v11 = vsel %vm1073_vm1, 0.0, %v1072_v9 }
 0x24f   :  { %1081 = vst [vmem:[#allocation9 + $0x70] sm:$0xff] %v1294_v10  ;;  %v1077_v0 = vmax.f32 %v1076_v11, -1.0 }
 0x250   :  { %v849_v12 = vpop.f32.mrb[28].mxu1 }
 0x251   :  { %1079 = vst [vmem:[#allocation10 + $0x68] sm:$0xff] %v1077_v0  ;;  %v1083_v13 = vadd.f32 %v1077_v0, %v849_v12  ;;  %v1618_v14 = vpop.f32.mrb[29].mxu1 }
 0x253   :  { %vm1084_vm2 = vcmp.gt.f32.partialorder %v1083_v13, 1.0 }
 0x254   :  { %v1295_v15 = vsel %vm1084_vm2, 1.0, %v2157_v61  ;;  %v1087_v17 = vsel %vm1084_vm2, 0.0, %v1083_v13 }
 0x255   :  { %1092 = vst [vmem:[#allocation9 + $0x78] sm:$0xff] %v1295_v15  ;;  %v1088_v18 = vmax.f32 %v1087_v17, -1.0 }
 0x256   :  { %v854_v19 = vpop.f32.mrb[30].mxu1 }
 0x257   :  { %1090 = vst [vmem:[#allocation10 + $0x70] sm:$0xff] %v1088_v18  ;;  %v1094_v20 = vadd.f32 %v1088_v18, %v854_v19  ;;  %v1621_v21 = vpop.f32.mrb[31].mxu1 }
 0x259   :  { %vm1095_vm3 = vcmp.gt.f32.partialorder %v1094_v20, 1.0 }
 0x25a   :  { %v1296_v22 = vsel %vm1095_vm3, 1.0, %v2157_v61  ;;  %v1098_v23 = vsel %vm1095_vm3, 0.0, %v1094_v20 }
 0x25b   :  { %1103 = vst [vmem:[#allocation9 + $0x80] sm:$0xff] %v1296_v22  ;;  %v1099_v24 = vmax.f32 %v1098_v23, -1.0 }
 0x25c   :  { %v859_v25 = vpop.f32.mrb[32].mxu1 }
 0x25d   :  { %1101 = vst [vmem:[#allocation10 + $0x78] sm:$0xff] %v1099_v24  ;;  %v1105_v26 = vadd.f32 %v1099_v24, %v859_v25  ;;  %v1624_v27 = vpop.f32.mrb[33].mxu1 }
 0x25f   :  { %vm1106_vm4 = vcmp.gt.f32.partialorder %v1105_v26, 1.0 }
 0x260   :  { %v1297_v28 = vsel %vm1106_vm4, 1.0, %v2157_v61  ;;  %v1109_v29 = vsel %vm1106_vm4, 0.0, %v1105_v26 }
 0x261   :  { %1114 = vst [vmem:[#allocation9 + $0x88] sm:$0xff] %v1297_v28  ;;  %v1110_v30 = vmax.f32 %v1109_v29, -1.0 }
 0x262   :  { %v864_v31 = vpop.f32.mrb[34].mxu1 }
 0x263   :  { %1112 = vst [vmem:[#allocation10 + $0x80] sm:$0xff] %v1110_v30  ;;  %v1116_v32 = vadd.f32 %v1110_v30, %v864_v31  ;;  %v1627_v33 = vpop.f32.mrb[35].mxu1 }
 0x265   :  { %vm1117_vm5 = vcmp.gt.f32.partialorder %v1116_v32, 1.0 }
 0x266   :  { %v1298_v34 = vsel %vm1117_vm5, 1.0, %v2157_v61  ;;  %v1120_v35 = vsel %vm1117_vm5, 0.0, %v1116_v32 }
 0x267   :  { %1125 = vst [vmem:[#allocation9 + $0x90] sm:$0xff] %v1298_v34  ;;  %v1121_v36 = vmax.f32 %v1120_v35, -1.0 }
 0x268   :  { %v869_v37 = vpop.f32.mrb[36].mxu1 }
 0x269   :  { %1123 = vst [vmem:[#allocation10 + $0x88] sm:$0xff] %v1121_v36  ;;  %v1127_v38 = vadd.f32 %v1121_v36, %v869_v37  ;;  %v1630_v39 = vpop.f32.mrb[37].mxu1 }
 0x26b   :  { %vm1128_vm0 = vcmp.gt.f32.partialorder %v1127_v38, 1.0 }
 0x26c   :  { %v1299_v40 = vsel %vm1128_vm0, 1.0, %v2157_v61  ;;  %v1131_v41 = vsel %vm1128_vm0, 0.0, %v1127_v38 }
 0x26d   :  { %1136 = vst [vmem:[#allocation9 + $0x98] sm:$0xff] %v1299_v40  ;;  %v1132_v42 = vmax.f32 %v1131_v41, -1.0 }
 0x26e   :  { %v874_v43 = vpop.f32.mrb[38].mxu1 }
 0x26f   :  { %1134 = vst [vmem:[#allocation10 + $0x90] sm:$0xff] %v1132_v42  ;;  %v1138_v44 = vadd.f32 %v1132_v42, %v874_v43  ;;  %v1633_v45 = vpop.f32.mrb[39].mxu1 }
 0x271   :  { %vm1139_vm6 = vcmp.gt.f32.partialorder %v1138_v44, 1.0 }
 0x272   :  { %v1300_v46 = vsel %vm1139_vm6, 1.0, %v2157_v61  ;;  %v1142_v47 = vsel %vm1139_vm6, 0.0, %v1138_v44 }
 0x273   :  { %1147 = vst [vmem:[#allocation9 + $0xa0] sm:$0xff] %v1300_v46  ;;  %v1143_v48 = vmax.f32 %v1142_v47, -1.0 }
 0x274   :  { %v879_v49 = vpop.f32.mrb[40].mxu1 }
 0x275   :  { %1145 = vst [vmem:[#allocation10 + $0x98] sm:$0xff] %v1143_v48  ;;  %v1149_v50 = vadd.f32 %v1143_v48, %v879_v49  ;;  %v1636_v51 = vpop.f32.mrb[41].mxu1 }
 0x277   :  { %vm1150_vm7 = vcmp.gt.f32.partialorder %v1149_v50, 1.0 }
 0x278   :  { %v1301_v52 = vsel %vm1150_vm7, 1.0, %v2157_v61  ;;  %v1153_v53 = vsel %vm1150_vm7, 0.0, %v1149_v50 }
 0x279   :  { %1158 = vst [vmem:[#allocation9 + $0xa8] sm:$0xff] %v1301_v52  ;;  %v1154_v54 = vmax.f32 %v1153_v53, -1.0 }
 0x27a   :  { %v884_v55 = vpop.f32.mrb[42].mxu1 }
 0x27b   :  { %1156 = vst [vmem:[#allocation10 + $0xa0] sm:$0xff] %v1154_v54  ;;  %v1160_v56 = vadd.f32 %v1154_v54, %v884_v55  ;;  %v1639_v57 = vpop.f32.mrb[43].mxu1 }
 0x27d   :  { %vm1161_vm8 = vcmp.gt.f32.partialorder %v1160_v56, 1.0 }
 0x27e   :  { %v1302_v58 = vsel %vm1161_vm8, 1.0, %v2157_v61  ;;  %v1164_v59 = vsel %vm1161_vm8, 0.0, %v1160_v56 }
 0x27f   :  { %1169 = vst [vmem:[#allocation9 + $0xb0] sm:$0xff] %v1302_v58  ;;  %v1165_v60 = vmax.f32 %v1164_v59, -1.0 }
 0x280   :  { %v889_v62 = vpop.f32.mrb[44].mxu1 }
 0x281   :  { %1167 = vst [vmem:[#allocation10 + $0xa8] sm:$0xff] %v1165_v60  ;;  %v1171_v63 = vadd.f32 %v1165_v60, %v889_v62  ;;  %v1642_v2 = vpop.f32.mrb[45].mxu1 }
 0x283   :  { %vm1172_vm9 = vcmp.gt.f32.partialorder %v1171_v63, 1.0 }
 0x284   :  { %v1303_v3 = vsel %vm1172_vm9, 1.0, %v2157_v61  ;;  %v1175_v5 = vsel %vm1172_vm9, 0.0, %v1171_v63 }
 0x285   :  { %1180 = vst [vmem:[#allocation9 + $0xb8] sm:$0xff] %v1303_v3  ;;  %v1176_v6 = vmax.f32 %v1175_v5, -1.0 }
 0x286   :  { %v894_v1 = vpop.f32.mrb[46].mxu1 }
 0x287   :  { %1178 = vst [vmem:[#allocation10 + $0xb0] sm:$0xff] %v1176_v6  ;;  %v1182_v7 = vadd.f32 %v1176_v6, %v894_v1  ;;  %v1645_v8 = vpop.f32.mrb[47].mxu1 }
 0x289   :  { %vm1183_vm10 = vcmp.gt.f32.partialorder %v1182_v7, 1.0 }
 0x28a   :  { %v1304_v4 = vsel %vm1183_vm10, 1.0, %v2157_v61  ;;  %v1186_v9 = vsel %vm1183_vm10, 0.0, %v1182_v7 }
 0x28b   :  { %1191 = vst [vmem:[#allocation9 + $0xc0] sm:$0xff] %v1304_v4  ;;  %v1187_v16 = vmax.f32 %v1186_v9, -1.0 }
 0x28c   :  { %v899_v10 = vpop.f32.mrb[48].mxu1 }
 0x28d   :  { %1786 = shalt.err (!%p1783_p0)
}
 0x28e   :  { %s1787_s5 = scalar_lea.hbm %s2205_s3, 3200 }
 0x28f   :  { %p1788_p1 = scmp.ne.s32.totalorder %s2205_s3, %s1787_s5  ;;  %p1791_p2 = scmp.lt.u32.totalorder %s1787_s5, %s2205_s3 }
 0x291   :  { %p1793_p3 = pnand %p1791_p2, %p1788_p1 }
 0x293   :  { %1796 = shalt.err (!%p1793_p3)
}
 0x294   :  { %1210 = dma.vmem_to_hbm [thread:$0]  %s1205_s27, 3200, %s2205_s3, [#allocation5], %s1828_s25, %s1828_s25, %s1829_s26   ;;  %1189 = vst [vmem:[#allocation10 + $0xb8] sm:$0xff] %v1187_v16  ;;  %v1193_v61 = vadd.f32 %v1187_v16, %v899_v10  ;;  %v1648_v11 = vpop.f32.mrb[49].mxu1 }
 0x295   :  { %s1837_s12 = smov [#allocation10]  }
 0x296   :  { %s1216_s13 = sshll.u32 %s1837_s12, 4  ;;  %vm1194_vm11 = vcmp.gt.f32.partialorder %v1193_v61, 1.0  ;;  %s1217_s13 = int_to_ptr.vmem [resolvable:$true] %s1216_s13 }
 0x297   :  { %v1195_v0 = vsel %vm1194_vm11, 0.0, %v1193_v61  ;;  %s1797_s1 = scalar_lea.vmem %s1217_s13, 3200  ;;  %p1802_p5 = scmp.lt.s32.totalorder %s1217_s13, %s1217_s13 }
 0x298   :  { %v1196_v12 = vmax.f32 %v1195_v0, -1.0  ;;  %p1798_p4 = scmp.ne.s32.totalorder %s1217_s13, %s1797_s1  ;;  %p1803_p6 = scmp.lt.s32.totalorder %s1797_s1, %s1797_s1 }
 0x29a   :  { %1198 = vst [vmem:[#allocation10 + $0xc0] sm:$0xff] %v1196_v12  ;;  %p1804_p7 = por %p1803_p6, %p1802_p5 }
 0x29c   :  { %p1805_p8 = pnand %p1804_p7, %p1798_p4 }
 0x29e   :  { %1808 = shalt.err (!%p1805_p8)
}
 0x29f   :  { %s1809_s3 = scalar_lea.hbm %s2206_s4, 3200 }
 0x2a0   :  { %p1810_p9 = scmp.ne.s32.totalorder %s2206_s4, %s1809_s3  ;;  %p1813_p10 = scmp.lt.u32.totalorder %s1809_s3, %s2206_s4 }
 0x2a2   :  { %p1815_p11 = pnand %p1813_p10, %p1810_p9 }
 0x2a4   :  { %1818 = shalt.err (!%p1815_p11)
}
 0x2a5   :  { %1222 = dma.vmem_to_hbm [thread:$0]  %s1217_s13, 3200, %s2206_s4, [#allocation11], %s1828_s25, %s1828_s25, %s1829_s26  }
 0x2a6   :  { %1823 = dma.done.wait [#allocation5], 3200  }
 0x2a7   :  { %1824 = vsyncadd [#allocation5], 4294964096 }
 0x2a8   :  { %1825 = dma.done.wait [#allocation11], 3200  }
 0x2a9   :  { %1826 = vsyncadd [#allocation11], 4294964096 }
 0x2aa   :  { %1229 = vsyncpa [#allocation4], 1 }
 0x2ab   :  { %1230 = vsyncpa [#allocation7], 1 }
 0x2ac   :  { %1231 = vsyncpa [#allocation5], 1 }
 0x2ad   :  { %1232 = vsyncpa [#allocation11], 1 }

</bundles_post_ra>
